<compile_context>
chip_gen: v7x
topology: tpu7x:2x2x1
jax: 0.10.0
libtpu: 0.0.40
codegen_flags: <defaults>
</compile_context>

<pallas_src>
import math
import functools

import jax
import jax.numpy as jnp
from jax.experimental import pallas as pl
from jax.experimental.pallas import tpu as pltpu


# --------------------- in-kernel building blocks (no launches) ---------------------

def _bf16_dot(x, w_ref):
    """MXU matmul with bf16 operands and f32 accumulation."""
    return jnp.dot(x.astype(jnp.bfloat16), w_ref[...],
                   preferred_element_type=jnp.float32)


def _layer_norm(x, g, b, eps=1e-5):
    mu = jnp.mean(x, axis=-1, keepdims=True)
    xc = x - mu
    var = jnp.mean(xc * xc, axis=-1, keepdims=True)
    return xc * jax.lax.rsqrt(var + eps) * g + b


def _split_heads(x, nheads):
    """[L, D] (f32) -> [nheads, L, dh] (bf16) via static lane slices + stack."""
    dh = x.shape[-1] // nheads
    parts = [x[:, h * dh:(h + 1) * dh] for h in range(nheads)]
    return jnp.stack(parts, axis=0).astype(jnp.bfloat16)


def _mha(q, k, v, wo3_ref, bo_ref, nheads, scale):
    """Multi-head attention with all heads batched into single dot_generals.

    q: [Lq, D], k/v: [Lk, D] (f32).  The head-concat + output projection is
    folded into a head-batched matmul against wo3 [H, dh, D] followed by a sum
    over heads; the [1, D] output bias is added exactly once at the end.
    TODO(synk): at real DETR scale (L~850) tile KV with an online-softmax
    (flash-style) accumulator instead of materializing [H, Lq, Lk] scores.
    """
    qh = _split_heads(q * scale, nheads)                       # [H, Lq, dh]
    kh = _split_heads(k, nheads)                               # [H, Lk, dh]
    vh = _split_heads(v, nheads)                               # [H, Lk, dh]
    s = jax.lax.dot_general(qh, kh, (((2,), (2,)), ((0,), (0,))),
                            preferred_element_type=jnp.float32)  # [H, Lq, Lk]
    m = jnp.max(s, axis=-1, keepdims=True)
    p = jnp.exp(s - m)
    p = p * pl.reciprocal(jnp.sum(p, axis=-1, keepdims=True), approx=True)
    o = jax.lax.dot_general(p.astype(jnp.bfloat16), vh,
                            (((2,), (1,)), ((0,), (0,))),
                            preferred_element_type=jnp.float32)  # [H, Lq, dh]
    t = jax.lax.dot_general(o.astype(jnp.bfloat16), wo3_ref[...],
                            (((2,), (1,)), ((0,), (0,))),
                            preferred_element_type=jnp.float32)  # [H, Lq, D]
    return jnp.sum(t, axis=0) + bo_ref[...]


# ------------------------------------ kernels ------------------------------------

def _stem_kernel(x_ref, wp_ref, bp_ref, wi_ref, bi_ref, o_ref):
    # patch-conv (as matmul) + ReLU + 1x1 input_proj, fused, one row tile per step.
    h = jnp.maximum(_bf16_dot(x_ref[...], wp_ref) + bp_ref[...], 0.0)
    o_ref[...] = _bf16_dot(h, wi_ref) + bi_ref[...]


def _encoder_layer_kernel(xq_ref, xkv_ref,
                          wq_ref, qadd_ref, wkv_ref, kvadd_ref, wo3_ref, bo_ref,
                          n1g_ref, n1b_ref,
                          w1_ref, b1_ref, w2_ref, b2_ref,
                          n2g_ref, n2b_ref,
                          out_ref, *, nheads, scale):
    xq = xq_ref[0]                                   # [TQ, D]  q-row tile
    xkv = xkv_ref[0]                                 # [L, D]   full rows (k/v)
    d = xq.shape[-1]
    # q = (x + pos) Wq + bq; the pos@Wq + bq term is precomputed in qadd.
    q = _bf16_dot(xq, wq_ref) + qadd_ref[...]
    # fused [k | v] projection; pos@Wk + bk | bv precomputed in kvadd.
    kv = _bf16_dot(xkv, wkv_ref) + kvadd_ref[...]
    attn = _mha(q, kv[:, :d], kv[:, d:], wo3_ref, bo_ref, nheads, scale)
    x = _layer_norm(xq + attn, n1g_ref[...], n1b_ref[...])      # residual+LN fused
    h = jnp.maximum(_bf16_dot(x, w1_ref) + b1_ref[...], 0.0)    # bias+ReLU fused
    out_ref[0] = _layer_norm(x + _bf16_dot(h, w2_ref) + b2_ref[...],
                             n2g_ref[...], n2b_ref[...])


def _decoder_layer_kernel(tq_ref, tkv_ref, mem_ref,
                          s_wq_ref, s_qadd_ref, s_wkv_ref, s_kvadd_ref,
                          s_wo3_ref, s_bo_ref, n1g_ref, n1b_ref,
                          c_wq_ref, c_qadd_ref, c_wkv_ref, c_kvadd_ref,
                          c_wo3_ref, c_bo_ref, n2g_ref, n2b_ref,
                          w1_ref, b1_ref, w2_ref, b2_ref,
                          n3g_ref, n3b_ref,
                          out_ref, *, nheads, scale):
    t = tq_ref[0]                                    # [TQ, D]  query-row tile
    tkv = tkv_ref[0]                                 # [Q, D]   full queries (k/v)
    mem = mem_ref[0]                                 # [L, D]
    d = t.shape[-1]

    # self-attention: q = k = tgt + query_pos (qpos folded into add terms), v = tgt
    q = _bf16_dot(t, s_wq_ref) + s_qadd_ref[...]
    kv = _bf16_dot(tkv, s_wkv_ref) + s_kvadd_ref[...]
    attn = _mha(q, kv[:, :d], kv[:, d:], s_wo3_ref, s_bo_ref, nheads, scale)
    t = _layer_norm(t + attn, n1g_ref[...], n1b_ref[...])

    # cross-attention: q = tgt + query_pos, k = memory + pos, v = memory
    q = _bf16_dot(t, c_wq_ref) + c_qadd_ref[...]
    kv = _bf16_dot(mem, c_wkv_ref) + c_kvadd_ref[...]
    attn = _mha(q, kv[:, :d], kv[:, d:], c_wo3_ref, c_bo_ref, nheads, scale)
    t = _layer_norm(t + attn, n2g_ref[...], n2b_ref[...])

    # FFN
    h = jnp.maximum(_bf16_dot(t, w1_ref) + b1_ref[...], 0.0)
    out_ref[0] = _layer_norm(t + _bf16_dot(h, w2_ref) + b2_ref[...],
                             n3g_ref[...], n3b_ref[...])


def _head_kernel(tgt_ref, ng_ref, nb_ref,
                 w1_ref, b1_ref, w2_ref, b2_ref,
                 wc_ref, wb_ref, bias_ref, out_ref):
    # decoder final LayerNorm + class head + bbox MLP.  Output is one lane-dense
    # [N, 128] slab: cols [0:nc) = class logits, cols [nc:nc+4) = raw
    # (pre-sigmoid) box coords; the (pre-padded) weights make the store unmasked.
    hs = _layer_norm(tgt_ref[...], ng_ref[...], nb_ref[...])
    h = jnp.maximum(_bf16_dot(hs, w1_ref) + b1_ref[...], 0.0)
    h = jnp.maximum(_bf16_dot(h, w2_ref) + b2_ref[...], 0.0)
    out_ref[...] = (_bf16_dot(hs, wc_ref) + _bf16_dot(h, wb_ref) + bias_ref[...])


# ------------------------------------ wrappers ------------------------------------

def _inv_spec(shape):
    zero = (0,) * len(shape)
    return pl.BlockSpec(tuple(shape), lambda *_: zero)


def _inv(a):
    """Grid-invariant full-array BlockSpec (weights / biases / add terms)."""
    return _inv_spec(a.shape)


def backbone_and_input_proj(images, prep, cfg):
    # TODO(synk): the pretrained ResNet-50 backbone of detr_resnet50 is replaced
    # by a single strided patch-conv stem (conv kernel == stride, as a matmul).
    patch = cfg["patch"]
    B, C, Himg, Wimg = images.shape
    hp, wp = Himg // patch, Wimg // patch
    x = images.reshape(B, C, hp, patch, wp, patch)
    x = x.transpose(0, 2, 4, 1, 3, 5).reshape(B * hp * wp, C * patch * patch)
    M, K = x.shape
    D = cfg["hidden_dim"]
    tm = M if M <= 512 else 512                       # row tiles, weights invariant
    args = [x, prep["stem_w"], prep["stem_b"], prep["proj_w"], prep["proj_b"]]
    in_specs = ([pl.BlockSpec((tm, K), lambda i: (i, 0))]
                + [_inv(a) for a in args[1:]])
    out = pl.pallas_call(
        _stem_kernel,
        out_shape=jax.ShapeDtypeStruct((M, D), jnp.float32),
        grid=(pl.cdiv(M, tm),),
        in_specs=in_specs,
        out_specs=pl.BlockSpec((tm, D), lambda i: (i, 0)),
        compiler_params=pltpu.CompilerParams(dimension_semantics=("parallel",)),
    )(*args)
    return out, hp, wp


def encoder_layer(src, lp, cfg):
    B, L, D = src.shape
    H = cfg["nheads"]
    sa, f = lp["self_attn"], lp["ffn"]
    F = f["w1"].shape[1]
    scale = 1.0 / math.sqrt(D // H)
    tq = L if L <= 128 else 128
    nq = pl.cdiv(L, tq)
    args = [src, src,
            sa["wq"], sa["qadd"], sa["wkv"], sa["kvadd"], sa["wo3"], sa["bo"],
            lp["norm1_g"], lp["norm1_b"],
            f["w1"], f["b1"], f["w2"], f["b2"],
            lp["norm2_g"], lp["norm2_b"]]
    in_specs = ([pl.BlockSpec((1, tq, D), lambda b, qi: (b, qi, 0)),   # q-row tile
                 pl.BlockSpec((1, L, D), lambda b, qi: (b, 0, 0)),     # full k/v rows
                 _inv(sa["wq"]),
                 pl.BlockSpec((tq, D), lambda b, qi: (qi, 0))]         # qadd tile
                + [_inv(a) for a in args[4:]])
    flops = B * (6 * L * D * D + 4 * L * L * D + 2 * L * D * D + 4 * L * D * F)
    bytes_accessed = (sum(int(a.size) * a.dtype.itemsize for a in args)
                      + 4 * B * L * D)
    return pl.pallas_call(
        functools.partial(_encoder_layer_kernel, nheads=H, scale=scale),
        out_shape=jax.ShapeDtypeStruct((B, L, D), jnp.float32),
        grid=(B, nq),
        in_specs=in_specs,
        out_specs=pl.BlockSpec((1, tq, D), lambda b, qi: (b, qi, 0)),
        compiler_params=pltpu.CompilerParams(
            dimension_semantics=("parallel", "parallel")),
        cost_estimate=pl.CostEstimate(flops=int(flops),
                                      transcendentals=int(B * H * L * L),
                                      bytes_accessed=int(bytes_accessed)),
    )(*args)


def decoder_layer(tgt, memory, lp, cfg):
    B, Q, D = tgt.shape
    L = memory.shape[1]
    H = cfg["nheads"]
    sa, ca, f = lp["self_attn"], lp["cross_attn"], lp["ffn"]
    F = f["w1"].shape[1]
    scale = 1.0 / math.sqrt(D // H)
    tq = Q if Q <= 128 else 128
    nq = pl.cdiv(Q, tq)
    args = [tgt, tgt, memory,
            sa["wq"], sa["qadd"], sa["wkv"], sa["kvadd"], sa["wo3"], sa["bo"],
            lp["norm1_g"], lp["norm1_b"],
            ca["wq"], ca["qadd"], ca["wkv"], ca["kvadd"], ca["wo3"], ca["bo"],
            lp["norm2_g"], lp["norm2_b"],
            f["w1"], f["b1"], f["w2"], f["b2"],
            lp["norm3_g"], lp["norm3_b"]]
    in_specs = [pl.BlockSpec((1, tq, D), lambda b, qi: (b, qi, 0)),    # query tile
                pl.BlockSpec((1, Q, D), lambda b, qi: (b, 0, 0)),      # full queries
                pl.BlockSpec((1, L, D), lambda b, qi: (b, 0, 0)),      # memory
                _inv(sa["wq"]),
                pl.BlockSpec((tq, D), lambda b, qi: (qi, 0)),
                _inv(sa["wkv"]), _inv(sa["kvadd"]), _inv(sa["wo3"]), _inv(sa["bo"]),
                _inv(lp["norm1_g"]), _inv(lp["norm1_b"]),
                _inv(ca["wq"]),
                pl.BlockSpec((tq, D), lambda b, qi: (qi, 0)),
                _inv(ca["wkv"]), _inv(ca["kvadd"]), _inv(ca["wo3"]), _inv(ca["bo"]),
                _inv(lp["norm2_g"]), _inv(lp["norm2_b"]),
                _inv(f["w1"]), _inv(f["b1"]), _inv(f["w2"]), _inv(f["b2"]),
                _inv(lp["norm3_g"]), _inv(lp["norm3_b"])]
    flops = B * (10 * Q * D * D + 4 * Q * Q * D
                 + 4 * L * D * D + 4 * Q * L * D + 4 * Q * D * F)
    bytes_accessed = (sum(int(a.size) * a.dtype.itemsize for a in args)
                      + 4 * B * Q * D)
    return pl.pallas_call(
        functools.partial(_decoder_layer_kernel, nheads=H, scale=scale),
        out_shape=jax.ShapeDtypeStruct((B, Q, D), jnp.float32),
        grid=(B, nq),
        in_specs=in_specs,
        out_specs=pl.BlockSpec((1, tq, D), lambda b, qi: (b, qi, 0)),
        compiler_params=pltpu.CompilerParams(
            dimension_semantics=("parallel", "parallel")),
        cost_estimate=pl.CostEstimate(flops=int(flops),
                                      transcendentals=int(B * H * Q * (Q + L)),
                                      bytes_accessed=int(bytes_accessed)),
    )(*args)


def prediction_heads(tgt, prep, cfg):
    B, Q, D = tgt.shape
    nc = cfg["num_classes"]
    PAD = 128
    args = [tgt.reshape(B * Q, D),
            prep["dec_norm_g"], prep["dec_norm_b"],
            prep["bbox_w1"], prep["bbox_b1"], prep["bbox_w2"], prep["bbox_b2"],
            prep["head_wc"], prep["head_wb"], prep["head_bias"]]
    out = pl.pallas_call(
        _head_kernel,
        out_shape=jax.ShapeDtypeStruct((B * Q, PAD), jnp.float32),
        in_specs=[_inv(a) for a in args],
        out_specs=_inv_spec((B * Q, PAD)),
    )(*args)
    logits = out[:, :nc].reshape(B, Q, nc)
    boxes = jax.nn.sigmoid(out[:, nc:nc + 4]).reshape(B, Q, 4)
    return {"pred_logits": logits, "pred_boxes": boxes}


def sine_pos_embed(h, w, d):
    """DETR PositionEmbeddingSine (normalize=True, temperature=1e4), no padding mask."""
    npf = d // 2
    temperature = 10000.0
    eps = 1e-6
    scale = 2.0 * math.pi
    y = (jnp.arange(1, h + 1, dtype=jnp.float32) / (h + eps) * scale)[:, None]
    x = (jnp.arange(1, w + 1, dtype=jnp.float32) / (w + eps) * scale)[None, :]
    y = jnp.broadcast_to(y, (h, w))
    x = jnp.broadcast_to(x, (h, w))
    dim_t = temperature ** (2.0 * (jnp.arange(npf) // 2).astype(jnp.float32) / npf)
    pos_x = x[..., None] / dim_t
    pos_y = y[..., None] / dim_t
    pos_x = jnp.stack([jnp.sin(pos_x[..., 0::2]), jnp.cos(pos_x[..., 1::2])],
                      axis=-1).reshape(h, w, npf)
    pos_y = jnp.stack([jnp.sin(pos_y[..., 0::2]), jnp.cos(pos_y[..., 1::2])],
                      axis=-1).reshape(h, w, npf)
    return jnp.concatenate([pos_y, pos_x], axis=-1).reshape(h * w, d)


def detr_forward(prep, images, cfg):
    B = images.shape[0]
    D = cfg["hidden_dim"]
    Q = cfg["num_queries"]

    src, hp, wp = backbone_and_input_proj(images, prep, cfg)
    L = hp * wp
    memory = src.reshape(B, L, D)

    for lp in prep["encoder"]:
        memory = encoder_layer(memory, lp, cfg)

    tgt = jnp.zeros((B, Q, D), jnp.float32)
    for lp in prep["decoder"]:
        tgt = decoder_layer(tgt, memory, lp, cfg)

    # TODO(synk): aux decoder-layer outputs of the original DETR are not returned.
    return prediction_heads(tgt, prep, cfg)


# ------------------------- one-time parameter preparation -------------------------

def prepare_params(params, cfg, hp, wp):
    """Pack weights once: bf16 casts, fused [k|v] matrices, head-reshaped Wo,
    positional embeddings pre-projected and folded into per-layer bias/add
    terms, and padded lane-dense class/bbox head slabs."""
    D = cfg["hidden_dim"]
    H = cfg["nheads"]
    dh = D // H

    def bf(a):
        return jnp.asarray(a, jnp.bfloat16)

    def row(a):
        return jnp.asarray(a, jnp.float32)[None, :]

    pos = sine_pos_embed(hp, wp, D)                              # [L, D]
    qpos = jnp.asarray(params["query_embed"], jnp.float32)       # [Q, D]

    def attn_pack(a, pos_q, pos_k):
        qadd = (pos_q @ a["wq"] + a["bq"][None, :]).astype(jnp.float32)
        kadd = pos_k @ a["wk"] + a["bk"][None, :]
        vadd = jnp.broadcast_to(a["bv"][None, :], kadd.shape)
        return dict(
            wq=bf(a["wq"]),
            qadd=qadd,
            wkv=bf(jnp.concatenate([a["wk"], a["wv"]], axis=1)),
            kvadd=jnp.concatenate([kadd, vadd], axis=1).astype(jnp.float32),
            wo3=bf(a["wo"].reshape(H, dh, D)),
            bo=row(a["bo"]),
        )

    def ffn_pack(f):
        return dict(w1=bf(f["w1"]), b1=row(f["b1"]),
                    w2=bf(f["w2"]), b2=row(f["b2"]))

    enc = [dict(self_attn=attn_pack(p["self_attn"], pos, pos),
                ffn=ffn_pack(p["ffn"]),
                norm1_g=row(p["norm1_g"]), norm1_b=row(p["norm1_b"]),
                norm2_g=row(p["norm2_g"]), norm2_b=row(p["norm2_b"]))
           for p in params["encoder"]]

    dec = [dict(self_attn=attn_pack(p["self_attn"], qpos, qpos),
                cross_attn=attn_pack(p["cross_attn"], qpos, pos),
                ffn=ffn_pack(p["ffn"]),
                norm1_g=row(p["norm1_g"]), norm1_b=row(p["norm1_b"]),
                norm2_g=row(p["norm2_g"]), norm2_b=row(p["norm2_b"]),
                norm3_g=row(p["norm3_g"]), norm3_b=row(p["norm3_b"]))
           for p in params["decoder"]]

    PAD = 128
    nc = cfg["num_classes"]
    wc = jnp.zeros((D, PAD), jnp.float32).at[:, :nc].set(params["class_w"])
    wb = jnp.zeros((D, PAD), jnp.float32).at[:, nc:nc + 4].set(params["bbox_w3"])
    bias = (jnp.zeros((1, PAD), jnp.float32)
            .at[0, :nc].set(params["class_b"])
            .at[0, nc:nc + 4].set(params["bbox_b3"]))

    return dict(
        stem_w=bf(params["backbone"]["w"]), stem_b=row(params["backbone"]["b"]),
        proj_w=bf(params["input_proj_w"]), proj_b=row(params["input_proj_b"]),
        encoder=enc, decoder=dec,
        dec_norm_g=row(params["dec_norm_g"]), dec_norm_b=row(params["dec_norm_b"]),
        bbox_w1=bf(params["bbox_w1"]), bbox_b1=row(params["bbox_b1"]),
        bbox_w2=bf(params["bbox_w2"]), bbox_b2=row(params["bbox_b2"]),
        head_wc=bf(wc), head_wb=bf(wb), head_bias=bias,
    )


# ---------------------------------- parameter init ----------------------------------

def init_params(key, cfg):
    keys = iter(jax.random.split(key, 256))
    D, F = cfg["hidden_dim"], cfg["ffn_dim"]

    def w(*shape, scale=0.05):
        return jax.random.normal(next(keys), shape, jnp.float32) * scale

    def zeros(*shape):
        return jnp.zeros(shape, jnp.float32)

    def ones(*shape):
        return jnp.ones(shape, jnp.float32)

    def attn_p():
        return dict(wq=w(D, D), bq=zeros(D), wk=w(D, D), bk=zeros(D),
                    wv=w(D, D), bv=zeros(D), wo=w(D, D), bo=zeros(D))

    def ffn_p():
        return dict(w1=w(D, F), b1=zeros(F), w2=w(F, D), b2=zeros(D))

    def enc_p():
        return dict(self_attn=attn_p(), ffn=ffn_p(),
                    norm1_g=ones(D), norm1_b=zeros(D),
                    norm2_g=ones(D), norm2_b=zeros(D))

    def dec_p():
        return dict(self_attn=attn_p(), cross_attn=attn_p(), ffn=ffn_p(),
                    norm1_g=ones(D), norm1_b=zeros(D),
                    norm2_g=ones(D), norm2_b=zeros(D),
                    norm3_g=ones(D), norm3_b=zeros(D))

    patch_in = cfg["in_channels"] * cfg["patch"] * cfg["patch"]
    return dict(
        backbone=dict(w=w(patch_in, cfg["backbone_ch"]), b=zeros(cfg["backbone_ch"])),
        input_proj_w=w(cfg["backbone_ch"], D), input_proj_b=zeros(D),
        encoder=[enc_p() for _ in range(cfg["num_enc_layers"])],
        decoder=[dec_p() for _ in range(cfg["num_dec_layers"])],
        dec_norm_g=ones(D), dec_norm_b=zeros(D),
        query_embed=w(cfg["num_queries"], D, scale=1.0),
        # NOTE: class_embed replaced by nn.Linear(D, num_classes) as in DETRModel
        # (no extra "no-object" logit).
        class_w=w(D, cfg["num_classes"]), class_b=zeros(cfg["num_classes"]),
        bbox_w1=w(D, D), bbox_b1=zeros(D),
        bbox_w2=w(D, D), bbox_b2=zeros(D),
        bbox_w3=w(D, 4), bbox_b3=zeros(4),
    )


# --------------------------------------- main ---------------------------------------

if __name__ == "__main__":
    cfg = dict(
        num_classes=6,      # DETRModel(num_classes=6, ...)
        num_queries=8,      # DETRModel(..., num_queries=8)
        hidden_dim=32,
        nheads=4,
        ffn_dim=64,
        num_enc_layers=1,
        num_dec_layers=1,
        in_channels=4,
        patch=8,
        backbone_ch=16,
    )

    key = jax.random.PRNGKey(0)
    k_img, k_par = jax.random.split(key)
    images = jax.random.normal(k_img, (2, 4, 16, 16), jnp.float32)  # NCHW
    params = init_params(k_par, cfg)

    hp = images.shape[2] // cfg["patch"]
    wp = images.shape[3] // cfg["patch"]
    prep = prepare_params(params, cfg, hp, wp)          # one-time weight packing

    fwd = jax.jit(functools.partial(detr_forward, cfg=cfg))
    out = fwd(prep, images)
    out = jax.block_until_ready(out)

    assert out["pred_logits"].shape == (2, cfg["num_queries"], cfg["num_classes"])
    assert out["pred_boxes"].shape == (2, cfg["num_queries"], 4)
    assert bool(jnp.all(jnp.isfinite(out["pred_logits"])))
    assert bool(jnp.all((out["pred_boxes"] >= 0.0) & (out["pred_boxes"] <= 1.0)))
    print("KERNEL_OK")
</pallas_src>

<mosaic_0001>
module attributes {stable_mosaic.version = 11 : i64} {
  func.func @_stem_kernel(%arg0: i32, %arg1: memref<8x256xf32, #tpu.memory_space<vmem>>, %arg2: memref<256x16xbf16, #tpu.memory_space<vmem>>, %arg3: memref<1x16xf32, #tpu.memory_space<vmem>>, %arg4: memref<16x32xbf16, #tpu.memory_space<vmem>>, %arg5: memref<1x32xf32, #tpu.memory_space<vmem>>, %arg6: memref<8x32xf32, #tpu.memory_space<vmem>>) attributes {dimension_semantics = [#tpu.dimension_semantics<parallel>], iteration_bounds = array<i64: 1>, scalar_prefetch = 0 : i64, scratch_operands = 0 : i64, tpu.core_type = #tpu.core_type<tc>, window_params = [{transform_indices = @transform_0, window_bounds = array<i64: 8, 256>}, {pipeline_mode = #tpu.pipeline_mode<synchronous>, transform_indices = @transform_1, window_bounds = array<i64: 256, 16>}, {pipeline_mode = #tpu.pipeline_mode<synchronous>, transform_indices = @transform_2, window_bounds = array<i64: 1, 16>}, {pipeline_mode = #tpu.pipeline_mode<synchronous>, transform_indices = @transform_3, window_bounds = array<i64: 16, 32>}, {pipeline_mode = #tpu.pipeline_mode<synchronous>, transform_indices = @transform_4, window_bounds = array<i64: 1, 32>}, {transform_indices = @transform_5, window_bounds = array<i64: 8, 32>}]} {
    %c0 = arith.constant 0 : index
    %c0_0 = arith.constant 0 : index
    %0 = vector.load %arg1[%c0, %c0_0] : memref<8x256xf32, #tpu.memory_space<vmem>>, vector<8x256xf32>
    %1 = arith.truncf %0 : vector<8x256xf32> to vector<8x256xbf16>
    %c0_1 = arith.constant 0 : index
    %c0_2 = arith.constant 0 : index
    %2 = vector.load %arg2[%c0_1, %c0_2] : memref<256x16xbf16, #tpu.memory_space<vmem>>, vector<256x16xbf16>
    %cst = arith.constant dense<0.000000e+00> : vector<8x16xf32>
    %3 = tpu.matmul %1, %2, %cst {dimension_numbers = #tpu.dot_dimension_numbers<[1], [0], [0], [1], [0, 0, 1, 1], [], []>} : vector<8x256xbf16>, vector<256x16xbf16>, vector<8x16xf32> -> vector<8x16xf32>
    %c0_3 = arith.constant 0 : index
    %c0_4 = arith.constant 0 : index
    %4 = vector.load %arg3[%c0_3, %c0_4] : memref<1x16xf32, #tpu.memory_space<vmem>>, vector<1x16xf32>
    %5 = vector.broadcast %4 : vector<1x16xf32> to vector<8x16xf32>
    %6 = arith.addf %3, %5 : vector<8x16xf32>
    %cst_5 = arith.constant 0.000000e+00 : f32
    %7 = vector.broadcast %cst_5 : f32 to vector<8x16xf32>
    %8 = arith.maximumf %6, %7 : vector<8x16xf32>
    %9 = arith.truncf %8 : vector<8x16xf32> to vector<8x16xbf16>
    %c0_6 = arith.constant 0 : index
    %c0_7 = arith.constant 0 : index
    %10 = vector.load %arg4[%c0_6, %c0_7] : memref<16x32xbf16, #tpu.memory_space<vmem>>, vector<16x32xbf16>
    %cst_8 = arith.constant dense<0.000000e+00> : vector<8x32xf32>
    %11 = tpu.matmul %9, %10, %cst_8 {dimension_numbers = #tpu.dot_dimension_numbers<[1], [0], [0], [1], [0, 0, 1, 1], [], []>} : vector<8x16xbf16>, vector<16x32xbf16>, vector<8x32xf32> -> vector<8x32xf32>
    %c0_9 = arith.constant 0 : index
    %c0_10 = arith.constant 0 : index
    %12 = vector.load %arg5[%c0_9, %c0_10] : memref<1x32xf32, #tpu.memory_space<vmem>>, vector<1x32xf32>
    %13 = vector.broadcast %12 : vector<1x32xf32> to vector<8x32xf32>
    %14 = arith.addf %11, %13 : vector<8x32xf32>
    %c0_11 = arith.constant 0 : index
    %c0_12 = arith.constant 0 : index
    %15 = vector.load %arg6[%c0_11, %c0_12] : memref<8x32xf32, #tpu.memory_space<vmem>>, vector<8x32xf32>
    tpu.vector_store %arg6[%c0_11, %c0_12], %14 {strides = array<i32>} : memref<8x32xf32, #tpu.memory_space<vmem>>, vector<8x32xf32>,
    return
  }
  func.func @transform_0(%arg0: i32) -> (i32, i32) {
    %c0_i32 = arith.constant 0 : i32
    %c0_i32_0 = arith.constant 0 : i32
    return %arg0, %c0_i32 : i32, i32
  }
  func.func @transform_1(%arg0: i32) -> (i32, i32) {
    %c0_i32 = arith.constant 0 : i32
    %c0_i32_0 = arith.constant 0 : i32
    %c0_i32_1 = arith.constant 0 : i32
    return %c0_i32, %c0_i32_0 : i32, i32
  }
  func.func @transform_2(%arg0: i32) -> (i32, i32) {
    %c0_i32 = arith.constant 0 : i32
    %c0_i32_0 = arith.constant 0 : i32
    %c0_i32_1 = arith.constant 0 : i32
    return %c0_i32, %c0_i32_0 : i32, i32
  }
  func.func @transform_3(%arg0: i32) -> (i32, i32) {
    %c0_i32 = arith.constant 0 : i32
    %c0_i32_0 = arith.constant 0 : i32
    %c0_i32_1 = arith.constant 0 : i32
    return %c0_i32, %c0_i32_0 : i32, i32
  }
  func.func @transform_4(%arg0: i32) -> (i32, i32) {
    %c0_i32 = arith.constant 0 : i32
    %c0_i32_0 = arith.constant 0 : i32
    %c0_i32_1 = arith.constant 0 : i32
    return %c0_i32, %c0_i32_0 : i32, i32
  }
  func.func @transform_5(%arg0: i32) -> (i32, i32) {
    %c0_i32 = arith.constant 0 : i32
    %c0_i32_0 = arith.constant 0 : i32
    return %arg0, %c0_i32 : i32, i32
  }
}

module attributes {stable_mosaic.version = 11 : i64} {
  func.func @_encoder_layer_kernel(%arg0: i32, %arg1: i32, %arg2: memref<1x4x32xf32, #tpu.memory_space<vmem>>, %arg3: memref<1x4x32xf32, #tpu.memory_space<vmem>>, %arg4: memref<32x32xbf16, #tpu.memory_space<vmem>>, %arg5: memref<4x32xf32, #tpu.memory_space<vmem>>, %arg6: memref<32x64xbf16, #tpu.memory_space<vmem>>, %arg7: memref<4x64xf32, #tpu.memory_space<vmem>>, %arg8: memref<4x8x32xbf16, #tpu.memory_space<vmem>>, %arg9: memref<1x32xf32, #tpu.memory_space<vmem>>, %arg10: memref<1x32xf32, #tpu.memory_space<vmem>>, %arg11: memref<1x32xf32, #tpu.memory_space<vmem>>, %arg12: memref<32x64xbf16, #tpu.memory_space<vmem>>, %arg13: memref<1x64xf32, #tpu.memory_space<vmem>>, %arg14: memref<64x32xbf16, #tpu.memory_space<vmem>>, %arg15: memref<1x32xf32, #tpu.memory_space<vmem>>, %arg16: memref<1x32xf32, #tpu.memory_space<vmem>>, %arg17: memref<1x32xf32, #tpu.memory_space<vmem>>, %arg18: memref<1x4x32xf32, #tpu.memory_space<vmem>>) attributes {dimension_semantics = [#tpu.dimension_semantics<parallel>, #tpu.dimension_semantics<parallel>], iteration_bounds = array<i64: 2, 1>, scalar_prefetch = 0 : i64, scratch_operands = 0 : i64, tpu.core_type = #tpu.core_type<tc>, window_params = [{transform_indices = @transform_0, window_bounds = array<i64: 1, 4, 32>}, {transform_indices = @transform_1, window_bounds = array<i64: 1, 4, 32>}, {pipeline_mode = #tpu.pipeline_mode<synchronous>, transform_indices = @transform_2, window_bounds = array<i64: 32, 32>}, {transform_indices = @transform_3, window_bounds = array<i64: 4, 32>}, {pipeline_mode = #tpu.pipeline_mode<synchronous>, transform_indices = @transform_4, window_bounds = array<i64: 32, 64>}, {pipeline_mode = #tpu.pipeline_mode<synchronous>, transform_indices = @transform_5, window_bounds = array<i64: 4, 64>}, {pipeline_mode = #tpu.pipeline_mode<synchronous>, transform_indices = @transform_6, window_bounds = array<i64: 4, 8, 32>}, {pipeline_mode = #tpu.pipeline_mode<synchronous>, transform_indices = @transform_7, window_bounds = array<i64: 1, 32>}, {pipeline_mode = #tpu.pipeline_mode<synchronous>, transform_indices = @transform_8, window_bounds = array<i64: 1, 32>}, {pipeline_mode = #tpu.pipeline_mode<synchronous>, transform_indices = @transform_9, window_bounds = array<i64: 1, 32>}, {pipeline_mode = #tpu.pipeline_mode<synchronous>, transform_indices = @transform_10, window_bounds = array<i64: 32, 64>}, {pipeline_mode = #tpu.pipeline_mode<synchronous>, transform_indices = @transform_11, window_bounds = array<i64: 1, 64>}, {pipeline_mode = #tpu.pipeline_mode<synchronous>, transform_indices = @transform_12, window_bounds = array<i64: 64, 32>}, {pipeline_mode = #tpu.pipeline_mode<synchronous>, transform_indices = @transform_13, window_bounds = array<i64: 1, 32>}, {pipeline_mode = #tpu.pipeline_mode<synchronous>, transform_indices = @transform_14, window_bounds = array<i64: 1, 32>}, {pipeline_mode = #tpu.pipeline_mode<synchronous>, transform_indices = @transform_15, window_bounds = array<i64: 1, 32>}, {transform_indices = @transform_16, window_bounds = array<i64: 1, 4, 32>}]} {
    %c0 = arith.constant 0 : index
    %c0_0 = arith.constant 0 : index
    %c0_1 = arith.constant 0 : index
    %0 = vector.load %arg2[%c0, %c0_0, %c0_1] : memref<1x4x32xf32, #tpu.memory_space<vmem>>, vector<1x4x32xf32>
    %1 = vector.shape_cast %0 : vector<1x4x32xf32> to vector<4x32xf32>
    %c0_2 = arith.constant 0 : index
    %c0_3 = arith.constant 0 : index
    %c0_4 = arith.constant 0 : index
    %2 = vector.load %arg3[%c0_2, %c0_3, %c0_4] : memref<1x4x32xf32, #tpu.memory_space<vmem>>, vector<1x4x32xf32>
    %3 = vector.shape_cast %2 : vector<1x4x32xf32> to vector<4x32xf32>
    %4 = arith.truncf %1 : vector<4x32xf32> to vector<4x32xbf16>
    %c0_5 = arith.constant 0 : index
    %c0_6 = arith.constant 0 : index
    %5 = vector.load %arg4[%c0_5, %c0_6] : memref<32x32xbf16, #tpu.memory_space<vmem>>, vector<32x32xbf16>
    %cst = arith.constant dense<0.000000e+00> : vector<4x32xf32>
    %6 = tpu.matmul %4, %5, %cst {dimension_numbers = #tpu.dot_dimension_numbers<[1], [0], [0], [1], [0, 0, 1, 1], [], []>} : vector<4x32xbf16>, vector<32x32xbf16>, vector<4x32xf32> -> vector<4x32xf32>
    %c0_7 = arith.constant 0 : index
    %c0_8 = arith.constant 0 : index
    %7 = vector.load %arg5[%c0_7, %c0_8] : memref<4x32xf32, #tpu.memory_space<vmem>>, vector<4x32xf32>
    %8 = arith.addf %6, %7 : vector<4x32xf32>
    %9 = arith.truncf %3 : vector<4x32xf32> to vector<4x32xbf16>
    %c0_9 = arith.constant 0 : index
    %c0_10 = arith.constant 0 : index
    %10 = vector.load %arg6[%c0_9, %c0_10] : memref<32x64xbf16, #tpu.memory_space<vmem>>, vector<32x64xbf16>
    %cst_11 = arith.constant dense<0.000000e+00> : vector<4x64xf32>
    %11 = tpu.matmul %9, %10, %cst_11 {dimension_numbers = #tpu.dot_dimension_numbers<[1], [0], [0], [1], [0, 0, 1, 1], [], []>} : vector<4x32xbf16>, vector<32x64xbf16>, vector<4x64xf32> -> vector<4x64xf32>
    %c0_12 = arith.constant 0 : index
    %c0_13 = arith.constant 0 : index
    %12 = vector.load %arg7[%c0_12, %c0_13] : memref<4x64xf32, #tpu.memory_space<vmem>>, vector<4x64xf32>
    %13 = arith.addf %11, %12 : vector<4x64xf32>
    %14 = vector.extract_strided_slice %13 {offsets = [0, 0], sizes = [4, 32], strides = [1, 1]} : vector<4x64xf32> to vector<4x32xf32>
    %15 = vector.extract_strided_slice %13 {offsets = [0, 32], sizes = [4, 32], strides = [1, 1]} : vector<4x64xf32> to vector<4x32xf32>
    %cst_14 = arith.constant 0.353553385 : f32
    %16 = vector.broadcast %cst_14 : f32 to vector<4x32xf32>
    %17 = arith.mulf %8, %16 : vector<4x32xf32>
    %18 = vector.extract_strided_slice %17 {offsets = [0, 0], sizes = [4, 8], strides = [1, 1]} : vector<4x32xf32> to vector<4x8xf32>
    %19 = vector.extract_strided_slice %17 {offsets = [0, 8], sizes = [4, 8], strides = [1, 1]} : vector<4x32xf32> to vector<4x8xf32>
    %20 = vector.extract_strided_slice %17 {offsets = [0, 16], sizes = [4, 8], strides = [1, 1]} : vector<4x32xf32> to vector<4x8xf32>
    %21 = vector.extract_strided_slice %17 {offsets = [0, 24], sizes = [4, 8], strides = [1, 1]} : vector<4x32xf32> to vector<4x8xf32>
    %22 = vector.shape_cast %18 : vector<4x8xf32> to vector<1x4x8xf32>
    %23 = vector.shape_cast %19 : vector<4x8xf32> to vector<1x4x8xf32>
    %24 = vector.shape_cast %20 : vector<4x8xf32> to vector<1x4x8xf32>
    %25 = vector.shape_cast %21 : vector<4x8xf32> to vector<1x4x8xf32>
    %26 = tpu.concatenate %22, %23, %24, %25 in 0 : vector<1x4x8xf32>, vector<1x4x8xf32>, vector<1x4x8xf32>, vector<1x4x8xf32> -> vector<4x4x8xf32>
    %27 = arith.truncf %26 : vector<4x4x8xf32> to vector<4x4x8xbf16>
    %28 = vector.extract_strided_slice %14 {offsets = [0, 0], sizes = [4, 8], strides = [1, 1]} : vector<4x32xf32> to vector<4x8xf32>
    %29 = vector.extract_strided_slice %14 {offsets = [0, 8], sizes = [4, 8], strides = [1, 1]} : vector<4x32xf32> to vector<4x8xf32>
    %30 = vector.extract_strided_slice %14 {offsets = [0, 16], sizes = [4, 8], strides = [1, 1]} : vector<4x32xf32> to vector<4x8xf32>
    %31 = vector.extract_strided_slice %14 {offsets = [0, 24], sizes = [4, 8], strides = [1, 1]} : vector<4x32xf32> to vector<4x8xf32>
    %32 = vector.shape_cast %28 : vector<4x8xf32> to vector<1x4x8xf32>
    %33 = vector.shape_cast %29 : vector<4x8xf32> to vector<1x4x8xf32>
    %34 = vector.shape_cast %30 : vector<4x8xf32> to vector<1x4x8xf32>
    %35 = vector.shape_cast %31 : vector<4x8xf32> to vector<1x4x8xf32>
    %36 = tpu.concatenate %32, %33, %34, %35 in 0 : vector<1x4x8xf32>, vector<1x4x8xf32>, vector<1x4x8xf32>, vector<1x4x8xf32> -> vector<4x4x8xf32>
    %37 = arith.truncf %36 : vector<4x4x8xf32> to vector<4x4x8xbf16>
    %38 = vector.extract_strided_slice %15 {offsets = [0, 0], sizes = [4, 8], strides = [1, 1]} : vector<4x32xf32> to vector<4x8xf32>
    %39 = vector.extract_strided_slice %15 {offsets = [0, 8], sizes = [4, 8], strides = [1, 1]} : vector<4x32xf32> to vector<4x8xf32>
    %40 = vector.extract_strided_slice %15 {offsets = [0, 16], sizes = [4, 8], strides = [1, 1]} : vector<4x32xf32> to vector<4x8xf32>
    %41 = vector.extract_strided_slice %15 {offsets = [0, 24], sizes = [4, 8], strides = [1, 1]} : vector<4x32xf32> to vector<4x8xf32>
    %42 = vector.shape_cast %38 : vector<4x8xf32> to vector<1x4x8xf32>
    %43 = vector.shape_cast %39 : vector<4x8xf32> to vector<1x4x8xf32>
    %44 = vector.shape_cast %40 : vector<4x8xf32> to vector<1x4x8xf32>
    %45 = vector.shape_cast %41 : vector<4x8xf32> to vector<1x4x8xf32>
    %46 = tpu.concatenate %42, %43, %44, %45 in 0 : vector<1x4x8xf32>, vector<1x4x8xf32>, vector<1x4x8xf32>, vector<1x4x8xf32> -> vector<4x4x8xf32>
    %47 = arith.truncf %46 : vector<4x4x8xf32> to vector<4x4x8xbf16>
    %cst_15 = arith.constant dense<0.000000e+00> : vector<4x4x4xf32>
    %48 = tpu.matmul %27, %37, %cst_15 {dimension_numbers = #tpu.dot_dimension_numbers<[2], [2], [1], [1], [0, 0, 0, 1, 1, 1], [0], [0]>} : vector<4x4x8xbf16>, vector<4x4x8xbf16>, vector<4x4x4xf32> -> vector<4x4x4xf32>
    %cst_16 = arith.constant dense<0xFF800000> : vector<4x4xf32>
    %49 = vector.multi_reduction <maximumf>, %48, %cst_16 [2] : vector<4x4x4xf32> to vector<4x4xf32>
    %50 = vector.shape_cast %49 : vector<4x4xf32> to vector<4x4x1xf32>
    %51 = vector.broadcast %50 : vector<4x4x1xf32> to vector<4x4x4xf32>
    %52 = arith.subf %48, %51 : vector<4x4x4xf32>
    %53 = math.exp %52 : vector<4x4x4xf32>
    %cst_17 = arith.constant dense<0.000000e+00> : vector<4x4xf32>
    %54 = vector.multi_reduction <add>, %53, %cst_17 [2] : vector<4x4x4xf32> to vector<4x4xf32>
    %55 = vector.shape_cast %54 : vector<4x4xf32> to vector<4x4x1xf32>
    %56 = tpu.reciprocal %55 {approx = true} : vector<4x4x1xf32> -> vector<4x4x1xf32>
    %57 = vector.broadcast %56 : vector<4x4x1xf32> to vector<4x4x4xf32>
    %58 = arith.mulf %53, %57 : vector<4x4x4xf32>
    %59 = arith.truncf %58 : vector<4x4x4xf32> to vector<4x4x4xbf16>
    %cst_18 = arith.constant dense<0.000000e+00> : vector<4x4x8xf32>
    %60 = tpu.matmul %59, %47, %cst_18 {dimension_numbers = #tpu.dot_dimension_numbers<[2], [1], [1], [2], [0, 0, 0, 1, 1, 2], [0], [0]>} : vector<4x4x4xbf16>, vector<4x4x8xbf16>, vector<4x4x8xf32> -> vector<4x4x8xf32>
    %61 = arith.truncf %60 : vector<4x4x8xf32> to vector<4x4x8xbf16>
    %c0_19 = arith.constant 0 : index
    %c0_20 = arith.constant 0 : index
    %c0_21 = arith.constant 0 : index
    %62 = vector.load %arg8[%c0_19, %c0_20, %c0_21] : memref<4x8x32xbf16, #tpu.memory_space<vmem>>, vector<4x8x32xbf16>
    %cst_22 = arith.constant dense<0.000000e+00> : vector<4x4x32xf32>
    %63 = tpu.matmul %61, %62, %cst_22 {dimension_numbers = #tpu.dot_dimension_numbers<[2], [1], [1], [2], [0, 0, 0, 1, 1, 2], [0], [0]>} : vector<4x4x8xbf16>, vector<4x8x32xbf16>, vector<4x4x32xf32> -> vector<4x4x32xf32>
    %cst_23 = arith.constant dense<0.000000e+00> : vector<4x32xf32>
    %64 = vector.multi_reduction <add>, %63, %cst_23 [0] : vector<4x4x32xf32> to vector<4x32xf32>
    %c0_24 = arith.constant 0 : index
    %c0_25 = arith.constant 0 : index
    %65 = vector.load %arg9[%c0_24, %c0_25] : memref<1x32xf32, #tpu.memory_space<vmem>>, vector<1x32xf32>
    %66 = vector.broadcast %65 : vector<1x32xf32> to vector<4x32xf32>
    %67 = arith.addf %64, %66 : vector<4x32xf32>
    %68 = arith.addf %1, %67 : vector<4x32xf32>
    %c0_26 = arith.constant 0 : index
    %c0_27 = arith.constant 0 : index
    %69 = vector.load %arg10[%c0_26, %c0_27] : memref<1x32xf32, #tpu.memory_space<vmem>>, vector<1x32xf32>
    %c0_28 = arith.constant 0 : index
    %c0_29 = arith.constant 0 : index
    %70 = vector.load %arg11[%c0_28, %c0_29] : memref<1x32xf32, #tpu.memory_space<vmem>>, vector<1x32xf32>
    %cst_30 = arith.constant dense<0.000000e+00> : vector<4xf32>
    %71 = vector.multi_reduction <add>, %68, %cst_30 [1] : vector<4x32xf32> to vector<4xf32>
    %72 = vector.shape_cast %71 : vector<4xf32> to vector<4x1xf32>
    %cst_31 = arith.constant 3.200000e+01 : f32
    %73 = vector.broadcast %cst_31 : f32 to vector<4x1xf32>
    %74 = arith.divf %72, %73 : vector<4x1xf32>
    %75 = vector.broadcast %74 : vector<4x1xf32> to vector<4x32xf32>
    %76 = arith.subf %68, %75 : vector<4x32xf32>
    %77 = arith.mulf %76, %76 : vector<4x32xf32>
    %cst_32 = arith.constant dense<0.000000e+00> : vector<4xf32>
    %78 = vector.multi_reduction <add>, %77, %cst_32 [1] : vector<4x32xf32> to vector<4xf32>
    %79 = vector.shape_cast %78 : vector<4xf32> to vector<4x1xf32>
    %cst_33 = arith.constant 3.200000e+01 : f32
    %80 = vector.broadcast %cst_33 : f32 to vector<4x1xf32>
    %81 = arith.divf %79, %80 : vector<4x1xf32>
    %cst_34 = arith.constant 9.99999974E-6 : f32
    %82 = vector.broadcast %cst_34 : f32 to vector<4x1xf32>
    %83 = arith.addf %81, %82 : vector<4x1xf32>
    %84 = math.rsqrt %83 : vector<4x1xf32>
    %85 = vector.broadcast %84 : vector<4x1xf32> to vector<4x32xf32>
    %86 = arith.mulf %76, %85 : vector<4x32xf32>
    %87 = vector.broadcast %69 : vector<1x32xf32> to vector<4x32xf32>
    %88 = arith.mulf %86, %87 : vector<4x32xf32>
    %89 = vector.broadcast %70 : vector<1x32xf32> to vector<4x32xf32>
    %90 = arith.addf %88, %89 : vector<4x32xf32>
    %91 = arith.truncf %90 : vector<4x32xf32> to vector<4x32xbf16>
    %c0_35 = arith.constant 0 : index
    %c0_36 = arith.constant 0 : index
    %92 = vector.load %arg12[%c0_35, %c0_36] : memref<32x64xbf16, #tpu.memory_space<vmem>>, vector<32x64xbf16>
    %cst_37 = arith.constant dense<0.000000e+00> : vector<4x64xf32>
    %93 = tpu.matmul %91, %92, %cst_37 {dimension_numbers = #tpu.dot_dimension_numbers<[1], [0], [0], [1], [0, 0, 1, 1], [], []>} : vector<4x32xbf16>, vector<32x64xbf16>, vector<4x64xf32> -> vector<4x64xf32>
    %c0_38 = arith.constant 0 : index
    %c0_39 = arith.constant 0 : index
    %94 = vector.load %arg13[%c0_38, %c0_39] : memref<1x64xf32, #tpu.memory_space<vmem>>, vector<1x64xf32>
    %95 = vector.broadcast %94 : vector<1x64xf32> to vector<4x64xf32>
    %96 = arith.addf %93, %95 : vector<4x64xf32>
    %cst_40 = arith.constant 0.000000e+00 : f32
    %97 = vector.broadcast %cst_40 : f32 to vector<4x64xf32>
    %98 = arith.maximumf %96, %97 : vector<4x64xf32>
    %99 = arith.truncf %98 : vector<4x64xf32> to vector<4x64xbf16>
    %c0_41 = arith.constant 0 : index
    %c0_42 = arith.constant 0 : index
    %100 = vector.load %arg14[%c0_41, %c0_42] : memref<64x32xbf16, #tpu.memory_space<vmem>>, vector<64x32xbf16>
    %cst_43 = arith.constant dense<0.000000e+00> : vector<4x32xf32>
    %101 = tpu.matmul %99, %100, %cst_43 {dimension_numbers = #tpu.dot_dimension_numbers<[1], [0], [0], [1], [0, 0, 1, 1], [], []>} : vector<4x64xbf16>, vector<64x32xbf16>, vector<4x32xf32> -> vector<4x32xf32>
    %102 = arith.addf %90, %101 : vector<4x32xf32>
    %c0_44 = arith.constant 0 : index
    %c0_45 = arith.constant 0 : index
    %103 = vector.load %arg15[%c0_44, %c0_45] : memref<1x32xf32, #tpu.memory_space<vmem>>, vector<1x32xf32>
    %104 = vector.broadcast %103 : vector<1x32xf32> to vector<4x32xf32>
    %105 = arith.addf %102, %104 : vector<4x32xf32>
    %c0_46 = arith.constant 0 : index
    %c0_47 = arith.constant 0 : index
    %106 = vector.load %arg16[%c0_46, %c0_47] : memref<1x32xf32, #tpu.memory_space<vmem>>, vector<1x32xf32>
    %c0_48 = arith.constant 0 : index
    %c0_49 = arith.constant 0 : index
    %107 = vector.load %arg17[%c0_48, %c0_49] : memref<1x32xf32, #tpu.memory_space<vmem>>, vector<1x32xf32>
    %cst_50 = arith.constant dense<0.000000e+00> : vector<4xf32>
    %108 = vector.multi_reduction <add>, %105, %cst_50 [1] : vector<4x32xf32> to vector<4xf32>
    %109 = vector.shape_cast %108 : vector<4xf32> to vector<4x1xf32>
    %cst_51 = arith.constant 3.200000e+01 : f32
    %110 = vector.broadcast %cst_51 : f32 to vector<4x1xf32>
    %111 = arith.divf %109, %110 : vector<4x1xf32>
    %112 = vector.broadcast %111 : vector<4x1xf32> to vector<4x32xf32>
    %113 = arith.subf %105, %112 : vector<4x32xf32>
    %114 = arith.mulf %113, %113 : vector<4x32xf32>
    %cst_52 = arith.constant dense<0.000000e+00> : vector<4xf32>
    %115 = vector.multi_reduction <add>, %114, %cst_52 [1] : vector<4x32xf32> to vector<4xf32>
    %116 = vector.shape_cast %115 : vector<4xf32> to vector<4x1xf32>
    %cst_53 = arith.constant 3.200000e+01 : f32
    %117 = vector.broadcast %cst_53 : f32 to vector<4x1xf32>
    %118 = arith.divf %116, %117 : vector<4x1xf32>
    %cst_54 = arith.constant 9.99999974E-6 : f32
    %119 = vector.broadcast %cst_54 : f32 to vector<4x1xf32>
    %120 = arith.addf %118, %119 : vector<4x1xf32>
    %121 = math.rsqrt %120 : vector<4x1xf32>
    %122 = vector.broadcast %121 : vector<4x1xf32> to vector<4x32xf32>
    %123 = arith.mulf %113, %122 : vector<4x32xf32>
    %124 = vector.broadcast %106 : vector<1x32xf32> to vector<4x32xf32>
    %125 = arith.mulf %123, %124 : vector<4x32xf32>
    %126 = vector.broadcast %107 : vector<1x32xf32> to vector<4x32xf32>
    %127 = arith.addf %125, %126 : vector<4x32xf32>
    %c0_55 = arith.constant 0 : index
    %c0_56 = arith.constant 0 : index
    %c0_57 = arith.constant 0 : index
    %128 = vector.load %arg18[%c0_55, %c0_56, %c0_57] : memref<1x4x32xf32, #tpu.memory_space<vmem>>, vector<1x4x32xf32>
    %129 = vector.shape_cast %128 : vector<1x4x32xf32> to vector<4x32xf32>
    %130 = vector.shape_cast %127 : vector<4x32xf32> to vector<1x4x32xf32>
    tpu.vector_store %arg18[%c0_55, %c0_56, %c0_57], %130 {strides = array<i32>} : memref<1x4x32xf32, #tpu.memory_space<vmem>>, vector<1x4x32xf32>,
    return
  }
  func.func @transform_0(%arg0: i32, %arg1: i32) -> (i32, i32, i32) {
    %c0_i32 = arith.constant 0 : i32
    %c0_i32_0 = arith.constant 0 : i32
    return %arg0, %arg1, %c0_i32 : i32, i32, i32
  }
  func.func @transform_1(%arg0: i32, %arg1: i32) -> (i32, i32, i32) {
    %c0_i32 = arith.constant 0 : i32
    %c0_i32_0 = arith.constant 0 : i32
    %c0_i32_1 = arith.constant 0 : i32
    return %arg0, %c0_i32, %c0_i32_0 : i32, i32, i32
  }
  func.func @transform_2(%arg0: i32, %arg1: i32) -> (i32, i32) {
    %c0_i32 = arith.constant 0 : i32
    %c0_i32_0 = arith.constant 0 : i32
    %c0_i32_1 = arith.constant 0 : i32
    return %c0_i32, %c0_i32_0 : i32, i32
  }
  func.func @transform_3(%arg0: i32, %arg1: i32) -> (i32, i32) {
    %c0_i32 = arith.constant 0 : i32
    %c0_i32_0 = arith.constant 0 : i32
    return %arg1, %c0_i32 : i32, i32
  }
  func.func @transform_4(%arg0: i32, %arg1: i32) -> (i32, i32) {
    %c0_i32 = arith.constant 0 : i32
    %c0_i32_0 = arith.constant 0 : i32
    %c0_i32_1 = arith.constant 0 : i32
    return %c0_i32, %c0_i32_0 : i32, i32
  }
  func.func @transform_5(%arg0: i32, %arg1: i32) -> (i32, i32) {
    %c0_i32 = arith.constant 0 : i32
    %c0_i32_0 = arith.constant 0 : i32
    %c0_i32_1 = arith.constant 0 : i32
    return %c0_i32, %c0_i32_0 : i32, i32
  }
  func.func @transform_6(%arg0: i32, %arg1: i32) -> (i32, i32, i32) {
    %c0_i32 = arith.constant 0 : i32
    %c0_i32_0 = arith.constant 0 : i32
    %c0_i32_1 = arith.constant 0 : i32
    %c0_i32_2 = arith.constant 0 : i32
    return %c0_i32, %c0_i32_0, %c0_i32_1 : i32, i32, i32
  }
  func.func @transform_7(%arg0: i32, %arg1: i32) -> (i32, i32) {
    %c0_i32 = arith.constant 0 : i32
    %c0_i32_0 = arith.constant 0 : i32
    %c0_i32_1 = arith.constant 0 : i32
    return %c0_i32, %c0_i32_0 : i32, i32
  }
  func.func @transform_8(%arg0: i32, %arg1: i32) -> (i32, i32) {
    %c0_i32 = arith.constant 0 : i32
    %c0_i32_0 = arith.constant 0 : i32
    %c0_i32_1 = arith.constant 0 : i32
    return %c0_i32, %c0_i32_0 : i32, i32
  }
  func.func @transform_9(%arg0: i32, %arg1: i32) -> (i32, i32) {
    %c0_i32 = arith.constant 0 : i32
    %c0_i32_0 = arith.constant 0 : i32
    %c0_i32_1 = arith.constant 0 : i32
    return %c0_i32, %c0_i32_0 : i32, i32
  }
  func.func @transform_10(%arg0: i32, %arg1: i32) -> (i32, i32) {
    %c0_i32 = arith.constant 0 : i32
    %c0_i32_0 = arith.constant 0 : i32
    %c0_i32_1 = arith.constant 0 : i32
    return %c0_i32, %c0_i32_0 : i32, i32
  }
  func.func @transform_11(%arg0: i32, %arg1: i32) -> (i32, i32) {
    %c0_i32 = arith.constant 0 : i32
    %c0_i32_0 = arith.constant 0 : i32
    %c0_i32_1 = arith.constant 0 : i32
    return %c0_i32, %c0_i32_0 : i32, i32
  }
  func.func @transform_12(%arg0: i32, %arg1: i32) -> (i32, i32) {
    %c0_i32 = arith.constant 0 : i32
    %c0_i32_0 = arith.constant 0 : i32
    %c0_i32_1 = arith.constant 0 : i32
    return %c0_i32, %c0_i32_0 : i32, i32
  }
  func.func @transform_13(%arg0: i32, %arg1: i32) -> (i32, i32) {
    %c0_i32 = arith.constant 0 : i32
    %c0_i32_0 = arith.constant 0 : i32
    %c0_i32_1 = arith.constant 0 : i32
    return %c0_i32, %c0_i32_0 : i32, i32
  }
  func.func @transform_14(%arg0: i32, %arg1: i32) -> (i32, i32) {
    %c0_i32 = arith.constant 0 : i32
    %c0_i32_0 = arith.constant 0 : i32
    %c0_i32_1 = arith.constant 0 : i32
    return %c0_i32, %c0_i32_0 : i32, i32
  }
  func.func @transform_15(%arg0: i32, %arg1: i32) -> (i32, i32) {
    %c0_i32 = arith.constant 0 : i32
    %c0_i32_0 = arith.constant 0 : i32
    %c0_i32_1 = arith.constant 0 : i32
    return %c0_i32, %c0_i32_0 : i32, i32
  }
  func.func @transform_16(%arg0: i32, %arg1: i32) -> (i32, i32, i32) {
    %c0_i32 = arith.constant 0 : i32
    %c0_i32_0 = arith.constant 0 : i32
    return %arg0, %arg1, %c0_i32 : i32, i32, i32
  }
}

module attributes {stable_mosaic.version = 11 : i64} {
  func.func @_head_kernel(%arg0: memref<16x32xf32, #tpu.memory_space<vmem>>, %arg1: memref<1x32xf32, #tpu.memory_space<vmem>>, %arg2: memref<1x32xf32, #tpu.memory_space<vmem>>, %arg3: memref<32x32xbf16, #tpu.memory_space<vmem>>, %arg4: memref<1x32xf32, #tpu.memory_space<vmem>>, %arg5: memref<32x32xbf16, #tpu.memory_space<vmem>>, %arg6: memref<1x32xf32, #tpu.memory_space<vmem>>, %arg7: memref<32x128xbf16, #tpu.memory_space<vmem>>, %arg8: memref<32x128xbf16, #tpu.memory_space<vmem>>, %arg9: memref<1x128xf32, #tpu.memory_space<vmem>>, %arg10: memref<16x128xf32, #tpu.memory_space<vmem>>) attributes {dimension_semantics = [], scalar_prefetch = 0 : i64, scratch_operands = 0 : i64, tpu.core_type = #tpu.core_type<tc>} {
    %c0 = arith.constant 0 : index
    %c0_0 = arith.constant 0 : index
    %0 = vector.load %arg0[%c0, %c0_0] : memref<16x32xf32, #tpu.memory_space<vmem>>, vector<16x32xf32>
    %c0_1 = arith.constant 0 : index
    %c0_2 = arith.constant 0 : index
    %1 = vector.load %arg1[%c0_1, %c0_2] : memref<1x32xf32, #tpu.memory_space<vmem>>, vector<1x32xf32>
    %c0_3 = arith.constant 0 : index
    %c0_4 = arith.constant 0 : index
    %2 = vector.load %arg2[%c0_3, %c0_4] : memref<1x32xf32, #tpu.memory_space<vmem>>, vector<1x32xf32>
    %cst = arith.constant dense<0.000000e+00> : vector<16xf32>
    %3 = vector.multi_reduction <add>, %0, %cst [1] : vector<16x32xf32> to vector<16xf32>
    %4 = vector.shape_cast %3 : vector<16xf32> to vector<16x1xf32>
    %cst_5 = arith.constant 3.200000e+01 : f32
    %5 = vector.broadcast %cst_5 : f32 to vector<16x1xf32>
    %6 = arith.divf %4, %5 : vector<16x1xf32>
    %7 = vector.broadcast %6 : vector<16x1xf32> to vector<16x32xf32>
    %8 = arith.subf %0, %7 : vector<16x32xf32>
    %9 = arith.mulf %8, %8 : vector<16x32xf32>
    %cst_6 = arith.constant dense<0.000000e+00> : vector<16xf32>
    %10 = vector.multi_reduction <add>, %9, %cst_6 [1] : vector<16x32xf32> to vector<16xf32>
    %11 = vector.shape_cast %10 : vector<16xf32> to vector<16x1xf32>
    %cst_7 = arith.constant 3.200000e+01 : f32
    %12 = vector.broadcast %cst_7 : f32 to vector<16x1xf32>
    %13 = arith.divf %11, %12 : vector<16x1xf32>
    %cst_8 = arith.constant 9.99999974E-6 : f32
    %14 = vector.broadcast %cst_8 : f32 to vector<16x1xf32>
    %15 = arith.addf %13, %14 : vector<16x1xf32>
    %16 = math.rsqrt %15 : vector<16x1xf32>
    %17 = vector.broadcast %16 : vector<16x1xf32> to vector<16x32xf32>
    %18 = arith.mulf %8, %17 : vector<16x32xf32>
    %19 = vector.broadcast %1 : vector<1x32xf32> to vector<16x32xf32>
    %20 = arith.mulf %18, %19 : vector<16x32xf32>
    %21 = vector.broadcast %2 : vector<1x32xf32> to vector<16x32xf32>
    %22 = arith.addf %20, %21 : vector<16x32xf32>
    %23 = arith.truncf %22 : vector<16x32xf32> to vector<16x32xbf16>
    %c0_9 = arith.constant 0 : index
    %c0_10 = arith.constant 0 : index
    %24 = vector.load %arg3[%c0_9, %c0_10] : memref<32x32xbf16, #tpu.memory_space<vmem>>, vector<32x32xbf16>
    %cst_11 = arith.constant dense<0.000000e+00> : vector<16x32xf32>
    %25 = tpu.matmul %23, %24, %cst_11 {dimension_numbers = #tpu.dot_dimension_numbers<[1], [0], [0], [1], [0, 0, 1, 1], [], []>} : vector<16x32xbf16>, vector<32x32xbf16>, vector<16x32xf32> -> vector<16x32xf32>
    %c0_12 = arith.constant 0 : index
    %c0_13 = arith.constant 0 : index
    %26 = vector.load %arg4[%c0_12, %c0_13] : memref<1x32xf32, #tpu.memory_space<vmem>>, vector<1x32xf32>
    %27 = vector.broadcast %26 : vector<1x32xf32> to vector<16x32xf32>
    %28 = arith.addf %25, %27 : vector<16x32xf32>
    %cst_14 = arith.constant 0.000000e+00 : f32
    %29 = vector.broadcast %cst_14 : f32 to vector<16x32xf32>
    %30 = arith.maximumf %28, %29 : vector<16x32xf32>
    %31 = arith.truncf %30 : vector<16x32xf32> to vector<16x32xbf16>
    %c0_15 = arith.constant 0 : index
    %c0_16 = arith.constant 0 : index
    %32 = vector.load %arg5[%c0_15, %c0_16] : memref<32x32xbf16, #tpu.memory_space<vmem>>, vector<32x32xbf16>
    %cst_17 = arith.constant dense<0.000000e+00> : vector<16x32xf32>
    %33 = tpu.matmul %31, %32, %cst_17 {dimension_numbers = #tpu.dot_dimension_numbers<[1], [0], [0], [1], [0, 0, 1, 1], [], []>} : vector<16x32xbf16>, vector<32x32xbf16>, vector<16x32xf32> -> vector<16x32xf32>
    %c0_18 = arith.constant 0 : index
    %c0_19 = arith.constant 0 : index
    %34 = vector.load %arg6[%c0_18, %c0_19] : memref<1x32xf32, #tpu.memory_space<vmem>>, vector<1x32xf32>
    %35 = vector.broadcast %34 : vector<1x32xf32> to vector<16x32xf32>
    %36 = arith.addf %33, %35 : vector<16x32xf32>
    %cst_20 = arith.constant 0.000000e+00 : f32
    %37 = vector.broadcast %cst_20 : f32 to vector<16x32xf32>
    %38 = arith.maximumf %36, %37 : vector<16x32xf32>
    %39 = arith.truncf %22 : vector<16x32xf32> to vector<16x32xbf16>
    %c0_21 = arith.constant 0 : index
    %c0_22 = arith.constant 0 : index
    %40 = vector.load %arg7[%c0_21, %c0_22] : memref<32x128xbf16, #tpu.memory_space<vmem>>, vector<32x128xbf16>
    %cst_23 = arith.constant dense<0.000000e+00> : vector<16x128xf32>
    %41 = tpu.matmul %39, %40, %cst_23 {dimension_numbers = #tpu.dot_dimension_numbers<[1], [0], [0], [1], [0, 0, 1, 1], [], []>} : vector<16x32xbf16>, vector<32x128xbf16>, vector<16x128xf32> -> vector<16x128xf32>
    %42 = arith.truncf %38 : vector<16x32xf32> to vector<16x32xbf16>
    %c0_24 = arith.constant 0 : index
    %c0_25 = arith.constant 0 : index
    %43 = vector.load %arg8[%c0_24, %c0_25] : memref<32x128xbf16, #tpu.memory_space<vmem>>, vector<32x128xbf16>
    %cst_26 = arith.constant dense<0.000000e+00> : vector<16x128xf32>
    %44 = tpu.matmul %42, %43, %cst_26 {dimension_numbers = #tpu.dot_dimension_numbers<[1], [0], [0], [1], [0, 0, 1, 1], [], []>} : vector<16x32xbf16>, vector<32x128xbf16>, vector<16x128xf32> -> vector<16x128xf32>
    %45 = arith.addf %41, %44 : vector<16x128xf32>
    %c0_27 = arith.constant 0 : index
    %c0_28 = arith.constant 0 : index
    %46 = vector.load %arg9[%c0_27, %c0_28] : memref<1x128xf32, #tpu.memory_space<vmem>>, vector<1x128xf32>
    %47 = vector.broadcast %46 : vector<1x128xf32> to vector<16x128xf32>
    %48 = arith.addf %45, %47 : vector<16x128xf32>
    %c0_29 = arith.constant 0 : index
    %c0_30 = arith.constant 0 : index
    %49 = vector.load %arg10[%c0_29, %c0_30] : memref<16x128xf32, #tpu.memory_space<vmem>>, vector<16x128xf32>
    tpu.vector_store %arg10[%c0_29, %c0_30], %48 {strides = array<i32>} : memref<16x128xf32, #tpu.memory_space<vmem>>, vector<16x128xf32>,
    return
  }
}

module attributes {stable_mosaic.version = 11 : i64} {
  func.func @_decoder_layer_kernel(%arg0: i32, %arg1: i32, %arg2: memref<1x8x32xf32, #tpu.memory_space<vmem>>, %arg3: memref<1x8x32xf32, #tpu.memory_space<vmem>>, %arg4: memref<1x4x32xf32, #tpu.memory_space<vmem>>, %arg5: memref<32x32xbf16, #tpu.memory_space<vmem>>, %arg6: memref<8x32xf32, #tpu.memory_space<vmem>>, %arg7: memref<32x64xbf16, #tpu.memory_space<vmem>>, %arg8: memref<8x64xf32, #tpu.memory_space<vmem>>, %arg9: memref<4x8x32xbf16, #tpu.memory_space<vmem>>, %arg10: memref<1x32xf32, #tpu.memory_space<vmem>>, %arg11: memref<1x32xf32, #tpu.memory_space<vmem>>, %arg12: memref<1x32xf32, #tpu.memory_space<vmem>>, %arg13: memref<32x32xbf16, #tpu.memory_space<vmem>>, %arg14: memref<8x32xf32, #tpu.memory_space<vmem>>, %arg15: memref<32x64xbf16, #tpu.memory_space<vmem>>, %arg16: memref<4x64xf32, #tpu.memory_space<vmem>>, %arg17: memref<4x8x32xbf16, #tpu.memory_space<vmem>>, %arg18: memref<1x32xf32, #tpu.memory_space<vmem>>, %arg19: memref<1x32xf32, #tpu.memory_space<vmem>>, %arg20: memref<1x32xf32, #tpu.memory_space<vmem>>, %arg21: memref<32x64xbf16, #tpu.memory_space<vmem>>, %arg22: memref<1x64xf32, #tpu.memory_space<vmem>>, %arg23: memref<64x32xbf16, #tpu.memory_space<vmem>>, %arg24: memref<1x32xf32, #tpu.memory_space<vmem>>, %arg25: memref<1x32xf32, #tpu.memory_space<vmem>>, %arg26: memref<1x32xf32, #tpu.memory_space<vmem>>, %arg27: memref<1x8x32xf32, #tpu.memory_space<vmem>>) attributes {dimension_semantics = [#tpu.dimension_semantics<parallel>, #tpu.dimension_semantics<parallel>], iteration_bounds = array<i64: 2, 1>, scalar_prefetch = 0 : i64, scratch_operands = 0 : i64, tpu.core_type = #tpu.core_type<tc>, window_params = [{transform_indices = @transform_0, window_bounds = array<i64: 1, 8, 32>}, {transform_indices = @transform_1, window_bounds = array<i64: 1, 8, 32>}, {transform_indices = @transform_2, window_bounds = array<i64: 1, 4, 32>}, {pipeline_mode = #tpu.pipeline_mode<synchronous>, transform_indices = @transform_3, window_bounds = array<i64: 32, 32>}, {transform_indices = @transform_4, window_bounds = array<i64: 8, 32>}, {pipeline_mode = #tpu.pipeline_mode<synchronous>, transform_indices = @transform_5, window_bounds = array<i64: 32, 64>}, {pipeline_mode = #tpu.pipeline_mode<synchronous>, transform_indices = @transform_6, window_bounds = array<i64: 8, 64>}, {pipeline_mode = #tpu.pipeline_mode<synchronous>, transform_indices = @transform_7, window_bounds = array<i64: 4, 8, 32>}, {pipeline_mode = #tpu.pipeline_mode<synchronous>, transform_indices = @transform_8, window_bounds = array<i64: 1, 32>}, {pipeline_mode = #tpu.pipeline_mode<synchronous>, transform_indices = @transform_9, window_bounds = array<i64: 1, 32>}, {pipeline_mode = #tpu.pipeline_mode<synchronous>, transform_indices = @transform_10, window_bounds = array<i64: 1, 32>}, {pipeline_mode = #tpu.pipeline_mode<synchronous>, transform_indices = @transform_11, window_bounds = array<i64: 32, 32>}, {transform_indices = @transform_12, window_bounds = array<i64: 8, 32>}, {pipeline_mode = #tpu.pipeline_mode<synchronous>, transform_indices = @transform_13, window_bounds = array<i64: 32, 64>}, {pipeline_mode = #tpu.pipeline_mode<synchronous>, transform_indices = @transform_14, window_bounds = array<i64: 4, 64>}, {pipeline_mode = #tpu.pipeline_mode<synchronous>, transform_indices = @transform_15, window_bounds = array<i64: 4, 8, 32>}, {pipeline_mode = #tpu.pipeline_mode<synchronous>, transform_indices = @transform_16, window_bounds = array<i64: 1, 32>}, {pipeline_mode = #tpu.pipeline_mode<synchronous>, transform_indices = @transform_17, window_bounds = array<i64: 1, 32>}, {pipeline_mode = #tpu.pipeline_mode<synchronous>, transform_indices = @transform_18, window_bounds = array<i64: 1, 32>}, {pipeline_mode = #tpu.pipeline_mode<synchronous>, transform_indices = @transform_19, window_bounds = array<i64: 32, 64>}, {pipeline_mode = #tpu.pipeline_mode<synchronous>, transform_indices = @transform_20, window_bounds = array<i64: 1, 64>}, {pipeline_mode = #tpu.pipeline_mode<synchronous>, transform_indices = @transform_21, window_bounds = array<i64: 64, 32>}, {pipeline_mode = #tpu.pipeline_mode<synchronous>, transform_indices = @transform_22, window_bounds = array<i64: 1, 32>}, {pipeline_mode = #tpu.pipeline_mode<synchronous>, transform_indices = @transform_23, window_bounds = array<i64: 1, 32>}, {pipeline_mode = #tpu.pipeline_mode<synchronous>, transform_indices = @transform_24, window_bounds = array<i64: 1, 32>}, {transform_indices = @transform_25, window_bounds = array<i64: 1, 8, 32>}]} {
    %c0 = arith.constant 0 : index
    %c0_0 = arith.constant 0 : index
    %c0_1 = arith.constant 0 : index
    %0 = vector.load %arg2[%c0, %c0_0, %c0_1] : memref<1x8x32xf32, #tpu.memory_space<vmem>>, vector<1x8x32xf32>
    %1 = vector.shape_cast %0 : vector<1x8x32xf32> to vector<8x32xf32>
    %c0_2 = arith.constant 0 : index
    %c0_3 = arith.constant 0 : index
    %c0_4 = arith.constant 0 : index
    %2 = vector.load %arg3[%c0_2, %c0_3, %c0_4] : memref<1x8x32xf32, #tpu.memory_space<vmem>>, vector<1x8x32xf32>
    %3 = vector.shape_cast %2 : vector<1x8x32xf32> to vector<8x32xf32>
    %c0_5 = arith.constant 0 : index
    %c0_6 = arith.constant 0 : index
    %c0_7 = arith.constant 0 : index
    %4 = vector.load %arg4[%c0_5, %c0_6, %c0_7] : memref<1x4x32xf32, #tpu.memory_space<vmem>>, vector<1x4x32xf32>
    %5 = vector.shape_cast %4 : vector<1x4x32xf32> to vector<4x32xf32>
    %6 = arith.truncf %1 : vector<8x32xf32> to vector<8x32xbf16>
    %c0_8 = arith.constant 0 : index
    %c0_9 = arith.constant 0 : index
    %7 = vector.load %arg5[%c0_8, %c0_9] : memref<32x32xbf16, #tpu.memory_space<vmem>>, vector<32x32xbf16>
    %cst = arith.constant dense<0.000000e+00> : vector<8x32xf32>
    %8 = tpu.matmul %6, %7, %cst {dimension_numbers = #tpu.dot_dimension_numbers<[1], [0], [0], [1], [0, 0, 1, 1], [], []>} : vector<8x32xbf16>, vector<32x32xbf16>, vector<8x32xf32> -> vector<8x32xf32>
    %c0_10 = arith.constant 0 : index
    %c0_11 = arith.constant 0 : index
    %9 = vector.load %arg6[%c0_10, %c0_11] : memref<8x32xf32, #tpu.memory_space<vmem>>, vector<8x32xf32>
    %10 = arith.addf %8, %9 : vector<8x32xf32>
    %11 = arith.truncf %3 : vector<8x32xf32> to vector<8x32xbf16>
    %c0_12 = arith.constant 0 : index
    %c0_13 = arith.constant 0 : index
    %12 = vector.load %arg7[%c0_12, %c0_13] : memref<32x64xbf16, #tpu.memory_space<vmem>>, vector<32x64xbf16>
    %cst_14 = arith.constant dense<0.000000e+00> : vector<8x64xf32>
    %13 = tpu.matmul %11, %12, %cst_14 {dimension_numbers = #tpu.dot_dimension_numbers<[1], [0], [0], [1], [0, 0, 1, 1], [], []>} : vector<8x32xbf16>, vector<32x64xbf16>, vector<8x64xf32> -> vector<8x64xf32>
    %c0_15 = arith.constant 0 : index
    %c0_16 = arith.constant 0 : index
    %14 = vector.load %arg8[%c0_15, %c0_16] : memref<8x64xf32, #tpu.memory_space<vmem>>, vector<8x64xf32>
    %15 = arith.addf %13, %14 : vector<8x64xf32>
    %16 = vector.extract_strided_slice %15 {offsets = [0, 0], sizes = [8, 32], strides = [1, 1]} : vector<8x64xf32> to vector<8x32xf32>
    %17 = vector.extract_strided_slice %15 {offsets = [0, 32], sizes = [8, 32], strides = [1, 1]} : vector<8x64xf32> to vector<8x32xf32>
    %cst_17 = arith.constant 0.353553385 : f32
    %18 = vector.broadcast %cst_17 : f32 to vector<8x32xf32>
    %19 = arith.mulf %10, %18 : vector<8x32xf32>
    %20 = vector.extract_strided_slice %19 {offsets = [0, 0], sizes = [8, 8], strides = [1, 1]} : vector<8x32xf32> to vector<8x8xf32>
    %21 = vector.extract_strided_slice %19 {offsets = [0, 8], sizes = [8, 8], strides = [1, 1]} : vector<8x32xf32> to vector<8x8xf32>
    %22 = vector.extract_strided_slice %19 {offsets = [0, 16], sizes = [8, 8], strides = [1, 1]} : vector<8x32xf32> to vector<8x8xf32>
    %23 = vector.extract_strided_slice %19 {offsets = [0, 24], sizes = [8, 8], strides = [1, 1]} : vector<8x32xf32> to vector<8x8xf32>
    %24 = vector.shape_cast %20 : vector<8x8xf32> to vector<1x8x8xf32>
    %25 = vector.shape_cast %21 : vector<8x8xf32> to vector<1x8x8xf32>
    %26 = vector.shape_cast %22 : vector<8x8xf32> to vector<1x8x8xf32>
    %27 = vector.shape_cast %23 : vector<8x8xf32> to vector<1x8x8xf32>
    %28 = tpu.concatenate %24, %25, %26, %27 in 0 : vector<1x8x8xf32>, vector<1x8x8xf32>, vector<1x8x8xf32>, vector<1x8x8xf32> -> vector<4x8x8xf32>
    %29 = arith.truncf %28 : vector<4x8x8xf32> to vector<4x8x8xbf16>
    %30 = vector.extract_strided_slice %16 {offsets = [0, 0], sizes = [8, 8], strides = [1, 1]} : vector<8x32xf32> to vector<8x8xf32>
    %31 = vector.extract_strided_slice %16 {offsets = [0, 8], sizes = [8, 8], strides = [1, 1]} : vector<8x32xf32> to vector<8x8xf32>
    %32 = vector.extract_strided_slice %16 {offsets = [0, 16], sizes = [8, 8], strides = [1, 1]} : vector<8x32xf32> to vector<8x8xf32>
    %33 = vector.extract_strided_slice %16 {offsets = [0, 24], sizes = [8, 8], strides = [1, 1]} : vector<8x32xf32> to vector<8x8xf32>
    %34 = vector.shape_cast %30 : vector<8x8xf32> to vector<1x8x8xf32>
    %35 = vector.shape_cast %31 : vector<8x8xf32> to vector<1x8x8xf32>
    %36 = vector.shape_cast %32 : vector<8x8xf32> to vector<1x8x8xf32>
    %37 = vector.shape_cast %33 : vector<8x8xf32> to vector<1x8x8xf32>
    %38 = tpu.concatenate %34, %35, %36, %37 in 0 : vector<1x8x8xf32>, vector<1x8x8xf32>, vector<1x8x8xf32>, vector<1x8x8xf32> -> vector<4x8x8xf32>
    %39 = arith.truncf %38 : vector<4x8x8xf32> to vector<4x8x8xbf16>
    %40 = vector.extract_strided_slice %17 {offsets = [0, 0], sizes = [8, 8], strides = [1, 1]} : vector<8x32xf32> to vector<8x8xf32>
    %41 = vector.extract_strided_slice %17 {offsets = [0, 8], sizes = [8, 8], strides = [1, 1]} : vector<8x32xf32> to vector<8x8xf32>
    %42 = vector.extract_strided_slice %17 {offsets = [0, 16], sizes = [8, 8], strides = [1, 1]} : vector<8x32xf32> to vector<8x8xf32>
    %43 = vector.extract_strided_slice %17 {offsets = [0, 24], sizes = [8, 8], strides = [1, 1]} : vector<8x32xf32> to vector<8x8xf32>
    %44 = vector.shape_cast %40 : vector<8x8xf32> to vector<1x8x8xf32>
    %45 = vector.shape_cast %41 : vector<8x8xf32> to vector<1x8x8xf32>
    %46 = vector.shape_cast %42 : vector<8x8xf32> to vector<1x8x8xf32>
    %47 = vector.shape_cast %43 : vector<8x8xf32> to vector<1x8x8xf32>
    %48 = tpu.concatenate %44, %45, %46, %47 in 0 : vector<1x8x8xf32>, vector<1x8x8xf32>, vector<1x8x8xf32>, vector<1x8x8xf32> -> vector<4x8x8xf32>
    %49 = arith.truncf %48 : vector<4x8x8xf32> to vector<4x8x8xbf16>
    %cst_18 = arith.constant dense<0.000000e+00> : vector<4x8x8xf32>
    %50 = tpu.matmul %29, %39, %cst_18 {dimension_numbers = #tpu.dot_dimension_numbers<[2], [2], [1], [1], [0, 0, 0, 1, 1, 1], [0], [0]>} : vector<4x8x8xbf16>, vector<4x8x8xbf16>, vector<4x8x8xf32> -> vector<4x8x8xf32>
    %cst_19 = arith.constant dense<0xFF800000> : vector<4x8xf32>
    %51 = vector.multi_reduction <maximumf>, %50, %cst_19 [2] : vector<4x8x8xf32> to vector<4x8xf32>
    %52 = vector.shape_cast %51 : vector<4x8xf32> to vector<4x8x1xf32>
    %53 = vector.broadcast %52 : vector<4x8x1xf32> to vector<4x8x8xf32>
    %54 = arith.subf %50, %53 : vector<4x8x8xf32>
    %55 = math.exp %54 : vector<4x8x8xf32>
    %cst_20 = arith.constant dense<0.000000e+00> : vector<4x8xf32>
    %56 = vector.multi_reduction <add>, %55, %cst_20 [2] : vector<4x8x8xf32> to vector<4x8xf32>
    %57 = vector.shape_cast %56 : vector<4x8xf32> to vector<4x8x1xf32>
    %58 = tpu.reciprocal %57 {approx = true} : vector<4x8x1xf32> -> vector<4x8x1xf32>
    %59 = vector.broadcast %58 : vector<4x8x1xf32> to vector<4x8x8xf32>
    %60 = arith.mulf %55, %59 : vector<4x8x8xf32>
    %61 = arith.truncf %60 : vector<4x8x8xf32> to vector<4x8x8xbf16>
    %cst_21 = arith.constant dense<0.000000e+00> : vector<4x8x8xf32>
    %62 = tpu.matmul %61, %49, %cst_21 {dimension_numbers = #tpu.dot_dimension_numbers<[2], [1], [1], [2], [0, 0, 0, 1, 1, 2], [0], [0]>} : vector<4x8x8xbf16>, vector<4x8x8xbf16>, vector<4x8x8xf32> -> vector<4x8x8xf32>
    %63 = arith.truncf %62 : vector<4x8x8xf32> to vector<4x8x8xbf16>
    %c0_22 = arith.constant 0 : index
    %c0_23 = arith.constant 0 : index
    %c0_24 = arith.constant 0 : index
    %64 = vector.load %arg9[%c0_22, %c0_23, %c0_24] : memref<4x8x32xbf16, #tpu.memory_space<vmem>>, vector<4x8x32xbf16>
    %cst_25 = arith.constant dense<0.000000e+00> : vector<4x8x32xf32>
    %65 = tpu.matmul %63, %64, %cst_25 {dimension_numbers = #tpu.dot_dimension_numbers<[2], [1], [1], [2], [0, 0, 0, 1, 1, 2], [0], [0]>} : vector<4x8x8xbf16>, vector<4x8x32xbf16>, vector<4x8x32xf32> -> vector<4x8x32xf32>
    %cst_26 = arith.constant dense<0.000000e+00> : vector<8x32xf32>
    %66 = vector.multi_reduction <add>, %65, %cst_26 [0] : vector<4x8x32xf32> to vector<8x32xf32>
    %c0_27 = arith.constant 0 : index
    %c0_28 = arith.constant 0 : index
    %67 = vector.load %arg10[%c0_27, %c0_28] : memref<1x32xf32, #tpu.memory_space<vmem>>, vector<1x32xf32>
    %68 = vector.broadcast %67 : vector<1x32xf32> to vector<8x32xf32>
    %69 = arith.addf %66, %68 : vector<8x32xf32>
    %70 = arith.addf %1, %69 : vector<8x32xf32>
    %c0_29 = arith.constant 0 : index
    %c0_30 = arith.constant 0 : index
    %71 = vector.load %arg11[%c0_29, %c0_30] : memref<1x32xf32, #tpu.memory_space<vmem>>, vector<1x32xf32>
    %c0_31 = arith.constant 0 : index
    %c0_32 = arith.constant 0 : index
    %72 = vector.load %arg12[%c0_31, %c0_32] : memref<1x32xf32, #tpu.memory_space<vmem>>, vector<1x32xf32>
    %cst_33 = arith.constant dense<0.000000e+00> : vector<8xf32>
    %73 = vector.multi_reduction <add>, %70, %cst_33 [1] : vector<8x32xf32> to vector<8xf32>
    %74 = vector.shape_cast %73 : vector<8xf32> to vector<8x1xf32>
    %cst_34 = arith.constant 3.200000e+01 : f32
    %75 = vector.broadcast %cst_34 : f32 to vector<8x1xf32>
    %76 = arith.divf %74, %75 : vector<8x1xf32>
    %77 = vector.broadcast %76 : vector<8x1xf32> to vector<8x32xf32>
    %78 = arith.subf %70, %77 : vector<8x32xf32>
    %79 = arith.mulf %78, %78 : vector<8x32xf32>
    %cst_35 = arith.constant dense<0.000000e+00> : vector<8xf32>
    %80 = vector.multi_reduction <add>, %79, %cst_35 [1] : vector<8x32xf32> to vector<8xf32>
    %81 = vector.shape_cast %80 : vector<8xf32> to vector<8x1xf32>
    %cst_36 = arith.constant 3.200000e+01 : f32
    %82 = vector.broadcast %cst_36 : f32 to vector<8x1xf32>
    %83 = arith.divf %81, %82 : vector<8x1xf32>
    %cst_37 = arith.constant 9.99999974E-6 : f32
    %84 = vector.broadcast %cst_37 : f32 to vector<8x1xf32>
    %85 = arith.addf %83, %84 : vector<8x1xf32>
    %86 = math.rsqrt %85 : vector<8x1xf32>
    %87 = vector.broadcast %86 : vector<8x1xf32> to vector<8x32xf32>
    %88 = arith.mulf %78, %87 : vector<8x32xf32>
    %89 = vector.broadcast %71 : vector<1x32xf32> to vector<8x32xf32>
    %90 = arith.mulf %88, %89 : vector<8x32xf32>
    %91 = vector.broadcast %72 : vector<1x32xf32> to vector<8x32xf32>
    %92 = arith.addf %90, %91 : vector<8x32xf32>
    %93 = arith.truncf %92 : vector<8x32xf32> to vector<8x32xbf16>
    %c0_38 = arith.constant 0 : index
    %c0_39 = arith.constant 0 : index
    %94 = vector.load %arg13[%c0_38, %c0_39] : memref<32x32xbf16, #tpu.memory_space<vmem>>, vector<32x32xbf16>
    %cst_40 = arith.constant dense<0.000000e+00> : vector<8x32xf32>
    %95 = tpu.matmul %93, %94, %cst_40 {dimension_numbers = #tpu.dot_dimension_numbers<[1], [0], [0], [1], [0, 0, 1, 1], [], []>} : vector<8x32xbf16>, vector<32x32xbf16>, vector<8x32xf32> -> vector<8x32xf32>
    %c0_41 = arith.constant 0 : index
    %c0_42 = arith.constant 0 : index
    %96 = vector.load %arg14[%c0_41, %c0_42] : memref<8x32xf32, #tpu.memory_space<vmem>>, vector<8x32xf32>
    %97 = arith.addf %95, %96 : vector<8x32xf32>
    %98 = arith.truncf %5 : vector<4x32xf32> to vector<4x32xbf16>
    %c0_43 = arith.constant 0 : index
    %c0_44 = arith.constant 0 : index
    %99 = vector.load %arg15[%c0_43, %c0_44] : memref<32x64xbf16, #tpu.memory_space<vmem>>, vector<32x64xbf16>
    %cst_45 = arith.constant dense<0.000000e+00> : vector<4x64xf32>
    %100 = tpu.matmul %98, %99, %cst_45 {dimension_numbers = #tpu.dot_dimension_numbers<[1], [0], [0], [1], [0, 0, 1, 1], [], []>} : vector<4x32xbf16>, vector<32x64xbf16>, vector<4x64xf32> -> vector<4x64xf32>
    %c0_46 = arith.constant 0 : index
    %c0_47 = arith.constant 0 : index
    %101 = vector.load %arg16[%c0_46, %c0_47] : memref<4x64xf32, #tpu.memory_space<vmem>>, vector<4x64xf32>
    %102 = arith.addf %100, %101 : vector<4x64xf32>
    %103 = vector.extract_strided_slice %102 {offsets = [0, 0], sizes = [4, 32], strides = [1, 1]} : vector<4x64xf32> to vector<4x32xf32>
    %104 = vector.extract_strided_slice %102 {offsets = [0, 32], sizes = [4, 32], strides = [1, 1]} : vector<4x64xf32> to vector<4x32xf32>
    %cst_48 = arith.constant 0.353553385 : f32
    %105 = vector.broadcast %cst_48 : f32 to vector<8x32xf32>
    %106 = arith.mulf %97, %105 : vector<8x32xf32>
    %107 = vector.extract_strided_slice %106 {offsets = [0, 0], sizes = [8, 8], strides = [1, 1]} : vector<8x32xf32> to vector<8x8xf32>
    %108 = vector.extract_strided_slice %106 {offsets = [0, 8], sizes = [8, 8], strides = [1, 1]} : vector<8x32xf32> to vector<8x8xf32>
    %109 = vector.extract_strided_slice %106 {offsets = [0, 16], sizes = [8, 8], strides = [1, 1]} : vector<8x32xf32> to vector<8x8xf32>
    %110 = vector.extract_strided_slice %106 {offsets = [0, 24], sizes = [8, 8], strides = [1, 1]} : vector<8x32xf32> to vector<8x8xf32>
    %111 = vector.shape_cast %107 : vector<8x8xf32> to vector<1x8x8xf32>
    %112 = vector.shape_cast %108 : vector<8x8xf32> to vector<1x8x8xf32>
    %113 = vector.shape_cast %109 : vector<8x8xf32> to vector<1x8x8xf32>
    %114 = vector.shape_cast %110 : vector<8x8xf32> to vector<1x8x8xf32>
    %115 = tpu.concatenate %111, %112, %113, %114 in 0 : vector<1x8x8xf32>, vector<1x8x8xf32>, vector<1x8x8xf32>, vector<1x8x8xf32> -> vector<4x8x8xf32>
    %116 = arith.truncf %115 : vector<4x8x8xf32> to vector<4x8x8xbf16>
    %117 = vector.extract_strided_slice %103 {offsets = [0, 0], sizes = [4, 8], strides = [1, 1]} : vector<4x32xf32> to vector<4x8xf32>
    %118 = vector.extract_strided_slice %103 {offsets = [0, 8], sizes = [4, 8], strides = [1, 1]} : vector<4x32xf32> to vector<4x8xf32>
    %119 = vector.extract_strided_slice %103 {offsets = [0, 16], sizes = [4, 8], strides = [1, 1]} : vector<4x32xf32> to vector<4x8xf32>
    %120 = vector.extract_strided_slice %103 {offsets = [0, 24], sizes = [4, 8], strides = [1, 1]} : vector<4x32xf32> to vector<4x8xf32>
    %121 = vector.shape_cast %117 : vector<4x8xf32> to vector<1x4x8xf32>
    %122 = vector.shape_cast %118 : vector<4x8xf32> to vector<1x4x8xf32>
    %123 = vector.shape_cast %119 : vector<4x8xf32> to vector<1x4x8xf32>
    %124 = vector.shape_cast %120 : vector<4x8xf32> to vector<1x4x8xf32>
    %125 = tpu.concatenate %121, %122, %123, %124 in 0 : vector<1x4x8xf32>, vector<1x4x8xf32>, vector<1x4x8xf32>, vector<1x4x8xf32> -> vector<4x4x8xf32>
    %126 = arith.truncf %125 : vector<4x4x8xf32> to vector<4x4x8xbf16>
    %127 = vector.extract_strided_slice %104 {offsets = [0, 0], sizes = [4, 8], strides = [1, 1]} : vector<4x32xf32> to vector<4x8xf32>
    %128 = vector.extract_strided_slice %104 {offsets = [0, 8], sizes = [4, 8], strides = [1, 1]} : vector<4x32xf32> to vector<4x8xf32>
    %129 = vector.extract_strided_slice %104 {offsets = [0, 16], sizes = [4, 8], strides = [1, 1]} : vector<4x32xf32> to vector<4x8xf32>
    %130 = vector.extract_strided_slice %104 {offsets = [0, 24], sizes = [4, 8], strides = [1, 1]} : vector<4x32xf32> to vector<4x8xf32>
    %131 = vector.shape_cast %127 : vector<4x8xf32> to vector<1x4x8xf32>
    %132 = vector.shape_cast %128 : vector<4x8xf32> to vector<1x4x8xf32>
    %133 = vector.shape_cast %129 : vector<4x8xf32> to vector<1x4x8xf32>
    %134 = vector.shape_cast %130 : vector<4x8xf32> to vector<1x4x8xf32>
    %135 = tpu.concatenate %131, %132, %133, %134 in 0 : vector<1x4x8xf32>, vector<1x4x8xf32>, vector<1x4x8xf32>, vector<1x4x8xf32> -> vector<4x4x8xf32>
    %136 = arith.truncf %135 : vector<4x4x8xf32> to vector<4x4x8xbf16>
    %cst_49 = arith.constant dense<0.000000e+00> : vector<4x8x4xf32>
    %137 = tpu.matmul %116, %126, %cst_49 {dimension_numbers = #tpu.dot_dimension_numbers<[2], [2], [1], [1], [0, 0, 0, 1, 1, 1], [0], [0]>} : vector<4x8x8xbf16>, vector<4x4x8xbf16>, vector<4x8x4xf32> -> vector<4x8x4xf32>
    %cst_50 = arith.constant dense<0xFF800000> : vector<4x8xf32>
    %138 = vector.multi_reduction <maximumf>, %137, %cst_50 [2] : vector<4x8x4xf32> to vector<4x8xf32>
    %139 = vector.shape_cast %138 : vector<4x8xf32> to vector<4x8x1xf32>
    %140 = vector.broadcast %139 : vector<4x8x1xf32> to vector<4x8x4xf32>
    %141 = arith.subf %137, %140 : vector<4x8x4xf32>
    %142 = math.exp %141 : vector<4x8x4xf32>
    %cst_51 = arith.constant dense<0.000000e+00> : vector<4x8xf32>
    %143 = vector.multi_reduction <add>, %142, %cst_51 [2] : vector<4x8x4xf32> to vector<4x8xf32>
    %144 = vector.shape_cast %143 : vector<4x8xf32> to vector<4x8x1xf32>
    %145 = tpu.reciprocal %144 {approx = true} : vector<4x8x1xf32> -> vector<4x8x1xf32>
    %146 = vector.broadcast %145 : vector<4x8x1xf32> to vector<4x8x4xf32>
    %147 = arith.mulf %142, %146 : vector<4x8x4xf32>
    %148 = arith.truncf %147 : vector<4x8x4xf32> to vector<4x8x4xbf16>
    %cst_52 = arith.constant dense<0.000000e+00> : vector<4x8x8xf32>
    %149 = tpu.matmul %148, %136, %cst_52 {dimension_numbers = #tpu.dot_dimension_numbers<[2], [1], [1], [2], [0, 0, 0, 1, 1, 2], [0], [0]>} : vector<4x8x4xbf16>, vector<4x4x8xbf16>, vector<4x8x8xf32> -> vector<4x8x8xf32>
    %150 = arith.truncf %149 : vector<4x8x8xf32> to vector<4x8x8xbf16>
    %c0_53 = arith.constant 0 : index
    %c0_54 = arith.constant 0 : index
    %c0_55 = arith.constant 0 : index
    %151 = vector.load %arg17[%c0_53, %c0_54, %c0_55] : memref<4x8x32xbf16, #tpu.memory_space<vmem>>, vector<4x8x32xbf16>
    %cst_56 = arith.constant dense<0.000000e+00> : vector<4x8x32xf32>
    %152 = tpu.matmul %150, %151, %cst_56 {dimension_numbers = #tpu.dot_dimension_numbers<[2], [1], [1], [2], [0, 0, 0, 1, 1, 2], [0], [0]>} : vector<4x8x8xbf16>, vector<4x8x32xbf16>, vector<4x8x32xf32> -> vector<4x8x32xf32>
    %cst_57 = arith.constant dense<0.000000e+00> : vector<8x32xf32>
    %153 = vector.multi_reduction <add>, %152, %cst_57 [0] : vector<4x8x32xf32> to vector<8x32xf32>
    %c0_58 = arith.constant 0 : index
    %c0_59 = arith.constant 0 : index
    %154 = vector.load %arg18[%c0_58, %c0_59] : memref<1x32xf32, #tpu.memory_space<vmem>>, vector<1x32xf32>
    %155 = vector.broadcast %154 : vector<1x32xf32> to vector<8x32xf32>
    %156 = arith.addf %153, %155 : vector<8x32xf32>
    %157 = arith.addf %92, %156 : vector<8x32xf32>
    %c0_60 = arith.constant 0 : index
    %c0_61 = arith.constant 0 : index
    %158 = vector.load %arg19[%c0_60, %c0_61] : memref<1x32xf32, #tpu.memory_space<vmem>>, vector<1x32xf32>
    %c0_62 = arith.constant 0 : index
    %c0_63 = arith.constant 0 : index
    %159 = vector.load %arg20[%c0_62, %c0_63] : memref<1x32xf32, #tpu.memory_space<vmem>>, vector<1x32xf32>
    %cst_64 = arith.constant dense<0.000000e+00> : vector<8xf32>
    %160 = vector.multi_reduction <add>, %157, %cst_64 [1] : vector<8x32xf32> to vector<8xf32>
    %161 = vector.shape_cast %160 : vector<8xf32> to vector<8x1xf32>
    %cst_65 = arith.constant 3.200000e+01 : f32
    %162 = vector.broadcast %cst_65 : f32 to vector<8x1xf32>
    %163 = arith.divf %161, %162 : vector<8x1xf32>
    %164 = vector.broadcast %163 : vector<8x1xf32> to vector<8x32xf32>
    %165 = arith.subf %157, %164 : vector<8x32xf32>
    %166 = arith.mulf %165, %165 : vector<8x32xf32>
    %cst_66 = arith.constant dense<0.000000e+00> : vector<8xf32>
    %167 = vector.multi_reduction <add>, %166, %cst_66 [1] : vector<8x32xf32> to vector<8xf32>
    %168 = vector.shape_cast %167 : vector<8xf32> to vector<8x1xf32>
    %cst_67 = arith.constant 3.200000e+01 : f32
    %169 = vector.broadcast %cst_67 : f32 to vector<8x1xf32>
    %170 = arith.divf %168, %169 : vector<8x1xf32>
    %cst_68 = arith.constant 9.99999974E-6 : f32
    %171 = vector.broadcast %cst_68 : f32 to vector<8x1xf32>
    %172 = arith.addf %170, %171 : vector<8x1xf32>
    %173 = math.rsqrt %172 : vector<8x1xf32>
    %174 = vector.broadcast %173 : vector<8x1xf32> to vector<8x32xf32>
    %175 = arith.mulf %165, %174 : vector<8x32xf32>
    %176 = vector.broadcast %158 : vector<1x32xf32> to vector<8x32xf32>
    %177 = arith.mulf %175, %176 : vector<8x32xf32>
    %178 = vector.broadcast %159 : vector<1x32xf32> to vector<8x32xf32>
    %179 = arith.addf %177, %178 : vector<8x32xf32>
    %180 = arith.truncf %179 : vector<8x32xf32> to vector<8x32xbf16>
    %c0_69 = arith.constant 0 : index
    %c0_70 = arith.constant 0 : index
    %181 = vector.load %arg21[%c0_69, %c0_70] : memref<32x64xbf16, #tpu.memory_space<vmem>>, vector<32x64xbf16>
    %cst_71 = arith.constant dense<0.000000e+00> : vector<8x64xf32>
    %182 = tpu.matmul %180, %181, %cst_71 {dimension_numbers = #tpu.dot_dimension_numbers<[1], [0], [0], [1], [0, 0, 1, 1], [], []>} : vector<8x32xbf16>, vector<32x64xbf16>, vector<8x64xf32> -> vector<8x64xf32>
    %c0_72 = arith.constant 0 : index
    %c0_73 = arith.constant 0 : index
    %183 = vector.load %arg22[%c0_72, %c0_73] : memref<1x64xf32, #tpu.memory_space<vmem>>, vector<1x64xf32>
    %184 = vector.broadcast %183 : vector<1x64xf32> to vector<8x64xf32>
    %185 = arith.addf %182, %184 : vector<8x64xf32>
    %cst_74 = arith.constant 0.000000e+00 : f32
    %186 = vector.broadcast %cst_74 : f32 to vector<8x64xf32>
    %187 = arith.maximumf %185, %186 : vector<8x64xf32>
    %188 = arith.truncf %187 : vector<8x64xf32> to vector<8x64xbf16>
    %c0_75 = arith.constant 0 : index
    %c0_76 = arith.constant 0 : index
    %189 = vector.load %arg23[%c0_75, %c0_76] : memref<64x32xbf16, #tpu.memory_space<vmem>>, vector<64x32xbf16>
    %cst_77 = arith.constant dense<0.000000e+00> : vector<8x32xf32>
    %190 = tpu.matmul %188, %189, %cst_77 {dimension_numbers = #tpu.dot_dimension_numbers<[1], [0], [0], [1], [0, 0, 1, 1], [], []>} : vector<8x64xbf16>, vector<64x32xbf16>, vector<8x32xf32> -> vector<8x32xf32>
    %191 = arith.addf %179, %190 : vector<8x32xf32>
    %c0_78 = arith.constant 0 : index
    %c0_79 = arith.constant 0 : index
    %192 = vector.load %arg24[%c0_78, %c0_79] : memref<1x32xf32, #tpu.memory_space<vmem>>, vector<1x32xf32>
    %193 = vector.broadcast %192 : vector<1x32xf32> to vector<8x32xf32>
    %194 = arith.addf %191, %193 : vector<8x32xf32>
    %c0_80 = arith.constant 0 : index
    %c0_81 = arith.constant 0 : index
    %195 = vector.load %arg25[%c0_80, %c0_81] : memref<1x32xf32, #tpu.memory_space<vmem>>, vector<1x32xf32>
    %c0_82 = arith.constant 0 : index
    %c0_83 = arith.constant 0 : index
    %196 = vector.load %arg26[%c0_82, %c0_83] : memref<1x32xf32, #tpu.memory_space<vmem>>, vector<1x32xf32>
    %cst_84 = arith.constant dense<0.000000e+00> : vector<8xf32>
    %197 = vector.multi_reduction <add>, %194, %cst_84 [1] : vector<8x32xf32> to vector<8xf32>
    %198 = vector.shape_cast %197 : vector<8xf32> to vector<8x1xf32>
    %cst_85 = arith.constant 3.200000e+01 : f32
    %199 = vector.broadcast %cst_85 : f32 to vector<8x1xf32>
    %200 = arith.divf %198, %199 : vector<8x1xf32>
    %201 = vector.broadcast %200 : vector<8x1xf32> to vector<8x32xf32>
    %202 = arith.subf %194, %201 : vector<8x32xf32>
    %203 = arith.mulf %202, %202 : vector<8x32xf32>
    %cst_86 = arith.constant dense<0.000000e+00> : vector<8xf32>
    %204 = vector.multi_reduction <add>, %203, %cst_86 [1] : vector<8x32xf32> to vector<8xf32>
    %205 = vector.shape_cast %204 : vector<8xf32> to vector<8x1xf32>
    %cst_87 = arith.constant 3.200000e+01 : f32
    %206 = vector.broadcast %cst_87 : f32 to vector<8x1xf32>
    %207 = arith.divf %205, %206 : vector<8x1xf32>
    %cst_88 = arith.constant 9.99999974E-6 : f32
    %208 = vector.broadcast %cst_88 : f32 to vector<8x1xf32>
    %209 = arith.addf %207, %208 : vector<8x1xf32>
    %210 = math.rsqrt %209 : vector<8x1xf32>
    %211 = vector.broadcast %210 : vector<8x1xf32> to vector<8x32xf32>
    %212 = arith.mulf %202, %211 : vector<8x32xf32>
    %213 = vector.broadcast %195 : vector<1x32xf32> to vector<8x32xf32>
    %214 = arith.mulf %212, %213 : vector<8x32xf32>
    %215 = vector.broadcast %196 : vector<1x32xf32> to vector<8x32xf32>
    %216 = arith.addf %214, %215 : vector<8x32xf32>
    %c0_89 = arith.constant 0 : index
    %c0_90 = arith.constant 0 : index
    %c0_91 = arith.constant 0 : index
    %217 = vector.load %arg27[%c0_89, %c0_90, %c0_91] : memref<1x8x32xf32, #tpu.memory_space<vmem>>, vector<1x8x32xf32>
    %218 = vector.shape_cast %217 : vector<1x8x32xf32> to vector<8x32xf32>
    %219 = vector.shape_cast %216 : vector<8x32xf32> to vector<1x8x32xf32>
    tpu.vector_store %arg27[%c0_89, %c0_90, %c0_91], %219 {strides = array<i32>} : memref<1x8x32xf32, #tpu.memory_space<vmem>>, vector<1x8x32xf32>,
    return
  }
  func.func @transform_0(%arg0: i32, %arg1: i32) -> (i32, i32, i32) {
    %c0_i32 = arith.constant 0 : i32
    %c0_i32_0 = arith.constant 0 : i32
    return %arg0, %arg1, %c0_i32 : i32, i32, i32
  }
  func.func @transform_1(%arg0: i32, %arg1: i32) -> (i32, i32, i32) {
    %c0_i32 = arith.constant 0 : i32
    %c0_i32_0 = arith.constant 0 : i32
    %c0_i32_1 = arith.constant 0 : i32
    return %arg0, %c0_i32, %c0_i32_0 : i32, i32, i32
  }
  func.func @transform_2(%arg0: i32, %arg1: i32) -> (i32, i32, i32) {
    %c0_i32 = arith.constant 0 : i32
    %c0_i32_0 = arith.constant 0 : i32
    %c0_i32_1 = arith.constant 0 : i32
    return %arg0, %c0_i32, %c0_i32_0 : i32, i32, i32
  }
  func.func @transform_3(%arg0: i32, %arg1: i32) -> (i32, i32) {
    %c0_i32 = arith.constant 0 : i32
    %c0_i32_0 = arith.constant 0 : i32
    %c0_i32_1 = arith.constant 0 : i32
    return %c0_i32, %c0_i32_0 : i32, i32
  }
  func.func @transform_4(%arg0: i32, %arg1: i32) -> (i32, i32) {
    %c0_i32 = arith.constant 0 : i32
    %c0_i32_0 = arith.constant 0 : i32
    return %arg1, %c0_i32 : i32, i32
  }
  func.func @transform_5(%arg0: i32, %arg1: i32) -> (i32, i32) {
    %c0_i32 = arith.constant 0 : i32
    %c0_i32_0 = arith.constant 0 : i32
    %c0_i32_1 = arith.constant 0 : i32
    return %c0_i32, %c0_i32_0 : i32, i32
  }
  func.func @transform_6(%arg0: i32, %arg1: i32) -> (i32, i32) {
    %c0_i32 = arith.constant 0 : i32
    %c0_i32_0 = arith.constant 0 : i32
    %c0_i32_1 = arith.constant 0 : i32
    return %c0_i32, %c0_i32_0 : i32, i32
  }
  func.func @transform_7(%arg0: i32, %arg1: i32) -> (i32, i32, i32) {
    %c0_i32 = arith.constant 0 : i32
    %c0_i32_0 = arith.constant 0 : i32
    %c0_i32_1 = arith.constant 0 : i32
    %c0_i32_2 = arith.constant 0 : i32
    return %c0_i32, %c0_i32_0, %c0_i32_1 : i32, i32, i32
  }
  func.func @transform_8(%arg0: i32, %arg1: i32) -> (i32, i32) {
    %c0_i32 = arith.constant 0 : i32
    %c0_i32_0 = arith.constant 0 : i32
    %c0_i32_1 = arith.constant 0 : i32
    return %c0_i32, %c0_i32_0 : i32, i32
  }
  func.func @transform_9(%arg0: i32, %arg1: i32) -> (i32, i32) {
    %c0_i32 = arith.constant 0 : i32
    %c0_i32_0 = arith.constant 0 : i32
    %c0_i32_1 = arith.constant 0 : i32
    return %c0_i32, %c0_i32_0 : i32, i32
  }
  func.func @transform_10(%arg0: i32, %arg1: i32) -> (i32, i32) {
    %c0_i32 = arith.constant 0 : i32
    %c0_i32_0 = arith.constant 0 : i32
    %c0_i32_1 = arith.constant 0 : i32
    return %c0_i32, %c0_i32_0 : i32, i32
  }
  func.func @transform_11(%arg0: i32, %arg1: i32) -> (i32, i32) {
    %c0_i32 = arith.constant 0 : i32
    %c0_i32_0 = arith.constant 0 : i32
    %c0_i32_1 = arith.constant 0 : i32
    return %c0_i32, %c0_i32_0 : i32, i32
  }
  func.func @transform_12(%arg0: i32, %arg1: i32) -> (i32, i32) {
    %c0_i32 = arith.constant 0 : i32
    %c0_i32_0 = arith.constant 0 : i32
    return %arg1, %c0_i32 : i32, i32
  }
  func.func @transform_13(%arg0: i32, %arg1: i32) -> (i32, i32) {
    %c0_i32 = arith.constant 0 : i32
    %c0_i32_0 = arith.constant 0 : i32
    %c0_i32_1 = arith.constant 0 : i32
    return %c0_i32, %c0_i32_0 : i32, i32
  }
  func.func @transform_14(%arg0: i32, %arg1: i32) -> (i32, i32) {
    %c0_i32 = arith.constant 0 : i32
    %c0_i32_0 = arith.constant 0 : i32
    %c0_i32_1 = arith.constant 0 : i32
    return %c0_i32, %c0_i32_0 : i32, i32
  }
  func.func @transform_15(%arg0: i32, %arg1: i32) -> (i32, i32, i32) {
    %c0_i32 = arith.constant 0 : i32
    %c0_i32_0 = arith.constant 0 : i32
    %c0_i32_1 = arith.constant 0 : i32
    %c0_i32_2 = arith.constant 0 : i32
    return %c0_i32, %c0_i32_0, %c0_i32_1 : i32, i32, i32
  }
  func.func @transform_16(%arg0: i32, %arg1: i32) -> (i32, i32) {
    %c0_i32 = arith.constant 0 : i32
    %c0_i32_0 = arith.constant 0 : i32
    %c0_i32_1 = arith.constant 0 : i32
    return %c0_i32, %c0_i32_0 : i32, i32
  }
  func.func @transform_17(%arg0: i32, %arg1: i32) -> (i32, i32) {
    %c0_i32 = arith.constant 0 : i32
    %c0_i32_0 = arith.constant 0 : i32
    %c0_i32_1 = arith.constant 0 : i32
    return %c0_i32, %c0_i32_0 : i32, i32
  }
  func.func @transform_18(%arg0: i32, %arg1: i32) -> (i32, i32) {
    %c0_i32 = arith.constant 0 : i32
    %c0_i32_0 = arith.constant 0 : i32
    %c0_i32_1 = arith.constant 0 : i32
    return %c0_i32, %c0_i32_0 : i32, i32
  }
  func.func @transform_19(%arg0: i32, %arg1: i32) -> (i32, i32) {
    %c0_i32 = arith.constant 0 : i32
    %c0_i32_0 = arith.constant 0 : i32
    %c0_i32_1 = arith.constant 0 : i32
    return %c0_i32, %c0_i32_0 : i32, i32
  }
  func.func @transform_20(%arg0: i32, %arg1: i32) -> (i32, i32) {
    %c0_i32 = arith.constant 0 : i32
    %c0_i32_0 = arith.constant 0 : i32
    %c0_i32_1 = arith.constant 0 : i32
    return %c0_i32, %c0_i32_0 : i32, i32
  }
  func.func @transform_21(%arg0: i32, %arg1: i32) -> (i32, i32) {
    %c0_i32 = arith.constant 0 : i32
    %c0_i32_0 = arith.constant 0 : i32
    %c0_i32_1 = arith.constant 0 : i32
    return %c0_i32, %c0_i32_0 : i32, i32
  }
  func.func @transform_22(%arg0: i32, %arg1: i32) -> (i32, i32) {
    %c0_i32 = arith.constant 0 : i32
    %c0_i32_0 = arith.constant 0 : i32
    %c0_i32_1 = arith.constant 0 : i32
    return %c0_i32, %c0_i32_0 : i32, i32
  }
  func.func @transform_23(%arg0: i32, %arg1: i32) -> (i32, i32) {
    %c0_i32 = arith.constant 0 : i32
    %c0_i32_0 = arith.constant 0 : i32
    %c0_i32_1 = arith.constant 0 : i32
    return %c0_i32, %c0_i32_0 : i32, i32
  }
  func.func @transform_24(%arg0: i32, %arg1: i32) -> (i32, i32) {
    %c0_i32 = arith.constant 0 : i32
    %c0_i32_0 = arith.constant 0 : i32
    %c0_i32_1 = arith.constant 0 : i32
    return %c0_i32, %c0_i32_0 : i32, i32
  }
  func.func @transform_25(%arg0: i32, %arg1: i32) -> (i32, i32, i32) {
    %c0_i32 = arith.constant 0 : i32
    %c0_i32_0 = arith.constant 0 : i32
    return %arg0, %arg1, %c0_i32 : i32, i32, i32
  }
}

</mosaic_0001>

<bundles_post_ra>
// kernel: detr_forward.4
= control target key start
LH: loop header
LB: loop body
LE: loop exit
PB: predicated region body
PF: predicated region fallthrough
CT: control target
= control target key end

     0   :  { %v336_v21 = vmov 0.0   ;;  %vm337_vm0 = vmmov 0   ;;  %vm217_vm1 = vcmask 130048   ;;  %vm261_vm2 = vcmask 261120   ;;  %s434_s1 = inlined_call_operand.vmem [shape: bf16[256,16], index: 1, kind: input, shape index: {}]   ;;  %s435_s0 = inlined_call_operand.vmem [shape: f32[8,256], index: 0, kind: input, shape index: {}]   ;;  %s436_s3 = inlined_call_operand.vmem [shape: bf16[16,32], index: 3, kind: input, shape index: {}]   ;;  %s437_s2 = inlined_call_operand.vmem [shape: f32[1,16], index: 2, kind: input, shape index: {}]   ;;  %s438_s4 = inlined_call_operand.vmem [shape: f32[1,32], index: 4, kind: input, shape index: {}]   ;;  %s439_s5 = inlined_call_operand.vmem [shape: f32[8,32], index: 5, kind: output, shape index: {}]  }
   0x1   :  { %v319_v0 = vld [vmem:[%s434_s1 + $0x40] sm:$0xff]   ;;  %v321_v2 = vld [vmem:[%s434_s1 + $0x48] sm:$0xff]   ;;  %v323_v4 = vld [vmem:[%s434_s1 + $0x50] sm:$0xff]   ;;  %311 = vmatprep.subr.bf16.mxu1 %v336_v21  ;;  %313 = vmatprep.mubr.msk.bf16.mxu1 %vm337_vm0, %v336_v21 }
   0x2   :  { %v320_v1 = vld [vmem:[%s434_s1] sm:$0xff]   ;;  %287 = vmatprep.subr.bf16.mxu0 %v319_v0  ;;  %v322_v3 = vld [vmem:[%s434_s1 + $0x8] sm:$0xff]   ;;  %v324_v5 = vld [vmem:[%s434_s1 + $0x10] sm:$0xff]  }
   0x3   :  { %288 = vmatpush3.bf16.msra.mxu0 %v320_v1  ;;  %v325_v6 = vld [vmem:[%s434_s1 + $0x58] sm:$0xff]   ;;  %v327_v8 = vld [vmem:[%s434_s1 + $0x60] sm:$0xff]   ;;  %v329_v10 = vld [vmem:[%s434_s1 + $0x68] sm:$0xff]  }
   0x4   :  { %289 = vmatprep.subr.bf16.mxu0 %v321_v2  ;;  %v326_v7 = vld [vmem:[%s434_s1 + $0x18] sm:$0xff]   ;;  %v328_v9 = vld [vmem:[%s434_s1 + $0x20] sm:$0xff]   ;;  %v22_v11 = vld [vmem:[%s435_s0 + $0x8] sm:$0xff] }
   0x5   :  { %v24_v12 = vpack.c.bf16 %v22_v11, %v22_v11  ;;  %v330_v13 = vld [vmem:[%s434_s1 + $0x28] sm:$0xff]   ;;  %v331_v14 = vld [vmem:[%s434_s1 + $0x70] sm:$0xff]   ;;  %v333_v16 = vld [vmem:[%s434_s1 + $0x78] sm:$0xff]  }
   0x6   :  { %v332_v15 = vld [vmem:[%s434_s1 + $0x30] sm:$0xff]   ;;  %v334_v17 = vld [vmem:[%s434_s1 + $0x38] sm:$0xff]   ;;  %v21_v18 = vld [vmem:[%s435_s0] sm:$0xff] }
   0x7   :  { %290 = vmatpush3.bf16.msra.mxu0 %v322_v3  ;;  %192 = vmatprep.mubr.bf16.mxu0 %v24_v12  ;;  %v23_v19 = vpack.c.bf16 %v21_v18, %v21_v18  ;;  %v335_v20 = vld [vmem:[%s436_s3] sm:$0xff]  }
   0x8   :  { %291 = vmatprep.subr.bf16.mxu0 %v323_v4  ;;  %312 = vmatpush3.bf16.msra.mxu1 %v335_v20  ;;  %v267_v23 = vld [vmem:[%s437_s2] ss:$0 sm:$0xff] }
   0x9   :  { %v284_v31 = vld [vmem:[%s438_s4] ss:$0 sm:$0xff] }
   0xb   :  { %292 = vmatpush3.bf16.msra.mxu0 %v324_v5 }
   0xc   :  { %293 = vmatprep.subr.bf16.mxu0 %v325_v6 }
   0xf   :  { %294 = vmatpush3.bf16.msra.mxu0 %v326_v7 }
  0x10   :  { %295 = vmatprep.subr.bf16.mxu0 %v327_v8 }
  0x13   :  { %296 = vmatpush3.bf16.msra.mxu0 %v328_v9 }
  0x14   :  { %297 = vmatprep.subr.bf16.mxu0 %v329_v10 }
  0x17   :  { %298 = vmatpush3.bf16.msra.mxu0 %v330_v13 }
  0x18   :  { %299 = vmatprep.subr.bf16.mxu0 %v331_v14 }
  0x1b   :  { %300 = vmatpush3.bf16.msra.mxu0 %v332_v15 }
  0x1c   :  { %301 = vmatprep.subr.bf16.mxu0 %v333_v16 }
  0x1f   :  { %302 = vmatpush3.bf16.msra.mxu0 %v334_v17 }
  0x22   :  { %193 = vmatmul.mubr.bf16.vlgmr.msra.gmra.mrb[0].mxu0 %v23_v19 }
  0xf5   :  { %v303_v22 = vpop.f32.mrb[0].mxu0 }
  0xf6   :  { %v304_v24 = vpop.f32.mrb[1].mxu0 }
  0xf7   :  { %v305_v25 = vadd.f32 %v304_v24, %v303_v22  ;;  %v306_v26 = vpop.f32.mrb[2].mxu0 }
  0xf8   :  { %v307_v27 = vpop.f32.mrb[3].mxu0 }
  0xf9   :  { %v195_v28 = vadd.f32 %v305_v25, %v267_v23 }
  0xfb   :  { %v200_v29 = vmax.f32 %v195_v28, 0.0 }
  0xfd   :  { %v201_v30 = vpack.c.bf16 %v200_v29, %v200_v29 }
  0xff   :  { %314 = vmatmul.mubr.msk.bf16.vlgmr.msra.gmra.mrb[0].mxu1 %vm217_vm1, %v201_v30 }
 0x1d2   :  { %v255_v32 = vpop.f32.mrb[0].mxu1 }
 0x1d3   :  { %v256_v33 = vadd.f32 %v284_v31, %v255_v32  ;;  %v315_v34 = vpop.f32.mrb[1].mxu1 }
 0x1d4   :  { %v258_v35 = vpop.f32.mrb[2].mxu1 }
 0x1d5   :  { %262 = vst.msk [vmem:[%s439_s5] sm:$0xff] %vm261_vm2, %v256_v33  ;;  %v316_v36 = vpop.f32.mrb[3].mxu1 }

// kernel: detr_forward.7
= control target key start
LH: loop header
LB: loop body
LE: loop exit
PB: predicated region body
PF: predicated region fallthrough
CT: control target
= control target key end

     0   :  { %vm40_vm0 = vcmask 261120   ;;  %v432_v15 = vmov 0.0   ;;  %vm433_vm1 = vmmov 0   ;;  %s564_s0 = inlined_call_operand.vmem [shape: f32[16,32], index: 0, kind: input, shape index: {}]   ;;  %s565_s3 = inlined_call_operand.vmem [shape: bf16[32,32], index: 3, kind: input, shape index: {}]   ;;  %s566_s1 = inlined_call_operand.vmem [shape: f32[1,32], index: 1, kind: input, shape index: {}]   ;;  %s567_s2 = inlined_call_operand.vmem [shape: f32[1,32], index: 2, kind: input, shape index: {}]   ;;  %s568_s5 = inlined_call_operand.vmem [shape: bf16[32,32], index: 5, kind: input, shape index: {}]   ;;  %s569_s7 = inlined_call_operand.vmem [shape: bf16[32,128], index: 7, kind: input, shape index: {}]   ;;  %s570_s4 = inlined_call_operand.vmem [shape: f32[1,32], index: 4, kind: input, shape index: {}]   ;;  %s571_s8 = inlined_call_operand.vmem [shape: bf16[32,128], index: 8, kind: input, shape index: {}]   ;;  %s572_s6 = inlined_call_operand.vmem [shape: f32[1,32], index: 6, kind: input, shape index: {}]   ;;  %s573_s9 = inlined_call_operand.vmem [shape: f32[1,128], index: 9, kind: input, shape index: {}]   ;;  %s574_s10 = inlined_call_operand.vmem [shape: f32[16,128], index: 10, kind: output, shape index: {}]  }
   0x1   :  { %v36_v0 = vld [vmem:[%s564_s0] sm:$0xff]  ;;  %v37_v1 = vld [vmem:[%s564_s0 + $0x8] sm:$0xff]  ;;  %386 = vmatprep.subr.bf16.mxu0 %v432_v15  ;;  %394 = vmatprep.subr.bf16.mxu1 %v432_v15 }
   0x2   :  { %v41_v2 = vsel %vm40_vm0, %v36_v0, 0.0  ;;  %v44_v3 = vsel %vm40_vm0, %v37_v1, 0.0  ;;  %v420_v14 = vld [vmem:[%s565_s3] sm:$0xff]   ;;  %v421_v16 = vld [vmem:[%s565_s3 + $0x8] sm:$0xff]   ;;  %390 = vmatprep.mubr.msk.bf16.mxu0 %vm433_vm1, %v432_v15  ;;  %398 = vmatprep.mubr.msk.bf16.mxu1 %vm433_vm1, %v432_v15 }
   0x3   :  { %42 = vadd.xlane.f32.xlu0 %v41_v2  ;;  %387 = vmatpush3.bf16.msra.mxu0 %v420_v14  ;;  %v357_v25 = vld [vmem:[%s566_s1] ss:$0 sm:$0xff]  ;;  %v423_v35 = vld [vmem:[%s568_s5 + $0x8] sm:$0xff]  }
   0x4   :  { %388 = vmatprep.subr.bf16.mxu0 %v432_v15  ;;  %v358_v29 = vld [vmem:[%s567_s2] ss:$0 sm:$0xff]  ;;  %v425_v47 = vld [vmem:[%s569_s7 + $0x8] sm:$0xff]  }
   0x5   :  { %v422_v34 = vld [vmem:[%s568_s5] sm:$0xff]   ;;  %v427_v49 = vld [vmem:[%s571_s8 + $0x8] sm:$0xff]  }
   0x6   :  { %395 = vmatpush3.bf16.msra.mxu1 %v422_v34  ;;  %v359_v36 = vld [vmem:[%s570_s4] ss:$0 sm:$0xff] }
   0x7   :  { %45 = vadd.xlane.f32.xlu0 %v44_v3  ;;  %389 = vmatpush3.bf16.msra.mxu0 %v421_v16  ;;  %v424_v45 = vld [vmem:[%s569_s7] sm:$0xff]  }
   0x8   :  { %402 = vmatprep.subr.bf16.mxu0 %v432_v15  ;;  %396 = vmatprep.subr.bf16.mxu1 %v432_v15  ;;  %v426_v48 = vld [vmem:[%s571_s8] sm:$0xff]  }
   0x9   :  { %v363_v50 = vld [vmem:[%s572_s6] ss:$0 sm:$0xff] }
   0xa   :  { %397 = vmatpush3.bf16.msra.mxu1 %v423_v35 }
   0xb   :  { %410 = vmatprep.subr.bf16.mxu1 %v432_v15 }
  0x90   :  { %v43_v4 = vpop.xlane.xlu0 %42 }
  0x91   :  { %v48_v5 = vmul.f32 0.03125, %v43_v4 }
  0x93   :  { %v50_v6 = vsub.f32 %v36_v0, %v48_v5 }
  0x94   :  { %v46_v7 = vpop.xlane.xlu0 %45 }
  0x95   :  { %v49_v8 = vmul.f32 0.03125, %v46_v7  ;;  %v52_v9 = vmul.f32 %v50_v6, %v50_v6 }
  0x97   :  { %v51_v10 = vsub.f32 %v37_v1, %v49_v8  ;;  %v54_v11 = vsel %vm40_vm0, %v52_v9, 0.0  ;;  %v373_v1 = vld [vmem:[%s573_s9] ss:$0 sm:$0xff] }
  0x98   :  { %55 = vadd.xlane.f32.xlu1 %v54_v11 }
  0x99   :  { %v53_v12 = vmul.f32 %v51_v10, %v51_v10 }
  0x9b   :  { %v57_v13 = vsel %vm40_vm0, %v53_v12, 0.0 }
  0x9c   :  { %58 = vadd.xlane.f32.xlu1 %v57_v13 }
 0x125   :  { %v56_v17 = vpop.xlane.xlu1 %55 }
 0x126   :  { %v60_v18 = vmul.f32 0.03125, %v56_v17 }
 0x128   :  { %v62_v19 = vadd.f32 1e-05, %v60_v18 }
 0x129   :  { %v59_v20 = vpop.xlane.xlu1 %58 }
 0x12a   :  { %428 = vrsqrt.f32 %v62_v19  ;;  %v61_v21 = vmul.f32 0.03125, %v59_v20 }
 0x12c   :  { %v63_v22 = vadd.f32 1e-05, %v61_v21 }
 0x12e   :  { %430 = vrsqrt.f32 %v63_v22 }
 0x134   :  { %v429_v23 = vpop.eup %428 }
 0x135   :  { %v66_v24 = vmul.f32 %v429_v23, %v50_v6 }
 0x137   :  { %v74_v28 = vmul.f32 %v357_v25, %v66_v24 }
 0x138   :  { %v431_v26 = vpop.eup %430 }
 0x139   :  { %v67_v27 = vmul.f32 %v431_v26, %v51_v10  ;;  %v82_v31 = vadd.f32 %v358_v29, %v74_v28 }
 0x13b   :  { %v75_v30 = vmul.f32 %v357_v25, %v67_v27 }
 0x13d   :  { %v83_v32 = vadd.f32 %v358_v29, %v75_v30 }
 0x13f   :  { %v84_v33 = vpack.c.bf16 %v83_v32, %v82_v31 }
 0x141   :  { %391 = vmatmul.mubr.msk.bf16.vlgmr.msra.gmra.mrb[0].mxu0 %vm40_vm0, %v84_v33 }
 0x142   :  { %406 = vmatprep.mubr.msk.bf16.mxu0 %vm433_vm1, %v432_v15  ;;  %403 = vmatpush3.bf16.msra.mxu0 %v426_v48 }
 0x143   :  { %404 = vmatprep.subr.bf16.mxu0 %v432_v15 }
 0x146   :  { %405 = vmatpush3.bf16.msra.mxu0 %v427_v49 }
 0x214   :  { %v145_v37 = vpop.f32.mrb[0].mxu0 }
 0x215   :  { %v146_v38 = vadd.f32 %v359_v36, %v145_v37  ;;  %v392_v39 = vpop.f32.mrb[1].mxu0 }
 0x216   :  { %v148_v40 = vpop.f32.mrb[2].mxu0 }
 0x217   :  { %v149_v41 = vadd.f32 %v359_v36, %v148_v40  ;;  %v393_v42 = vpop.f32.mrb[3].mxu0  ;;  %v152_v43 = vmax.f32 %v146_v38, 0.0 }
 0x219   :  { %v153_v44 = vmax.f32 %v149_v41, 0.0 }
 0x21b   :  { %v154_v46 = vpack.c.bf16 %v153_v44, %v152_v43 }
 0x21d   :  { %399 = vmatmul.mubr.msk.bf16.vlgmr.msra.gmra.mrb[0].mxu1 %vm40_vm0, %v154_v46 }
 0x21e   :  { %411 = vmatpush3.bf16.msra.mxu1 %v424_v45  ;;  %414 = vmatprep.mubr.msk.bf16.mxu1 %vm433_vm1, %v432_v15 }
 0x21f   :  { %412 = vmatprep.subr.bf16.mxu1 %v432_v15 }
 0x222   :  { %413 = vmatpush3.bf16.msra.mxu1 %v425_v47 }
 0x225   :  { %415 = vmatmul.mubr.msk.bf16.vlgmr.msra.gmra.mrb[4].mxu1 %vm40_vm0, %v84_v33 }
 0x2f0   :  { %v215_v51 = vpop.f32.mrb[0].mxu1 }
 0x2f1   :  { %v216_v52 = vadd.f32 %v363_v50, %v215_v51  ;;  %v400_v53 = vpop.f32.mrb[1].mxu1 }
 0x2f2   :  { %v218_v54 = vpop.f32.mrb[2].mxu1 }
 0x2f3   :  { %v219_v55 = vadd.f32 %v363_v50, %v218_v54  ;;  %v401_v56 = vpop.f32.mrb[3].mxu1  ;;  %v222_v57 = vmax.f32 %v216_v52, 0.0 }
 0x2f5   :  { %v223_v58 = vmax.f32 %v219_v55, 0.0 }
 0x2f7   :  { %v228_v59 = vpack.c.bf16 %v223_v58, %v222_v57 }
 0x2f8   :  { %v335_v60 = vpop.f32.mrb[4].mxu1 }
 0x2f9   :  { %407 = vmatmul.mubr.msk.bf16.vlgmr.msra.gmra.mrb[4].mxu0 %vm40_vm0, %v228_v59  ;;  %v416_v61 = vpop.f32.mrb[5].mxu1 }
 0x2fa   :  { %v338_v62 = vpop.f32.mrb[6].mxu1 }
 0x2fb   :  { %v417_v63 = vpop.f32.mrb[7].mxu1 }
 0x3cc   :  { %v282_v0 = vpop.f32.mrb[4].mxu0 }
 0x3cd   :  { %v336_v2 = vadd.f32 %v335_v60, %v282_v0  ;;  %v408_v3 = vpop.f32.mrb[5].mxu0 }
 0x3ce   :  { %v285_v4 = vpop.f32.mrb[6].mxu0 }
 0x3cf   :  { %v349_v5 = vadd.f32 %v373_v1, %v336_v2  ;;  %v339_v6 = vadd.f32 %v338_v62, %v285_v4  ;;  %v409_v7 = vpop.f32.mrb[7].mxu0 }
 0x3d1   :  { %351 = vst [vmem:[%s574_s10] sm:$0xff] %v349_v5  ;;  %v350_v8 = vadd.f32 %v373_v1, %v339_v6 }
 0x3d3   :  { %352 = vst [vmem:[%s574_s10 + $0x8] sm:$0xff] %v350_v8 }

// kernel: detr_forward.5
= control target key start
LH: loop header
LB: loop body
LE: loop exit
PB: predicated region body
PF: predicated region fallthrough
CT: control target
= control target key end

     0   :  { %s2060_s21 = smov 0   ;;  %s2062_s22 = smov 0   ;;  %s2293_s0 = inlined_call_operand.vmem [shape: f32[2,4,32], index: 0, kind: input, shape index: {}, may-alias: {0,1}]   ;;  %s2294_s1 = inlined_call_operand.vmem [shape: f32[2,4,32], index: 1, kind: input, shape index: {}, may-alias: {0,1}]   ;;  %s2295_s2 = inlined_call_operand.vmem [shape: bf16[32,32], index: 2, kind: input, shape index: {}]   ;;  %s2296_s3 = inlined_call_operand.vmem [shape: f32[4,32], index: 3, kind: input, shape index: {}]   ;;  %s2297_s4 = inlined_call_operand.vmem [shape: bf16[32,64], index: 4, kind: input, shape index: {}]   ;;  %s2298_s5 = inlined_call_operand.vmem [shape: f32[4,64], index: 5, kind: input, shape index: {}]   ;;  %s2299_s6 = inlined_call_operand.vmem [shape: bf16[4,8,32], index: 6, kind: input, shape index: {}]   ;;  %s2300_s7 = inlined_call_operand.vmem [shape: f32[1,32], index: 7, kind: input, shape index: {}]   ;;  %s2301_s8 = inlined_call_operand.vmem [shape: f32[1,32], index: 8, kind: input, shape index: {}]   ;;  %s2302_s9 = inlined_call_operand.vmem [shape: f32[1,32], index: 9, kind: input, shape index: {}]   ;;  %s2303_s10 = inlined_call_operand.vmem [shape: bf16[32,64], index: 10, kind: input, shape index: {}]   ;;  %s2304_s11 = inlined_call_operand.vmem [shape: f32[1,64], index: 11, kind: input, shape index: {}]   ;;  %s2305_s12 = inlined_call_operand.vmem [shape: bf16[64,32], index: 12, kind: input, shape index: {}]   ;;  %s2306_s13 = inlined_call_operand.vmem [shape: f32[1,32], index: 13, kind: input, shape index: {}]   ;;  %s2307_s14 = inlined_call_operand.vmem [shape: f32[1,32], index: 14, kind: input, shape index: {}]   ;;  %s2308_s15 = inlined_call_operand.vmem [shape: f32[1,32], index: 15, kind: input, shape index: {}]   ;;  %s2309_s16 = inlined_call_operand.vmem [shape: f32[2,4,32], index: 16, kind: output, shape index: {}]  }
   0x1   :  { %2310 = sst [smem:[#allocation2_spill]] %s2293_s0  ;;  %s2064_s23 = smov 0  }
   0x2 LB: > { %s38_s24 = sadd.s32 1, %s1963_s22  ;;  %p1700_p0 = scmp.ge.s32.totalorder %s1967_s23, 1  ;;  %s1967_s23 = sphi %s2064_s23, %s26_s23   ;;  %s1963_s22 = sphi %s2062_s22, %s2313_s22   ;;  %s1959_s21 = sphi %s2060_s21, %s2312_s21  }
   0x3   : > { %p40_p1 = scmp.ge.s32.totalorder %s38_s24, 2  ;;  %p498_p2 = scmp.lt.s32.totalorder %s1967_s23, 3 }
   0x5   : > { %s2315_s24 = smov (%p40_p1, %s38_s24), 0  ;;  %p499_p3 = pnand %p1700_p0, %p498_p2 }
   0x6   : > { %v1915_v0 = vld [vmem:[%s2295_s2] sm:$0xff] (!%p499_p3)   ;;  %v1969_v1 = vmov (!%p499_p3), 0.0   ;;  %v1917_v3 = vld [vmem:[%s2295_s2 + $0x8] sm:$0xff] (!%p499_p3)   ;;  %vm1970_vm0 = vmmov (!%p499_p3), 0   ;;  %p560_p4 = scmp.lt.s32.totalorder (!%p499_p3), %s1959_s21, 1  ;;  %vm603_vm1 = vcmask (!%p499_p3), 261120  }
   0x7   : > { %502 = sbr.rel (%p499_p3) target bundleno = 2393 (0x959), region = 84  ;;  %1777 = vmatprep.subr.bf16.mxu0 (!%p499_p3), %v1969_v1  ;;  %1785 = vmatprep.subr.bf16.mxu1 (!%p499_p3), %v1969_v1  ;;  %v1916_v2 = vld [vmem:[%s2297_s4] sm:$0xff] (!%p499_p3)   ;;  %v1918_v4 = vld [vmem:[%s2297_s4 + $0x8] sm:$0xff] (!%p499_p3)   ;;  %s2311_s25 = sld [smem:[#allocation2_spill]] (!%p499_p3)  ;;  %vm737_vm2 = vcmask (!%p499_p3), 64512   ;;  %vm922_vm3 = vcmask (!%p499_p3), 27648  }
   0x8   : > { %1778 = vmatpush3.bf16.msra.mxu0 (!%p499_p3), %v1915_v0  ;;  %1781 = vmatprep.mubr.msk.bf16.mxu0 (!%p499_p3), %vm1970_vm0, %v1969_v1  ;;  %v590_v9 = vld [vmem:[%s2296_s3] sm:$0xf] (!%p499_p3)  ;;  %s1971_s19 = smov (!%p499_p3), 120   ;;  %s1972_s20 = smov (!%p499_p3), 112   ;;  %vm978_vm4 = vcmask (!%p499_p3), 1041408   ;;  %vm974_vm5 = vcmask (!%p499_p3), 31744  }
   0x9   : > { %1786 = vmatpush3.bf16.msra.mxu1 (!%p499_p3), %v1916_v2  ;;  %1779 = vmatprep.subr.bf16.mxu0 (!%p499_p3), %v1969_v1  ;;  %v652_v10 = vld [vmem:[%s2298_s5] sm:$0xf] (!%p499_p3)  ;;  %vm1180_vm6 = vcmask (!%p499_p3), 1043456   ;;  %vm1362_vm7 = vcmask (!%p499_p3), 257024   ;;  %vm1510_vm8 = vcmask (!%p499_p3), 523264  }
   0xa   : > { %1787 = vmatprep.subr.bf16.mxu1 (!%p499_p3), %v1969_v1  ;;  %1789 = vmatprep.mubr.msk.bf16.mxu1 (!%p499_p3), %vm1970_vm0, %v1969_v1 }
   0xc   : > { %1780 = vmatpush3.bf16.msra.mxu0 (!%p499_p3), %v1917_v3 }
   0xd   : > { %1788 = vmatpush3.bf16.msra.mxu1 (!%p499_p3), %v1918_v4  ;;  %1793 = vmatprep.subr.bf16.mxu0 (!%p499_p3), %v1969_v1 }
   0xe   : > { %s2317_s21 = smov (!%p560_p4, %s1959_s21), 1  ;;  %1799 = vmatprep.subr.bf16.mxu1 %v1969_v1 }
   0xf   : > { %s2098_s18 = sshll.u32 %s2317_s21, 2 }
  0x10   : > { %s566_s26 = scalar_lea.vmem %s2311_s25, %s2098_s18  ;;  %s570_s29 = scalar_lea.vmem %s2294_s1, %s2098_s18 }
  0x11   : > { %v2105_v5 = vld [vmem:[%s566_s26] sm:$0xf]  ;;  %s1973_s25 = smov 104   ;;  %s1974_s26 = smov 96  }
  0x12   : > { %v585_v6 = vpack.c.bf16 %v2105_v5, %v2105_v5  ;;  %v584_v7 = vld [vmem:[%s570_s29] sm:$0xf]  ;;  %s581_s21 = scalar_lea.vmem %s2309_s16, %s2098_s18 }
  0x13   : > { %v647_v8 = vpack.c.bf16 %v584_v7, %v584_v7 }
  0x14   : > { %1782 = vmatmul.mubr.msk.bf16.vlgmr.msra.gmra.mrb[0].mxu0 %vm603_vm1, %v585_v6 }
  0x15   : > { %1790 = vmatmul.mubr.msk.bf16.vlgmr.msra.gmra.mrb[0].mxu1 %vm603_vm1, %v647_v8  ;;  %1795 = vmatprep.mubr.msk.bf16.mxu0 %vm1970_vm0, %v1969_v1 }
  0x16   : > { %1801 = vmatprep.mubr.msk.bf16.mxu1 %vm1970_vm0, %v1969_v1 }
  0xe7   : > { %v641_v11 = vpop.f32.mrb[0].mxu0 }
  0xe8   : > { %v642_v12 = vadd.f32 %v641_v11, %v590_v9  ;;  %v702_v13 = vpop.f32.mrb[0].mxu1  ;;  %v1783_v14 = vpop.f32.mrb[1].mxu0 }
  0xe9   : > { %v703_v15 = vadd.f32 %v702_v13, %v652_v10  ;;  %v1791_v16 = vpop.f32.mrb[1].mxu1  ;;  %v644_v17 = vpop.f32.mrb[2].mxu0 }
  0xea   : > { %v708_v18 = vmul.f32 0.35355338, %v642_v12  ;;  %v705_v19 = vpop.f32.mrb[2].mxu1  ;;  %v1784_v20 = vpop.f32.mrb[3].mxu0 }
  0xeb   : > { %724 = vrot.lane.b32.xlu0 %v703_v15, %s1971_s19  ;;  %v1792_v21 = vpop.f32.mrb[3].mxu1  ;;  %v2126_v22 = vpack.c.bf16 %v703_v15, %v703_v15 }
  0xec   : > { %710 = vrot.lane.b32.xlu1 %v708_v18, %s1971_s19  ;;  %v719_v24 = vpack.c.bf16 %v708_v18, %v708_v18 }
  0xed   : > { %v742_v23 = vsel %vm737_vm2, %v2126_v22, 0 }
  0xee   : > { %1794 = vmatpush3.bf16.xpose.msra.mxu0 %v742_v23 }
  0xef   : > { %727 = vrot.lane.b32.xlu0 %v703_v15, %s1972_s20  ;;  %1805 = vmatprep.subr.bf16.mxu0 %v1969_v1 }
  0xf0   : > { %730 = vrot.lane.b32.xlu1 %v703_v15, %s1973_s25 }
  0xf3   : > { %713 = vrot.lane.b32.xlu0 %v708_v18, %s1972_s20 }
  0xf4   : > { %716 = vrot.lane.b32.xlu1 %v708_v18, %s1973_s25 }
  0xf5   : > { %1796 = vmatmul.mubr.msk.bf16.vlgmr.msra.gmra.mrb[4].mxu0 %vm737_vm2, %v719_v24 }
  0xf6   : > { %1807 = vmatprep.mubr.msk.bf16.mxu0 %vm1970_vm0, %v1969_v1 }
 0x15d   : > { %v725_v25 = vpop.permute.xlu0 %724 }
 0x15e   : > { %v2134_v26 = vpack.c.bf16 %v725_v25, %v725_v25  ;;  %v711_v27 = vpop.permute.xlu1 %710 }
 0x15f   : > { %v720_v34 = vpack.c.bf16 %v711_v27, %v711_v27 }
 0x160   : > { %v788_v28 = vsel %vm737_vm2, %v2134_v26, 0 }
 0x161   : > { %1800 = vmatpush3.bf16.xpose.msra.mxu1 %v788_v28  ;;  %v728_v29 = vpop.permute.xlu0 %727 }
 0x162   : > { %v2138_v30 = vpack.c.bf16 %v728_v29, %v728_v29  ;;  %v731_v31 = vpop.permute.xlu1 %730  ;;  %1811 = vmatprep.subr.bf16.mxu1 %v1969_v1 }
 0x163   : > { %v2143_v33 = vpack.c.bf16 %v731_v31, %v731_v31 }
 0x164   : > { %v834_v32 = vsel %vm737_vm2, %v2138_v30, 0 }
 0x165   : > { %1806 = vmatpush3.bf16.xpose.msra.mxu0 %v834_v32  ;;  %v714_v35 = vpop.permute.xlu0 %713  ;;  %v880_v36 = vsel %vm737_vm2, %v2143_v33, 0 }
 0x166   : > { %1817 = vmatprep.subr.bf16.mxu0 %v1969_v1  ;;  %v721_v37 = vpack.c.bf16 %v714_v35, %v714_v35  ;;  %v717_v38 = vpop.permute.xlu1 %716 }
 0x167   : > { %v722_v39 = vpack.c.bf16 %v717_v38, %v717_v38 }
 0x168   : > { %1802 = vmatmul.mubr.msk.bf16.vlgmr.msra.gmra.mrb[4].mxu1 %vm737_vm2, %v720_v34 }
 0x169   : > { %1812 = vmatpush3.bf16.xpose.msra.mxu1 %v880_v36  ;;  %1813 = vmatprep.mubr.msk.bf16.mxu1 %vm1970_vm0, %v1969_v1  ;;  %v1173_v36 = vld [vmem:[%s2299_s6] sm:$0xf] }
 0x16a   : > { %1823 = vmatprep.subr.bf16.mxu1 %v1969_v1 }
 0x16c   : > { %1808 = vmatmul.mubr.msk.bf16.vlgmr.msra.gmra.mrb[8].mxu0 %vm737_vm2, %v721_v37 }
 0x16d   : > { %1819 = vmatprep.mubr.msk.bf16.mxu0 %vm1970_vm0, %v1969_v1 }
 0x170   : > { %1814 = vmatmul.mubr.msk.bf16.vlgmr.msra.gmra.mrb[8].mxu1 %vm737_vm2, %v722_v39 }
 0x171   : > { %1825 = vmatprep.mubr.msk.bf16.mxu1 %vm1970_vm0, %v1969_v1 }
 0x1c8   : > { %v778_v40 = vpop.f32.mrb[4].mxu0 }
 0x1c9   : > { %v1797_v41 = vpop.f32.mrb[5].mxu0  ;;  %v923_v42 = vsel %vm922_vm3, %v778_v40, -inf }
 0x1ca   : > { %924 = vmax.xlane.f32.xlu0 %v923_v42  ;;  %v781_v43 = vpop.f32.mrb[6].mxu0 }
 0x1cb   : > { %v1798_v44 = vpop.f32.mrb[7].mxu0 }
 0x1cc   : > { %v1174_v44 = vld [vmem:[%s2299_s6 + $0x4] sm:$0xf] }
 0x23b   : > { %v824_v45 = vpop.f32.mrb[4].mxu1 }
 0x23c   : > { %v1803_v46 = vpop.f32.mrb[5].mxu1  ;;  %v926_v47 = vsel %vm922_vm3, %v824_v45, -inf }
 0x23d   : > { %927 = vmax.xlane.f32.xlu1 %v926_v47  ;;  %v827_v48 = vpop.f32.mrb[6].mxu1  ;;  %v1175_v46 = vld [vmem:[%s2299_s6 + $0x8] sm:$0xf] }
 0x23e   : > { %v1804_v49 = vpop.f32.mrb[7].mxu1 }
 0x23f   : > { %v870_v50 = vpop.f32.mrb[8].mxu0 }
 0x240   : > { %v1809_v51 = vpop.f32.mrb[9].mxu0  ;;  %v929_v52 = vsel %vm922_vm3, %v870_v50, -inf }
 0x241   : > { %930 = vmax.xlane.f32.xlu0 %v929_v52  ;;  %v873_v53 = vpop.f32.mrb[10].mxu0 }
 0x242   : > { %v1810_v54 = vpop.f32.mrb[11].mxu0  ;;  %v1176_v53 = vld [vmem:[%s2299_s6 + $0xc] sm:$0xf] }
 0x243   : > { %v916_v55 = vpop.f32.mrb[8].mxu1 }
 0x244   : > { %v1815_v56 = vpop.f32.mrb[9].mxu1  ;;  %v932_v57 = vsel %vm922_vm3, %v916_v55, -inf }
 0x245   : > { %v919_v58 = vpop.f32.mrb[10].mxu1  ;;  %933 = vmax.xlane.f32.xlu0 %v932_v57  ;;  %v1320_v57 = vsel %vm1180_vm6, %v1176_v53, 0  ;;  %v1923_v53 = vld [vmem:[%s2305_s12 + $0x10] sm:$0xff]  }
 0x246   : > { %v1816_v59 = vpop.f32.mrb[11].mxu1 }
 0x24e   : > { %972 = vrot.lane.b32.xlu1 %v2126_v22, %s1974_s26 }
 0x257   : > { %v925_v60 = vpop.xlane.xlu0 %924 }
 0x258   : > { %v935_v61 = vsub.f32 %v778_v40, %v925_v60  ;;  %v1182_v40 = vsel %vm1180_vm6, %v1173_v36, 0 }
 0x25a   : > { %v939_v62 = vmul.f32 1.442695, %v935_v61 }
 0x25c   : > { %1925 = vpow2.f32 %v939_v62 }
 0x266   : > { %v1926_v63 = vpop.eup %1925 }
 0x267   : > { %v947_v0 = vsel %vm922_vm3, %v1926_v63, 0.0 }
 0x272   : > { %948 = vadd.xlane.f32.xlu1 %v947_v0 }
 0x2ca   : > { %v928_v2 = vpop.xlane.xlu1 %927 }
 0x2cb   : > { %v936_v3 = vsub.f32 %v824_v45, %v928_v2  ;;  %v1228_v45 = vsel %vm1180_vm6, %v1174_v44, 0 }
 0x2cd   : > { %v941_v4 = vmul.f32 1.442695, %v936_v3 }
 0x2ce   : > { %v973_v6 = vpop.permute.xlu1 %972  ;;  %v931_v7 = vpop.xlane.xlu0 %930 }
 0x2cf   : > { %1927 = vpow2.f32 %v941_v4  ;;  %v980_v8 = vsel %vm978_vm4, %v973_v6, 0  ;;  %v937_v9 = vsub.f32 %v870_v50, %v931_v7  ;;  %v1274_v50 = vsel %vm1180_vm6, %v1175_v46, 0 }
 0x2d0   : > { %1818 = vmatpush3.bf16.msra.mxu0 %v980_v8 }
 0x2d1   : > { %v943_v10 = vmul.f32 1.442695, %v937_v9  ;;  %1829 = vmatprep.subr.bf16.mxu0 %v1969_v1 }
 0x2d2   : > { %v934_v11 = vpop.xlane.xlu0 %933 }
 0x2d3   : > { %1929 = vpow2.f32 %v943_v10  ;;  %v938_v12 = vsub.f32 %v916_v55, %v934_v11 }
 0x2d5   : > { %v945_v13 = vmul.f32 1.442695, %v938_v12 }
 0x2d7   : > { %1931 = vpow2.f32 %v945_v13 }
 0x2d9   : > { %v1928_v14 = vpop.eup %1927 }
 0x2da   : > { %v950_v15 = vsel %vm922_vm3, %v1928_v14, 0.0 }
 0x2db   : > { %951 = vadd.xlane.f32.xlu0 %v950_v15 }
 0x2dd   : > { %v1930_v16 = vpop.eup %1929 }
 0x2de   : > { %v953_v17 = vsel %vm922_vm3, %v1930_v16, 0.0 }
 0x2df   : > { %954 = vadd.xlane.f32.xlu1 %v953_v17 }
 0x2e1   : > { %v1932_v18 = vpop.eup %1931 }
 0x2e2   : > { %v956_v19 = vsel %vm922_vm3, %v1932_v18, 0.0 }
 0x2e3   : > { %957 = vadd.xlane.f32.xlu0 %v956_v19 }
 0x2f0   : > { %1072 = vrot.lane.b32.xlu1 %v2138_v30, %s1974_s26 }
 0x2f4   : > { %1121 = vrot.lane.b32.xlu1 %v2143_v33, %s1974_s26 }
 0x2f9   : > { %1023 = vrot.lane.b32.xlu0 %v2134_v26, %s1974_s26 }
 0x2ff   : > { %v949_v20 = vpop.xlane.xlu1 %948 }
 0x300   : > { %1933 = vrcp.f32 %v949_v20 }
 0x30a   : > { %v1934_v21 = vpop.eup %1933 }
 0x30b   : > { %v963_v22 = vmul.f32 %v1934_v21, %v1926_v63 }
 0x30d   : > { %v967_v23 = vpack.c.bf16 %v963_v22, %v963_v22 }
 0x30f   : > { %1820 = vmatmul.mubr.msk.bf16.vlgmr.msra.gmra.mrb[12].mxu0 %vm974_vm5, %v967_v23 }
 0x310   : > { %1831 = vmatprep.mubr.msk.bf16.mxu0 %vm1970_vm0, %v1969_v1 }
 0x368   : > { %v952_v24 = vpop.xlane.xlu0 %951 }
 0x369   : > { %1935 = vrcp.f32 %v952_v24 }
 0x36c   : > { %v955_v25 = vpop.xlane.xlu1 %954 }
 0x36d   : > { %1937 = vrcp.f32 %v955_v25 }
 0x370   : > { %v1073_v27 = vpop.permute.xlu1 %1072  ;;  %v958_v28 = vpop.xlane.xlu0 %957 }
 0x371   : > { %v1078_v29 = vsel %vm978_vm4, %v1073_v27, 0  ;;  %1939 = vrcp.f32 %v958_v28  ;;  %v1722_v28 = vld [vmem:[%s2300_s7] ss:$0 sm:$0xff] }
 0x372   : > { %1830 = vmatpush3.bf16.msra.mxu0 %v1078_v29 }
 0x373   : > { %v1936_v26 = vpop.eup %1935  ;;  %1841 = vmatprep.subr.bf16.mxu0 %v1969_v1 }
 0x374   : > { %v964_v30 = vmul.f32 %v1936_v26, %v1928_v14  ;;  %v1024_v31 = vpop.permute.xlu0 %1023  ;;  %v1122_v33 = vpop.permute.xlu1 %1121 }
 0x375   : > { %v1029_v32 = vsel %vm978_vm4, %v1024_v31, 0  ;;  %v1127_v38 = vsel %vm978_vm4, %v1122_v33, 0 }
 0x376   : > { %1824 = vmatpush3.bf16.msra.mxu1 %v1029_v32  ;;  %v968_v34 = vpack.c.bf16 %v964_v30, %v964_v30 }
 0x377   : > { %v1938_v35 = vpop.eup %1937  ;;  %1835 = vmatprep.subr.bf16.mxu1 %v1969_v1 }
 0x378   : > { %v965_v37 = vmul.f32 %v1938_v35, %v1930_v16 }
 0x379   : > { %1826 = vmatmul.mubr.msk.bf16.vlgmr.msra.gmra.mrb[12].mxu1 %vm974_vm5, %v968_v34 }
 0x37a   : > { %1836 = vmatpush3.bf16.msra.mxu1 %v1127_v38  ;;  %v969_v39 = vpack.c.bf16 %v965_v37, %v965_v37  ;;  %1837 = vmatprep.mubr.msk.bf16.mxu1 %vm1970_vm0, %v1969_v1 }
 0x37b   : > { %v1940_v41 = vpop.eup %1939  ;;  %1847 = vmatprep.subr.bf16.mxu1 %v1969_v1 }
 0x37c   : > { %v966_v42 = vmul.f32 %v1940_v41, %v1932_v18  ;;  %1832 = vmatmul.mubr.msk.bf16.vlgmr.msra.gmra.mrb[16].mxu0 %vm974_vm5, %v969_v39  ;;  %v1921_v41 = vld [vmem:[%s2305_s12] sm:$0xff]  }
 0x37d   : > { %1842 = vmatpush3.bf16.msra.mxu0 %v1182_v40  ;;  %1843 = vmatprep.mubr.msk.bf16.mxu0 %vm1970_vm0, %v1969_v1  ;;  %v1919_v40 = vld [vmem:[%s2303_s10] sm:$0xff]  }
 0x37e   : > { %v970_v43 = vpack.c.bf16 %v966_v42, %v966_v42  ;;  %1853 = vmatprep.subr.bf16.mxu0 %v1969_v1  ;;  %v1922_v42 = vld [vmem:[%s2305_s12 + $0x8] sm:$0xff]  }
 0x381   : > { %1838 = vmatmul.mubr.msk.bf16.vlgmr.msra.gmra.mrb[16].mxu1 %vm974_vm5, %v970_v43 }
 0x382   : > { %1849 = vmatprep.mubr.msk.bf16.mxu1 %vm1970_vm0, %v1969_v1  ;;  %1848 = vmatpush3.bf16.msra.mxu1 %v1228_v45 }
 0x383   : > { %1859 = vmatprep.subr.bf16.mxu1 %v1969_v1 }
 0x3e2   : > { %v1016_v47 = vpop.f32.mrb[12].mxu0 }
 0x3e3   : > { %v1169_v48 = vpack.c.bf16 %v1016_v47, %v1016_v47  ;;  %v1821_v49 = vpop.f32.mrb[13].mxu0  ;;  %v1723_v47 = vld [vmem:[%s2301_s8] ss:$0 sm:$0xff] }
 0x3e4   : > { %v1019_v51 = vpop.f32.mrb[14].mxu0  ;;  %v1724_v49 = vld [vmem:[%s2302_s9] ss:$0 sm:$0xff] }
 0x3e5   : > { %v1822_v52 = vpop.f32.mrb[15].mxu0  ;;  %1844 = vmatmul.mubr.msk.bf16.vlgmr.msra.gmra.mrb[20].mxu0 %vm737_vm2, %v1169_v48 }
 0x3e6   : > { %1854 = vmatpush3.bf16.msra.mxu0 %v1274_v50  ;;  %1855 = vmatprep.mubr.msk.bf16.mxu0 %vm1970_vm0, %v1969_v1 }
 0x3e7   : > { %1865 = vmatprep.subr.bf16.mxu0 %v1969_v1 }
 0x44c   : > { %v1065_v54 = vpop.f32.mrb[12].mxu1 }
 0x44d   : > { %v1170_v55 = vpack.c.bf16 %v1065_v54, %v1065_v54  ;;  %v1827_v56 = vpop.f32.mrb[13].mxu1  ;;  %v1924_v54 = vld [vmem:[%s2305_s12 + $0x18] sm:$0xff]  }
 0x44e   : > { %v1068_v58 = vpop.f32.mrb[14].mxu1 }
 0x44f   : > { %v1828_v59 = vpop.f32.mrb[15].mxu1  ;;  %v1114_v60 = vpop.f32.mrb[16].mxu0  ;;  %1850 = vmatmul.mubr.msk.bf16.vlgmr.msra.gmra.mrb[20].mxu1 %vm737_vm2, %v1170_v55  ;;  %v1725_v55 = vld [vmem:[%s2304_s11] ss:$0 sm:$0xff] }
 0x450   : > { %v1171_v61 = vpack.c.bf16 %v1114_v60, %v1114_v60  ;;  %v1833_v62 = vpop.f32.mrb[17].mxu0  ;;  %1860 = vmatpush3.bf16.msra.mxu1 %v1320_v57  ;;  %1861 = vmatprep.mubr.msk.bf16.mxu1 %vm1970_vm0, %v1969_v1 }
 0x451   : > { %v1117_v63 = vpop.f32.mrb[18].mxu0  ;;  %1873 = vmatprep.subr.bf16.mxu1 %v1969_v1 }
 0x452   : > { %v1834_v0 = vpop.f32.mrb[19].mxu0  ;;  %1856 = vmatmul.mubr.msk.bf16.vlgmr.msra.gmra.mrb[24].mxu0 %vm737_vm2, %v1171_v61 }
 0x453   : > { %1869 = vmatprep.mubr.msk.bf16.mxu0 %vm1970_vm0, %v1969_v1  ;;  %1866 = vmatpush3.bf16.msra.mxu0 %v1919_v40 }
 0x454   : > { %v1163_v2 = vpop.f32.mrb[16].mxu1  ;;  %1867 = vmatprep.subr.bf16.mxu0 %v1969_v1 }
 0x455   : > { %v1172_v3 = vpack.c.bf16 %v1163_v2, %v1163_v2  ;;  %v1839_v4 = vpop.f32.mrb[17].mxu1 }
 0x456   : > { %v1166_v6 = vpop.f32.mrb[18].mxu1 }
 0x457   : > { %v1840_v7 = vpop.f32.mrb[19].mxu1  ;;  %1862 = vmatmul.mubr.msk.bf16.vlgmr.msra.gmra.mrb[24].mxu1 %vm737_vm2, %v1172_v3 }
 0x458   : > { %1881 = vmatprep.mubr.msk.bf16.mxu1 %vm1970_vm0, %v1969_v1  ;;  %1874 = vmatpush3.bf16.msra.mxu1 %v1921_v41 }
 0x459   : > { %1875 = vmatprep.subr.bf16.mxu1 %v1969_v1 }
 0x45c   : > { %1876 = vmatpush3.bf16.msra.mxu1 %v1922_v42 }
 0x45d   : > { %1877 = vmatprep.subr.bf16.mxu1 %v1969_v1 }
 0x460   : > { %1878 = vmatpush3.bf16.msra.mxu1 %v1923_v53 }
 0x461   : > { %1879 = vmatprep.subr.bf16.mxu1 %v1969_v1  ;;  %v1734_v1 = vld [vmem:[%s2306_s13] ss:$0 sm:$0xff] }
 0x464   : > { %1880 = vmatpush3.bf16.msra.mxu1 %v1924_v54 }
 0x4b8   : > { %v1218_v8 = vpop.f32.mrb[20].mxu0 }
 0x4b9   : > { %v1845_v9 = vpop.f32.mrb[21].mxu0  ;;  %v1363_v13 = vsel %vm1362_vm7, %v1218_v8, 0.0 }
 0x4ba   : > { %v1221_v10 = vpop.f32.mrb[22].mxu0 }
 0x4bb   : > { %v1846_v11 = vpop.f32.mrb[23].mxu0 }
 0x522   : > { %v1264_v12 = vpop.f32.mrb[20].mxu1 }
 0x523   : > { %v1364_v14 = vsel %vm1362_vm7, %v1264_v12, 0.0  ;;  %v1851_v15 = vpop.f32.mrb[21].mxu1 }
 0x524   : > { %v1365_v16 = vadd.f32 %v1364_v14, %v1363_v13  ;;  %v1267_v17 = vpop.f32.mrb[22].mxu1 }
 0x525   : > { %v1852_v18 = vpop.f32.mrb[23].mxu1  ;;  %v1310_v19 = vpop.f32.mrb[24].mxu0  ;;  %v1735_v17 = vld [vmem:[%s2307_s14] ss:$0 sm:$0xff] }
 0x526   : > { %v1366_v20 = vsel %vm1362_vm7, %v1310_v19, 0.0  ;;  %v1857_v21 = vpop.f32.mrb[25].mxu0  ;;  %v1736_v19 = vld [vmem:[%s2308_s15] ss:$0 sm:$0xff] }
 0x527   : > { %v1367_v22 = vadd.f32 %v1366_v20, %v1365_v16  ;;  %v1313_v23 = vpop.f32.mrb[26].mxu0 }
 0x528   : > { %v1858_v24 = vpop.f32.mrb[27].mxu0 }
 0x52a   : > { %v1356_v25 = vpop.f32.mrb[24].mxu1 }
 0x52b   : > { %v1368_v27 = vsel %vm1362_vm7, %v1356_v25, 0.0  ;;  %v1863_v29 = vpop.f32.mrb[25].mxu1 }
 0x52c   : > { %v1369_v26 = vadd.f32 %v1368_v27, %v1367_v22  ;;  %v1359_v30 = vpop.f32.mrb[26].mxu1 }
 0x52d   : > { %v1864_v31 = vpop.f32.mrb[27].mxu1 }
 0x52e   : > { %v1377_v32 = vadd.f32 %v1722_v28, %v1369_v26 }
 0x530   : > { %v1378_v33 = vadd.f32 %v1377_v32, %v2105_v5  ;;  %v1920_v5 = vld [vmem:[%s2303_s10 + $0x8] sm:$0xff]  }
 0x531   : > { %1868 = vmatpush3.bf16.msra.mxu0 %v1920_v5 }
 0x532   : > { %v1381_v34 = vsel %vm1362_vm7, %v1378_v33, 0.0 }
 0x533   : > { %1382 = vadd.xlane.f32.xlu0 %v1381_v34 }
 0x5c0   : > { %v1383_v35 = vpop.xlane.xlu0 %1382 }
 0x5c1   : > { %v1385_v36 = vmul.f32 0.03125, %v1383_v35 }
 0x5c3   : > { %v1386_v37 = vsub.f32 %v1378_v33, %v1385_v36 }
 0x5c5   : > { %v1387_v38 = vmul.f32 %v1386_v37, %v1386_v37 }
 0x5c7   : > { %v1388_v39 = vsel %vm1362_vm7, %v1387_v38, 0.0 }
 0x5c8   : > { %1389 = vadd.xlane.f32.xlu1 %v1388_v39 }
 0x655   : > { %v1390_v43 = vpop.xlane.xlu1 %1389 }
 0x656   : > { %v1391_v44 = vmul.f32 0.03125, %v1390_v43 }
 0x658   : > { %v1392_v45 = vadd.f32 1e-05, %v1391_v44 }
 0x65a   : > { %1941 = vrsqrt.f32 %v1392_v45 }
 0x664   : > { %v1942_v46 = vpop.eup %1941 }
 0x665   : > { %v1394_v48 = vmul.f32 %v1942_v46, %v1386_v37 }
 0x667   : > { %v1401_v50 = vmul.f32 %v1723_v47, %v1394_v48 }
 0x669   : > { %v1408_v51 = vadd.f32 %v1724_v49, %v1401_v50 }
 0x66b   : > { %v1409_v52 = vpack.c.bf16 %v1408_v51, %v1408_v51 }
 0x66d   : > { %1870 = vmatmul.mubr.msk.bf16.vlgmr.msra.gmra.mrb[28].mxu0 %vm603_vm1, %v1409_v52 }
 0x740   : > { %v1470_v56 = vpop.f32.mrb[28].mxu0 }
 0x741   : > { %v1471_v57 = vadd.f32 %v1725_v55, %v1470_v56  ;;  %v1871_v58 = vpop.f32.mrb[29].mxu0 }
 0x742   : > { %v1473_v59 = vpop.f32.mrb[30].mxu0 }
 0x743   : > { %v1476_v60 = vmax.f32 %v1471_v57, 0.0  ;;  %v1872_v61 = vpop.f32.mrb[31].mxu0 }
 0x745   : > { %v1477_v62 = vpack.c.bf16 %v1476_v60, %v1476_v60 }
 0x747   : > { %1882 = vmatmul.mubr.msk.bf16.vlgmr.msra.gmra.mrb[28].mxu1 %vm1510_vm8, %v1477_v62 }
 0x81a   : > { %v1548_v63 = vpop.f32.mrb[28].mxu1 }
 0x81b   : > { %v1554_v0 = vadd.f32 %v1548_v63, %v1408_v51  ;;  %v1883_v2 = vpop.f32.mrb[29].mxu1 }
 0x81c   : > { %v1551_v3 = vpop.f32.mrb[30].mxu1 }
 0x81d   : > { %v1884_v4 = vpop.f32.mrb[31].mxu1  ;;  %v1562_v6 = vadd.f32 %v1734_v1, %v1554_v0 }
 0x81f   : > { %v1565_v7 = vsel %vm1362_vm7, %v1562_v6, 0.0 }
 0x820   : > { %1566 = vadd.xlane.f32.xlu0 %v1565_v7 }
 0x8ad   : > { %v1567_v8 = vpop.xlane.xlu0 %1566 }
 0x8ae   : > { %v1568_v9 = vmul.f32 0.03125, %v1567_v8 }
 0x8b0   : > { %v1569_v10 = vsub.f32 %v1562_v6, %v1568_v9 }
 0x8b2   : > { %v1570_v11 = vmul.f32 %v1569_v10, %v1569_v10 }
 0x8b4   : > { %v1571_v12 = vsel %vm1362_vm7, %v1570_v11, 0.0 }
 0x8b5   : > { %1572 = vadd.xlane.f32.xlu0 %v1571_v12 }
 0x942   : > { %v1573_v13 = vpop.xlane.xlu0 %1572 }
 0x943   : > { %v1574_v14 = vmul.f32 0.03125, %v1573_v13 }
 0x945   : > { %v1575_v15 = vadd.f32 1e-05, %v1574_v14 }
 0x947   : > { %1943 = vrsqrt.f32 %v1575_v15 }
 0x951   : > { %v1944_v16 = vpop.eup %1943 }
 0x952   : > { %v1577_v18 = vmul.f32 %v1944_v16, %v1569_v10 }
 0x954   : > { %v1584_v20 = vmul.f32 %v1735_v17, %v1577_v18 }
 0x956   : > { %v1591_v21 = vadd.f32 %v1736_v19, %v1584_v20 }
 0x958   : > { %1592 = vst.msk [vmem:[%s581_s21] sm:$0xf] %vm1362_vm7, %v1591_v21 }
 0x959 PF: > { %s26_s23 = sadd.s32 1, %s1967_s23   ;;  %s2312_s21 = smov %s1963_s22 }
 0x95a   : > { %p23_p5 = scmp.ge.s32.totalorder %s26_s23, 4   ;;  %s2313_s22 = smov %s2315_s24 }
 0x95c   :  { %25 = sbr.rel (!%p23_p5) target bundleno = 2 (0x2), region = 120 }

// kernel: detr_forward.6
= control target key start
LH: loop header
LB: loop body
LE: loop exit
PB: predicated region body
PF: predicated region fallthrough
CT: control target
= control target key end

     0   :  { %s3387_s29 = smov 0   ;;  %s3787_s0 = inlined_call_operand.vmem [shape: f32[2,8,32], index: 0, kind: input, shape index: {}, may-alias: {0,1}]   ;;  %s3788_s1 = inlined_call_operand.vmem [shape: f32[2,8,32], index: 1, kind: input, shape index: {}, may-alias: {0,1}]   ;;  %s3789_s2 = inlined_call_operand.vmem [shape: f32[2,4,32], index: 2, kind: input, shape index: {}]   ;;  %s3790_s3 = inlined_call_operand.vmem [shape: bf16[32,32], index: 3, kind: input, shape index: {}]   ;;  %s3791_s4 = inlined_call_operand.vmem [shape: f32[8,32], index: 4, kind: input, shape index: {}]   ;;  %s3792_s5 = inlined_call_operand.vmem [shape: bf16[32,64], index: 5, kind: input, shape index: {}]   ;;  %s3793_s6 = inlined_call_operand.vmem [shape: f32[8,64], index: 6, kind: input, shape index: {}]   ;;  %s3794_s7 = inlined_call_operand.vmem [shape: bf16[4,8,32], index: 7, kind: input, shape index: {}]   ;;  %s3795_s8 = inlined_call_operand.vmem [shape: f32[1,32], index: 8, kind: input, shape index: {}]   ;;  %s3796_s9 = inlined_call_operand.vmem [shape: f32[1,32], index: 9, kind: input, shape index: {}]   ;;  %s3797_s10 = inlined_call_operand.vmem [shape: f32[1,32], index: 10, kind: input, shape index: {}]   ;;  %s3798_s11 = inlined_call_operand.vmem [shape: bf16[32,32], index: 11, kind: input, shape index: {}]   ;;  %s3799_s12 = inlined_call_operand.vmem [shape: f32[8,32], index: 12, kind: input, shape index: {}]   ;;  %s3800_s13 = inlined_call_operand.vmem [shape: bf16[32,64], index: 13, kind: input, shape index: {}]   ;;  %s3801_s14 = inlined_call_operand.vmem [shape: f32[4,64], index: 14, kind: input, shape index: {}]   ;;  %s3802_s15 = inlined_call_operand.vmem [shape: bf16[4,8,32], index: 15, kind: input, shape index: {}]   ;;  %s3803_s16 = inlined_call_operand.vmem [shape: f32[1,32], index: 16, kind: input, shape index: {}]   ;;  %s3804_s17 = inlined_call_operand.vmem [shape: f32[1,32], index: 17, kind: input, shape index: {}]   ;;  %s3805_s18 = inlined_call_operand.vmem [shape: f32[1,32], index: 18, kind: input, shape index: {}]   ;;  %s3806_s19 = inlined_call_operand.vmem [shape: bf16[32,64], index: 19, kind: input, shape index: {}]   ;;  %s3807_s20 = inlined_call_operand.vmem [shape: f32[1,64], index: 20, kind: input, shape index: {}]   ;;  %s3808_s21 = inlined_call_operand.vmem [shape: bf16[64,32], index: 21, kind: input, shape index: {}]   ;;  %s3809_s22 = inlined_call_operand.vmem [shape: f32[1,32], index: 22, kind: input, shape index: {}]   ;;  %s3810_s23 = inlined_call_operand.vmem [shape: f32[1,32], index: 23, kind: input, shape index: {}]   ;;  %s3811_s24 = inlined_call_operand.vmem [shape: f32[1,32], index: 24, kind: input, shape index: {}]   ;;  %s3812_s25 = inlined_call_operand.vmem [shape: f32[2,8,32], index: 25, kind: output, shape index: {}]  }
   0x1   :  { %3826 = sst [smem:[#allocation2_spill]] %s3787_s0 }
   0x2   :  { %3827 = sst [smem:[#allocation3_spill]] %s3788_s1 }
   0x3   :  { %3828 = sst [smem:[#allocation4_spill]] %s3789_s2  ;;  %s3389_s2 = smov 0  }
   0x4   :  { %3829 = sst [smem:[#allocation5_spill]] %s3790_s3 }
   0x5   :  { %3830 = sst [smem:[#allocation6_spill]] %s3791_s4 }
   0x6   :  { %3831 = sst [smem:[#allocation7_spill]] %s3792_s5 }
   0x7   :  { %3832 = sst [smem:[#allocation8_spill]] %s3793_s6  ;;  %s3391_s6 = smov 0  }
   0x8   :  { %3833 = sst [smem:[#allocation9_spill]] %s3794_s7 }
   0x9   :  { %3834 = sst [smem:[#allocation10_spill]] %s3795_s8 }
   0xa   :  { %3835 = sst [smem:[#allocation11_spill]] %s3796_s9 }
   0xb LB: > { %s47_s30 = sadd.s32 1, %s3245_s2  ;;  %p2820_p0 = scmp.ge.s32.totalorder %s3249_s6, 1  ;;  %s3249_s6 = sphi %s3391_s6, %s35_s6   ;;  %s3245_s2 = sphi %s3389_s2, %s3851_s2   ;;  %s3241_s29 = sphi %s3387_s29, %s3850_s29  }
   0xc   : > { %p49_p1 = scmp.ge.s32.totalorder %s47_s30, 2  ;;  %p741_p2 = scmp.lt.s32.totalorder %s3249_s6, 3 }
   0xe   : > { %s3853_s30 = smov (%p49_p1, %s47_s30), 0  ;;  %p742_p3 = pnand %p2820_p0, %p741_p2 }
   0xf   : > { %s3836_s26 = sld [smem:[#allocation5_spill]] (!%p742_p3)  ;;  %v3251_v1 = vmov (!%p742_p3), 0.0   ;;  %s3837_s27 = sld [smem:[#allocation7_spill]] (!%p742_p3)  ;;  %vm3252_vm0 = vmmov (!%p742_p3), 0   ;;  %vm881_vm1 = vcmask (!%p742_p3), 261120   ;;  %vm1015_vm2 = vcmask (!%p742_p3), 64512  }
  0x10   : > { %745 = sbr.rel (%p742_p3) target bundleno = 4020 (0xfb4), region = 120  ;;  %2949 = vmatprep.subr.bf16.mxu0 (!%p742_p3), %v3251_v1  ;;  %2957 = vmatprep.subr.bf16.mxu1 (!%p742_p3), %v3251_v1  ;;  %p829_p4 = scmp.lt.s32.totalorder (!%p742_p3), %s3241_s29, 1  ;;  %vm1254_vm3 = vcmask (!%p742_p3), 1043456   ;;  %vm2018_vm4 = vcmask (!%p742_p3), 31744   ;;  %vm2073_vm5 = vcmask (!%p742_p3), 1041408   ;;  %vm2602_vm6 = vcmask (!%p742_p3), 523264  }
  0x11   : > { %2953 = vmatprep.mubr.msk.bf16.mxu0 (!%p742_p3), %vm3252_vm0, %v3251_v1  ;;  %2961 = vmatprep.mubr.msk.bf16.mxu1 (!%p742_p3), %vm3252_vm0, %v3251_v1  ;;  %s3838_s1 = sld [smem:[#allocation2_spill]] (!%p742_p3)  ;;  %s3839_s9 = sld [smem:[#allocation3_spill]] (!%p742_p3) }
  0x12   : > { %s3841_s28 = sld [smem:[#allocation8_spill]] (!%p742_p3)  ;;  %s3818_s7 = smov (!%p742_p3), 104  }
  0x13   : > { %s3816_s3 = smov (!%p742_p3), 96   ;;  %s3842_s4 = sld [smem:[#allocation9_spill]] (!%p742_p3) }
  0x15   : > { %v3175_v0 = vld [vmem:[%s3836_s26] sm:$0xff] (!%p742_p3)   ;;  %v3177_v3 = vld [vmem:[%s3836_s26 + $0x8] sm:$0xff] (!%p742_p3)  }
  0x16   : > { %v3176_v2 = vld [vmem:[%s3837_s27] sm:$0xff] (!%p742_p3)   ;;  %2950 = vmatpush3.bf16.msra.mxu0 (!%p742_p3), %v3175_v0  ;;  %v3178_v4 = vld [vmem:[%s3837_s27 + $0x8] sm:$0xff] (!%p742_p3)  }
  0x17   : > { %2958 = vmatpush3.bf16.msra.mxu1 %v3176_v2  ;;  %2951 = vmatprep.subr.bf16.mxu0 %v3251_v1  ;;  %s3855_s29 = smov (!%p829_p4, %s3241_s29), 1 }
  0x18   : > { %2959 = vmatprep.subr.bf16.mxu1 %v3251_v1  ;;  %s3428_s0 = sshll.u32 %s3855_s29, 3  ;;  %v930_v10 = vld [vmem:[%s3841_s28] sm:$0xff]  ;;  %s3843_s28 = sld [smem:[#allocation10_spill]] }
  0x19   : > { %s835_s8 = scalar_lea.vmem %s3838_s1, %s3428_s0  ;;  %s839_s5 = scalar_lea.vmem %s3839_s9, %s3428_s0 }
  0x1a   : > { %2952 = vmatpush3.bf16.msra.mxu0 %v3177_v3  ;;  %v3435_v5 = vld [vmem:[%s835_s8] sm:$0xff]  ;;  %s3840_s1 = sld [smem:[#allocation6_spill]]  ;;  %s3820_s9 = smov 120  }
  0x1b   : > { %2960 = vmatpush3.bf16.msra.mxu1 %v3178_v4  ;;  %2965 = vmatprep.subr.bf16.mxu0 %v3251_v1  ;;  %v863_v6 = vpack.c.bf16 %v3435_v5, %v3435_v5  ;;  %v861_v7 = vld [vmem:[%s839_s5] sm:$0xff]  ;;  %s3822_s5 = smov 112  }
  0x1c   : > { %2971 = vmatprep.subr.bf16.mxu1 %v3251_v1  ;;  %v925_v8 = vpack.c.bf16 %v861_v7, %v861_v7 }
  0x1d   : > { %2954 = vmatmul.mubr.msk.bf16.vlgmr.msra.gmra.mrb[0].mxu0 %vm881_vm1, %v863_v6 }
  0x1e   : > { %2962 = vmatmul.mubr.msk.bf16.vlgmr.msra.gmra.mrb[0].mxu1 %vm881_vm1, %v925_v8  ;;  %2967 = vmatprep.mubr.msk.bf16.mxu0 %vm3252_vm0, %v3251_v1 }
  0x1f   : > { %2973 = vmatprep.mubr.msk.bf16.mxu1 %vm3252_vm0, %v3251_v1 }
  0x20   : > { %v868_v9 = vld [vmem:[%s3840_s1] sm:$0xff] }
  0xf0   : > { %v919_v11 = vpop.f32.mrb[0].mxu0 }
  0xf1   : > { %v920_v12 = vadd.f32 %v919_v11, %v868_v9  ;;  %v980_v13 = vpop.f32.mrb[0].mxu1  ;;  %v2955_v14 = vpop.f32.mrb[1].mxu0 }
  0xf2   : > { %v981_v15 = vadd.f32 %v980_v13, %v930_v10  ;;  %v2963_v16 = vpop.f32.mrb[1].mxu1  ;;  %v922_v17 = vpop.f32.mrb[2].mxu0 }
  0xf3   : > { %v986_v18 = vmul.f32 0.35355338, %v920_v12  ;;  %v983_v19 = vpop.f32.mrb[2].mxu1  ;;  %v2956_v20 = vpop.f32.mrb[3].mxu0 }
  0xf4   : > { %1002 = vrot.lane.b32.xlu0 %v981_v15, %s3820_s9  ;;  %v2964_v21 = vpop.f32.mrb[3].mxu1  ;;  %v3457_v22 = vpack.c.bf16 %v981_v15, %v981_v15 }
  0xf5   : > { %988 = vrot.lane.b32.xlu1 %v986_v18, %s3820_s9  ;;  %v997_v24 = vpack.c.bf16 %v986_v18, %v986_v18  ;;  %s3848_s9 = smov 104  }
  0xf6   : > { %v1020_v23 = vsel %vm1015_vm2, %v3457_v22, 0 }
  0xf7   : > { %2966 = vmatpush3.bf16.xpose.msra.mxu0 %v1020_v23 }
  0xf8   : > { %1005 = vrot.lane.b32.xlu0 %v981_v15, %s3822_s5  ;;  %2977 = vmatprep.subr.bf16.mxu0 %v3251_v1 }
  0xf9   : > { %1008 = vrot.lane.b32.xlu1 %v981_v15, %s3818_s7 }
  0xfc   : > { %991 = vrot.lane.b32.xlu0 %v986_v18, %s3822_s5 }
  0xfd   : > { %994 = vrot.lane.b32.xlu1 %v986_v18, %s3818_s7  ;;  %s2823_s7 = sshll.u32 %s3855_s29, 2  ;;  %s3847_s29 = smov 120  }
  0xfe   : > { %2968 = vmatmul.mubr.msk.bf16.vlgmr.msra.gmra.mrb[4].mxu0 %vm1015_vm2, %v997_v24 }
  0xff   : > { %2979 = vmatprep.mubr.msk.bf16.mxu0 %vm3252_vm0, %v3251_v1 }
 0x166   : > { %v1003_v25 = vpop.permute.xlu0 %1002 }
 0x167   : > { %v3470_v26 = vpack.c.bf16 %v1003_v25, %v1003_v25  ;;  %v989_v27 = vpop.permute.xlu1 %988 }
 0x168   : > { %v998_v34 = vpack.c.bf16 %v989_v27, %v989_v27 }
 0x169   : > { %v1066_v28 = vsel %vm1015_vm2, %v3470_v26, 0 }
 0x16a   : > { %2972 = vmatpush3.bf16.xpose.msra.mxu1 %v1066_v28  ;;  %v1006_v29 = vpop.permute.xlu0 %1005 }
 0x16b   : > { %v3474_v30 = vpack.c.bf16 %v1006_v29, %v1006_v29  ;;  %v1009_v31 = vpop.permute.xlu1 %1008  ;;  %2983 = vmatprep.subr.bf16.mxu1 %v3251_v1 }
 0x16c   : > { %v3479_v33 = vpack.c.bf16 %v1009_v31, %v1009_v31 }
 0x16d   : > { %v1112_v32 = vsel %vm1015_vm2, %v3474_v30, 0 }
 0x16e   : > { %2978 = vmatpush3.bf16.xpose.msra.mxu0 %v1112_v32  ;;  %v992_v35 = vpop.permute.xlu0 %991  ;;  %v1158_v36 = vsel %vm1015_vm2, %v3479_v33, 0 }
 0x16f   : > { %2989 = vmatprep.subr.bf16.mxu0 %v3251_v1  ;;  %v999_v37 = vpack.c.bf16 %v992_v35, %v992_v35  ;;  %v995_v38 = vpop.permute.xlu1 %994 }
 0x170   : > { %v1000_v39 = vpack.c.bf16 %v995_v38, %v995_v38 }
 0x171   : > { %2974 = vmatmul.mubr.msk.bf16.vlgmr.msra.gmra.mrb[4].mxu1 %vm1015_vm2, %v998_v34 }
 0x172   : > { %2984 = vmatpush3.bf16.xpose.msra.mxu1 %v1158_v36  ;;  %2985 = vmatprep.mubr.msk.bf16.mxu1 %vm3252_vm0, %v3251_v1  ;;  %v1449_v36 = vld [vmem:[%s3842_s4] sm:$0xf] }
 0x173   : > { %2995 = vmatprep.subr.bf16.mxu1 %v3251_v1 }
 0x175   : > { %2980 = vmatmul.mubr.msk.bf16.vlgmr.msra.gmra.mrb[8].mxu0 %vm1015_vm2, %v999_v37 }
 0x176   : > { %2991 = vmatprep.mubr.msk.bf16.mxu0 %vm3252_vm0, %v3251_v1 }
 0x179   : > { %2986 = vmatmul.mubr.msk.bf16.vlgmr.msra.gmra.mrb[8].mxu1 %vm1015_vm2, %v1000_v39 }
 0x17a   : > { %2997 = vmatprep.mubr.msk.bf16.mxu1 %vm3252_vm0, %v3251_v1 }
 0x1d1   : > { %v1056_v40 = vpop.f32.mrb[4].mxu0 }
 0x1d2   : > { %v2969_v41 = vpop.f32.mrb[5].mxu0  ;;  %v1200_v42 = vsel %vm1015_vm2, %v1056_v40, -inf }
 0x1d3   : > { %1201 = vmax.xlane.f32.xlu0 %v1200_v42  ;;  %v1059_v43 = vpop.f32.mrb[6].mxu0 }
 0x1d4   : > { %v2970_v44 = vpop.f32.mrb[7].mxu0 }
 0x1d5   : > { %v1450_v44 = vld [vmem:[%s3842_s4 + $0x4] sm:$0xf] }
 0x244   : > { %v1102_v45 = vpop.f32.mrb[4].mxu1 }
 0x245   : > { %v2975_v46 = vpop.f32.mrb[5].mxu1  ;;  %v1203_v47 = vsel %vm1015_vm2, %v1102_v45, -inf }
 0x246   : > { %1204 = vmax.xlane.f32.xlu1 %v1203_v47  ;;  %v1105_v48 = vpop.f32.mrb[6].mxu1  ;;  %v1451_v46 = vld [vmem:[%s3842_s4 + $0x8] sm:$0xf] }
 0x247   : > { %v2976_v49 = vpop.f32.mrb[7].mxu1 }
 0x248   : > { %v1148_v50 = vpop.f32.mrb[8].mxu0 }
 0x249   : > { %v2981_v51 = vpop.f32.mrb[9].mxu0  ;;  %v1206_v52 = vsel %vm1015_vm2, %v1148_v50, -inf }
 0x24a   : > { %1207 = vmax.xlane.f32.xlu0 %v1206_v52  ;;  %v1151_v53 = vpop.f32.mrb[10].mxu0 }
 0x24b   : > { %v2982_v54 = vpop.f32.mrb[11].mxu0  ;;  %v1452_v53 = vld [vmem:[%s3842_s4 + $0xc] sm:$0xf]  ;;  %s3844_s4 = sld [smem:[#allocation4_spill]] }
 0x24c   : > { %v1194_v55 = vpop.f32.mrb[8].mxu1 }
 0x24d   : > { %v2987_v56 = vpop.f32.mrb[9].mxu1  ;;  %v1209_v57 = vsel %vm1015_vm2, %v1194_v55, -inf }
 0x24e   : > { %v1197_v58 = vpop.f32.mrb[10].mxu1  ;;  %1210 = vmax.xlane.f32.xlu0 %v1209_v57  ;;  %v1595_v57 = vsel %vm1254_vm3, %v1452_v53, 0 }
 0x24f   : > { %v2988_v59 = vpop.f32.mrb[11].mxu1 }
 0x251   : > { %s843_s26 = scalar_lea.vmem %s3844_s4, %s2823_s7  ;;  %s3845_s7 = sld [smem:[#allocation11_spill]] }
 0x257   : > { %1249 = vrot.lane.b32.xlu1 %v3457_v22, %s3816_s3 }
 0x260   : > { %v1202_v60 = vpop.xlane.xlu0 %1201 }
 0x261   : > { %v1212_v61 = vsub.f32 %v1056_v40, %v1202_v60  ;;  %v1457_v40 = vsel %vm1254_vm3, %v1449_v36, 0 }
 0x263   : > { %v1216_v62 = vmul.f32 1.442695, %v1212_v61 }
 0x265   : > { %3189 = vpow2.f32 %v1216_v62 }
 0x26f   : > { %v3190_v63 = vpop.eup %3189 }
 0x270   : > { %v1224_v0 = vsel %vm1015_vm2, %v3190_v63, 0.0 }
 0x27b   : > { %1225 = vadd.xlane.f32.xlu1 %v1224_v0 }
 0x2d3   : > { %v1205_v2 = vpop.xlane.xlu1 %1204 }
 0x2d4   : > { %v1213_v3 = vsub.f32 %v1102_v45, %v1205_v2  ;;  %v1503_v45 = vsel %vm1254_vm3, %v1450_v44, 0  ;;  %v3182_v44 = vld [vmem:[%s3798_s11 + $0x8] sm:$0xff]  }
 0x2d6   : > { %v1218_v4 = vmul.f32 1.442695, %v1213_v3 }
 0x2d7   : > { %v1250_v6 = vpop.permute.xlu1 %1249  ;;  %v1208_v7 = vpop.xlane.xlu0 %1207 }
 0x2d8   : > { %3191 = vpow2.f32 %v1218_v4  ;;  %v1256_v8 = vsel %vm1254_vm3, %v1250_v6, 0  ;;  %v1214_v9 = vsub.f32 %v1148_v50, %v1208_v7  ;;  %v1549_v50 = vsel %vm1254_vm3, %v1451_v46, 0 }
 0x2d9   : > { %2990 = vmatpush3.bf16.msra.mxu0 %v1256_v8 }
 0x2da   : > { %v1220_v10 = vmul.f32 1.442695, %v1214_v9  ;;  %3001 = vmatprep.subr.bf16.mxu0 %v3251_v1 }
 0x2db   : > { %v1211_v11 = vpop.xlane.xlu0 %1210 }
 0x2dc   : > { %3193 = vpow2.f32 %v1220_v10  ;;  %v1215_v12 = vsub.f32 %v1194_v55, %v1211_v11 }
 0x2de   : > { %v1222_v13 = vmul.f32 1.442695, %v1215_v12 }
 0x2e0   : > { %3195 = vpow2.f32 %v1222_v13 }
 0x2e2   : > { %v3192_v14 = vpop.eup %3191 }
 0x2e3   : > { %v1227_v15 = vsel %vm1015_vm2, %v3192_v14, 0.0 }
 0x2e4   : > { %1228 = vadd.xlane.f32.xlu0 %v1227_v15 }
 0x2e6   : > { %v3194_v16 = vpop.eup %3193 }
 0x2e7   : > { %v1230_v17 = vsel %vm1015_vm2, %v3194_v16, 0.0 }
 0x2e8   : > { %1231 = vadd.xlane.f32.xlu1 %v1230_v17 }
 0x2ea   : > { %v3196_v18 = vpop.eup %3195 }
 0x2eb   : > { %v1233_v19 = vsel %vm1015_vm2, %v3196_v18, 0.0 }
 0x2ec   : > { %1234 = vadd.xlane.f32.xlu0 %v1233_v19 }
 0x2f9   : > { %1348 = vrot.lane.b32.xlu1 %v3474_v30, %s3816_s3 }
 0x2fd   : > { %1397 = vrot.lane.b32.xlu1 %v3479_v33, %s3816_s3 }
 0x302   : > { %1299 = vrot.lane.b32.xlu0 %v3470_v26, %s3816_s3  ;;  %s3846_s3 = smov 112  }
 0x308   : > { %v1226_v20 = vpop.xlane.xlu1 %1225 }
 0x309   : > { %3197 = vrcp.f32 %v1226_v20 }
 0x313   : > { %v3198_v21 = vpop.eup %3197 }
 0x314   : > { %v1240_v22 = vmul.f32 %v3198_v21, %v3190_v63 }
 0x316   : > { %v1244_v23 = vpack.c.bf16 %v1240_v22, %v1240_v22 }
 0x318   : > { %2992 = vmatmul.mubr.msk.bf16.vlgmr.msra.gmra.mrb[12].mxu0 %vm1015_vm2, %v1244_v23 }
 0x319   : > { %3003 = vmatprep.mubr.msk.bf16.mxu0 %vm3252_vm0, %v3251_v1 }
 0x371   : > { %v1229_v24 = vpop.xlane.xlu0 %1228 }
 0x372   : > { %3199 = vrcp.f32 %v1229_v24 }
 0x375   : > { %v1232_v25 = vpop.xlane.xlu1 %1231 }
 0x376   : > { %3201 = vrcp.f32 %v1232_v25 }
 0x379   : > { %v1349_v27 = vpop.permute.xlu1 %1348  ;;  %v1235_v28 = vpop.xlane.xlu0 %1234 }
 0x37a   : > { %v1354_v29 = vsel %vm1254_vm3, %v1349_v27, 0  ;;  %3203 = vrcp.f32 %v1235_v28  ;;  %v2843_v28 = vld [vmem:[%s3843_s28] ss:$0 sm:$0xff] }
 0x37b   : > { %3002 = vmatpush3.bf16.msra.mxu0 %v1354_v29 }
 0x37c   : > { %v3200_v26 = vpop.eup %3199  ;;  %3013 = vmatprep.subr.bf16.mxu0 %v3251_v1 }
 0x37d   : > { %v1241_v30 = vmul.f32 %v3200_v26, %v3192_v14  ;;  %v1300_v31 = vpop.permute.xlu0 %1299  ;;  %v1398_v33 = vpop.permute.xlu1 %1397 }
 0x37e   : > { %v1305_v32 = vsel %vm1254_vm3, %v1300_v31, 0  ;;  %v1403_v38 = vsel %vm1254_vm3, %v1398_v33, 0 }
 0x37f   : > { %2996 = vmatpush3.bf16.msra.mxu1 %v1305_v32  ;;  %v1245_v34 = vpack.c.bf16 %v1241_v30, %v1241_v30 }
 0x380   : > { %v3202_v35 = vpop.eup %3201  ;;  %3007 = vmatprep.subr.bf16.mxu1 %v3251_v1 }
 0x381   : > { %v1242_v37 = vmul.f32 %v3202_v35, %v3194_v16 }
 0x382   : > { %2998 = vmatmul.mubr.msk.bf16.vlgmr.msra.gmra.mrb[12].mxu1 %vm1015_vm2, %v1245_v34 }
 0x383   : > { %3008 = vmatpush3.bf16.msra.mxu1 %v1403_v38  ;;  %v1246_v39 = vpack.c.bf16 %v1242_v37, %v1242_v37  ;;  %3009 = vmatprep.mubr.msk.bf16.mxu1 %vm3252_vm0, %v3251_v1 }
 0x384   : > { %v3204_v41 = vpop.eup %3203  ;;  %3019 = vmatprep.subr.bf16.mxu1 %v3251_v1 }
 0x385   : > { %v1243_v42 = vmul.f32 %v3204_v41, %v3196_v18  ;;  %3004 = vmatmul.mubr.msk.bf16.vlgmr.msra.gmra.mrb[16].mxu0 %vm1015_vm2, %v1246_v39  ;;  %v862_v41 = vld [vmem:[%s843_s26] sm:$0xf] }
 0x386   : > { %3014 = vmatpush3.bf16.msra.mxu0 %v1457_v40  ;;  %3015 = vmatprep.mubr.msk.bf16.mxu0 %vm3252_vm0, %v3251_v1  ;;  %v3179_v40 = vld [vmem:[%s3800_s13] sm:$0xff]  }
 0x387   : > { %v1247_v43 = vpack.c.bf16 %v1243_v42, %v1243_v42  ;;  %3025 = vmatprep.subr.bf16.mxu0 %v3251_v1  ;;  %v1744_v42 = vpack.c.bf16 %v862_v41, %v862_v41 }
 0x38a   : > { %3010 = vmatmul.mubr.msk.bf16.vlgmr.msra.gmra.mrb[16].mxu1 %vm1015_vm2, %v1247_v43  ;;  %v3181_v43 = vld [vmem:[%s3798_s11] sm:$0xff]  }
 0x38b   : > { %3021 = vmatprep.mubr.msk.bf16.mxu1 %vm3252_vm0, %v3251_v1  ;;  %3020 = vmatpush3.bf16.msra.mxu1 %v1503_v45 }
 0x38c   : > { %3031 = vmatprep.subr.bf16.mxu1 %v3251_v1 }
 0x3eb   : > { %v1292_v47 = vpop.f32.mrb[12].mxu0 }
 0x3ec   : > { %v1445_v48 = vpack.c.bf16 %v1292_v47, %v1292_v47  ;;  %v2993_v49 = vpop.f32.mrb[13].mxu0 }
 0x3ed   : > { %v1295_v51 = vpop.f32.mrb[14].mxu0  ;;  %v2844_v49 = vld [vmem:[%s3845_s7] ss:$0 sm:$0xff]  ;;  %s3849_s7 = smov 96  }
 0x3ee   : > { %v2994_v52 = vpop.f32.mrb[15].mxu0  ;;  %3016 = vmatmul.mubr.msk.bf16.vlgmr.msra.gmra.mrb[20].mxu0 %vm1015_vm2, %v1445_v48  ;;  %v2845_v51 = vld [vmem:[%s3797_s10] ss:$0 sm:$0xff] }
 0x3ef   : > { %3026 = vmatpush3.bf16.msra.mxu0 %v1549_v50  ;;  %3027 = vmatprep.mubr.msk.bf16.mxu0 %vm3252_vm0, %v3251_v1 }
 0x3f0   : > { %3037 = vmatprep.subr.bf16.mxu0 %v3251_v1 }
 0x455   : > { %v1341_v54 = vpop.f32.mrb[12].mxu1 }
 0x456   : > { %v1446_v55 = vpack.c.bf16 %v1341_v54, %v1341_v54  ;;  %v2999_v56 = vpop.f32.mrb[13].mxu1 }
 0x457   : > { %v1344_v58 = vpop.f32.mrb[14].mxu1 }
 0x458   : > { %v3000_v59 = vpop.f32.mrb[15].mxu1  ;;  %v1390_v60 = vpop.f32.mrb[16].mxu0  ;;  %3022 = vmatmul.mubr.msk.bf16.vlgmr.msra.gmra.mrb[20].mxu1 %vm1015_vm2, %v1446_v55  ;;  %v1749_v55 = vld [vmem:[%s3801_s14] sm:$0xf] }
 0x459   : > { %v1447_v61 = vpack.c.bf16 %v1390_v60, %v1390_v60  ;;  %v3005_v62 = vpop.f32.mrb[17].mxu0  ;;  %3032 = vmatpush3.bf16.msra.mxu1 %v1595_v57  ;;  %3033 = vmatprep.mubr.msk.bf16.mxu1 %vm3252_vm0, %v3251_v1 }
 0x45a   : > { %v1393_v63 = vpop.f32.mrb[18].mxu0  ;;  %3045 = vmatprep.subr.bf16.mxu1 %v3251_v1 }
 0x45b   : > { %v3006_v0 = vpop.f32.mrb[19].mxu0  ;;  %3028 = vmatmul.mubr.msk.bf16.vlgmr.msra.gmra.mrb[24].mxu0 %vm1015_vm2, %v1447_v61 }
 0x45c   : > { %3041 = vmatprep.mubr.msk.bf16.mxu0 %vm3252_vm0, %v3251_v1  ;;  %3038 = vmatpush3.bf16.msra.mxu0 %v3181_v43 }
 0x45d   : > { %v1439_v2 = vpop.f32.mrb[16].mxu1  ;;  %3039 = vmatprep.subr.bf16.mxu0 %v3251_v1 }
 0x45e   : > { %v1448_v3 = vpack.c.bf16 %v1439_v2, %v1439_v2  ;;  %v3011_v4 = vpop.f32.mrb[17].mxu1 }
 0x45f   : > { %v1442_v6 = vpop.f32.mrb[18].mxu1 }
 0x460   : > { %v3012_v7 = vpop.f32.mrb[19].mxu1  ;;  %3034 = vmatmul.mubr.msk.bf16.vlgmr.msra.gmra.mrb[24].mxu1 %vm1015_vm2, %v1448_v3  ;;  %3040 = vmatpush3.bf16.msra.mxu0 %v3182_v44  ;;  %v1688_v3 = vld [vmem:[%s3799_s12] sm:$0xff] }
 0x461   : > { %3049 = vmatprep.mubr.msk.bf16.mxu1 %vm3252_vm0, %v3251_v1  ;;  %3046 = vmatpush3.bf16.msra.mxu1 %v3179_v40 }
 0x462   : > { %3047 = vmatprep.subr.bf16.mxu1 %v3251_v1  ;;  %3053 = vmatprep.subr.bf16.mxu0 %v3251_v1 }
 0x4c1   : > { %v1493_v8 = vpop.f32.mrb[20].mxu0 }
 0x4c2   : > { %v3017_v9 = vpop.f32.mrb[21].mxu0  ;;  %v1637_v13 = vsel %vm881_vm1, %v1493_v8, 0.0 }
 0x4c3   : > { %v1496_v10 = vpop.f32.mrb[22].mxu0 }
 0x4c4   : > { %v3018_v11 = vpop.f32.mrb[23].mxu0 }
 0x52b   : > { %v1539_v12 = vpop.f32.mrb[20].mxu1 }
 0x52c   : > { %v1638_v14 = vsel %vm881_vm1, %v1539_v12, 0.0  ;;  %v3023_v15 = vpop.f32.mrb[21].mxu1 }
 0x52d   : > { %v1639_v16 = vadd.f32 %v1638_v14, %v1637_v13  ;;  %v1542_v17 = vpop.f32.mrb[22].mxu1 }
 0x52e   : > { %v3024_v18 = vpop.f32.mrb[23].mxu1  ;;  %v1585_v19 = vpop.f32.mrb[24].mxu0 }
 0x52f   : > { %v1640_v20 = vsel %vm881_vm1, %v1585_v19, 0.0  ;;  %v3029_v21 = vpop.f32.mrb[25].mxu0 }
 0x530   : > { %v1641_v22 = vadd.f32 %v1640_v20, %v1639_v16  ;;  %v1588_v23 = vpop.f32.mrb[26].mxu0 }
 0x531   : > { %v3030_v24 = vpop.f32.mrb[27].mxu0 }
 0x533   : > { %v1631_v25 = vpop.f32.mrb[24].mxu1 }
 0x534   : > { %v1642_v27 = vsel %vm881_vm1, %v1631_v25, 0.0  ;;  %v3035_v29 = vpop.f32.mrb[25].mxu1 }
 0x535   : > { %v1643_v26 = vadd.f32 %v1642_v27, %v1641_v22  ;;  %v1634_v30 = vpop.f32.mrb[26].mxu1 }
 0x536   : > { %v3036_v31 = vpop.f32.mrb[27].mxu1 }
 0x537   : > { %v1651_v32 = vadd.f32 %v2843_v28, %v1643_v26 }
 0x539   : > { %v1652_v33 = vadd.f32 %v1651_v32, %v3435_v5  ;;  %v3180_v5 = vld [vmem:[%s3800_s13 + $0x8] sm:$0xff]  }
 0x53a   : > { %3048 = vmatpush3.bf16.msra.mxu1 %v3180_v5 }
 0x53b   : > { %v1655_v34 = vsel %vm881_vm1, %v1652_v33, 0.0  ;;  %3059 = vmatprep.subr.bf16.mxu1 %v3251_v1 }
 0x53c   : > { %1656 = vadd.xlane.f32.xlu0 %v1655_v34 }
 0x53d   : > { %3050 = vmatmul.mubr.msk.bf16.vlgmr.msra.gmra.mrb[28].mxu1 %vm881_vm1, %v1744_v42 }
 0x53e   : > { %3061 = vmatprep.mubr.msk.bf16.mxu1 %vm3252_vm0, %v3251_v1 }
 0x5c9   : > { %v1657_v35 = vpop.xlane.xlu0 %1656 }
 0x5ca   : > { %v1659_v36 = vmul.f32 0.03125, %v1657_v35 }
 0x5cc   : > { %v1660_v37 = vsub.f32 %v1652_v33, %v1659_v36 }
 0x5ce   : > { %v1661_v38 = vmul.f32 %v1660_v37, %v1660_v37 }
 0x5d0   : > { %v1662_v39 = vsel %vm881_vm1, %v1661_v38, 0.0 }
 0x5d1   : > { %1663 = vadd.xlane.f32.xlu1 %v1662_v39 }
 0x610   : > { %v1799_v56 = vpop.f32.mrb[28].mxu1 }
 0x611   : > { %v1800_v57 = vadd.f32 %v1799_v56, %v1749_v55  ;;  %v3051_v58 = vpop.f32.mrb[29].mxu1 }
 0x612   : > { %v1802_v59 = vpop.f32.mrb[30].mxu1 }
 0x613   : > { %1824 = vrot.lane.b32.xlu1 %v1800_v57, %s3846_s3  ;;  %v3052_v60 = vpop.f32.mrb[31].mxu1  ;;  %1821 = vrot.lane.b32.xlu0 %v1800_v57, %s3847_s29  ;;  %v3614_v61 = vpack.c.bf16 %v1800_v57, %v1800_v57 }
 0x615   : > { %v1838_v62 = vsel %vm1015_vm2, %v3614_v61, 0 }
 0x617   : > { %1827 = vrot.lane.b32.xlu1 %v1800_v57, %s3848_s9 }
 0x65e   : > { %v1664_v45 = vpop.xlane.xlu1 %1663 }
 0x65f   : > { %v1665_v46 = vmul.f32 0.03125, %v1664_v45 }
 0x661   : > { %v1666_v47 = vadd.f32 1e-05, %v1665_v46 }
 0x663   : > { %3205 = vrsqrt.f32 %v1666_v47 }
 0x66d   : > { %v3206_v48 = vpop.eup %3205 }
 0x66e   : > { %v1668_v50 = vmul.f32 %v3206_v48, %v1660_v37 }
 0x670   : > { %v1675_v52 = vmul.f32 %v2844_v49, %v1668_v50 }
 0x672   : > { %v3601_v53 = vadd.f32 %v2845_v51, %v1675_v52 }
 0x674   : > { %v1683_v54 = vpack.c.bf16 %v3601_v53, %v3601_v53 }
 0x676   : > { %3042 = vmatmul.mubr.msk.bf16.vlgmr.msra.gmra.mrb[28].mxu0 %vm881_vm1, %v1683_v54 }
 0x677   : > { %3055 = vmatprep.mubr.msk.bf16.mxu0 %vm3252_vm0, %v3251_v1  ;;  %3054 = vmatpush3.bf16.xpose.msra.mxu0 %v1838_v62 }
 0x678   : > { %3065 = vmatprep.subr.bf16.mxu0 %v3251_v1 }
 0x685   : > { %v1822_v63 = vpop.permute.xlu0 %1821  ;;  %v1825_v6 = vpop.permute.xlu1 %1824 }
 0x686   : > { %v3619_v0 = vpack.c.bf16 %v1822_v63, %v1822_v63  ;;  %v3627_v9 = vpack.c.bf16 %v1825_v6, %v1825_v6 }
 0x688   : > { %v1884_v2 = vsel %vm1015_vm2, %v3619_v0, 0  ;;  %v1930_v14 = vsel %vm1015_vm2, %v3627_v9, 0 }
 0x689   : > { %3060 = vmatpush3.bf16.xpose.msra.mxu1 %v1884_v2  ;;  %v1828_v15 = vpop.permute.xlu1 %1827 }
 0x68a   : > { %3071 = vmatprep.subr.bf16.mxu1 %v3251_v1  ;;  %v3638_v16 = vpack.c.bf16 %v1828_v15, %v1828_v15 }
 0x68c   : > { %v1976_v19 = vsel %vm1015_vm2, %v3638_v16, 0 }
 0x749   : > { %v1738_v4 = vpop.f32.mrb[28].mxu0 }
 0x74a   : > { %v1739_v7 = vadd.f32 %v1738_v4, %v1688_v3  ;;  %v3043_v8 = vpop.f32.mrb[29].mxu0 }
 0x74b   : > { %v1741_v10 = vpop.f32.mrb[30].mxu0 }
 0x74c   : > { %v1805_v11 = vmul.f32 0.35355338, %v1739_v7  ;;  %v3044_v12 = vpop.f32.mrb[31].mxu0 }
 0x74e   : > { %v1816_v13 = vpack.c.bf16 %v1805_v11, %v1805_v11  ;;  %1813 = vrot.lane.b32.xlu1 %v1805_v11, %s3848_s9  ;;  %1807 = vrot.lane.b32.xlu0 %v1805_v11, %s3847_s29  ;;  %s858_s9 = scalar_lea.vmem %s3812_s25, %s3428_s0 }
 0x750   : > { %3056 = vmatmul.mubr.msk.bf16.vlgmr.msra.gmra.mrb[32].mxu0 %vm1015_vm2, %v1816_v13 }
 0x751   : > { %3066 = vmatpush3.bf16.xpose.msra.mxu0 %v1930_v14  ;;  %3067 = vmatprep.mubr.msk.bf16.mxu0 %vm3252_vm0, %v3251_v1 }
 0x752   : > { %1810 = vrot.lane.b32.xlu0 %v1805_v11, %s3846_s3  ;;  %3077 = vmatprep.subr.bf16.mxu0 %v3251_v1 }
 0x7c0   : > { %v1808_v17 = vpop.permute.xlu0 %1807  ;;  %v1814_v22 = vpop.permute.xlu1 %1813 }
 0x7c1   : > { %v1817_v18 = vpack.c.bf16 %v1808_v17, %v1808_v17  ;;  %v1819_v23 = vpack.c.bf16 %v1814_v22, %v1814_v22 }
 0x7c3   : > { %3062 = vmatmul.mubr.msk.bf16.vlgmr.msra.gmra.mrb[32].mxu1 %vm1015_vm2, %v1817_v18 }
 0x7c4   : > { %3072 = vmatpush3.bf16.xpose.msra.mxu1 %v1976_v19  ;;  %v1811_v20 = vpop.permute.xlu0 %1810  ;;  %3073 = vmatprep.mubr.msk.bf16.mxu1 %vm3252_vm0, %v3251_v1 }
 0x7c5   : > { %v1818_v21 = vpack.c.bf16 %v1811_v20, %v1811_v20  ;;  %3083 = vmatprep.subr.bf16.mxu1 %v3251_v1  ;;  %v2268_v20 = vld [vmem:[%s3802_s15] sm:$0xf] }
 0x7c7   : > { %3068 = vmatmul.mubr.msk.bf16.vlgmr.msra.gmra.mrb[36].mxu0 %vm1015_vm2, %v1818_v21 }
 0x7c8   : > { %3079 = vmatprep.mubr.msk.bf16.mxu0 %vm3252_vm0, %v3251_v1 }
 0x7cb   : > { %3074 = vmatmul.mubr.msk.bf16.vlgmr.msra.gmra.mrb[36].mxu1 %vm1015_vm2, %v1819_v23 }
 0x7cc   : > { %3085 = vmatprep.mubr.msk.bf16.mxu1 %vm3252_vm0, %v3251_v1 }
 0x823   : > { %v1874_v24 = vpop.f32.mrb[32].mxu0 }
 0x824   : > { %v3057_v25 = vpop.f32.mrb[33].mxu0  ;;  %v2019_v27 = vsel %vm2018_vm4, %v1874_v24, -inf }
 0x825   : > { %2020 = vmax.xlane.f32.xlu0 %v2019_v27  ;;  %v1877_v28 = vpop.f32.mrb[34].mxu0 }
 0x826   : > { %v3058_v29 = vpop.f32.mrb[35].mxu0 }
 0x827   : > { %v2269_v29 = vld [vmem:[%s3802_s15 + $0x4] sm:$0xf] }
 0x896   : > { %v1920_v26 = vpop.f32.mrb[32].mxu1 }
 0x897   : > { %v3063_v30 = vpop.f32.mrb[33].mxu1  ;;  %v2022_v31 = vsel %vm2018_vm4, %v1920_v26, -inf }
 0x898   : > { %2023 = vmax.xlane.f32.xlu1 %v2022_v31  ;;  %v1923_v32 = vpop.f32.mrb[34].mxu1  ;;  %v2270_v30 = vld [vmem:[%s3802_s15 + $0x8] sm:$0xf] }
 0x899   : > { %v3064_v33 = vpop.f32.mrb[35].mxu1 }
 0x89a   : > { %v1966_v34 = vpop.f32.mrb[36].mxu0 }
 0x89b   : > { %v3069_v35 = vpop.f32.mrb[37].mxu0  ;;  %v2025_v36 = vsel %vm2018_vm4, %v1966_v34, -inf }
 0x89c   : > { %2026 = vmax.xlane.f32.xlu0 %v2025_v36  ;;  %v1969_v37 = vpop.f32.mrb[38].mxu0 }
 0x89d   : > { %v3070_v38 = vpop.f32.mrb[39].mxu0  ;;  %v2271_v37 = vld [vmem:[%s3802_s15 + $0xc] sm:$0xf] }
 0x89e   : > { %v2012_v39 = vpop.f32.mrb[36].mxu1 }
 0x89f   : > { %v3075_v40 = vpop.f32.mrb[37].mxu1  ;;  %v2028_v5 = vsel %vm2018_vm4, %v2012_v39, -inf }
 0x8a0   : > { %v2015_v41 = vpop.f32.mrb[38].mxu1  ;;  %2029 = vmax.xlane.f32.xlu0 %v2028_v5  ;;  %v2414_v5 = vsel %vm1254_vm3, %v2271_v37, 0  ;;  %v3187_v37 = vld [vmem:[%s3808_s21 + $0x10] sm:$0xff]  }
 0x8a1   : > { %v3076_v42 = vpop.f32.mrb[39].mxu1 }
 0x8a9   : > { %2068 = vrot.lane.b32.xlu1 %v3614_v61, %s3849_s7 }
 0x8b2   : > { %v2021_v43 = vpop.xlane.xlu0 %2020 }
 0x8b3   : > { %v2031_v44 = vsub.f32 %v1874_v24, %v2021_v43  ;;  %v2276_v24 = vsel %vm1254_vm3, %v2268_v20, 0 }
 0x8b5   : > { %v2035_v45 = vmul.f32 1.442695, %v2031_v44 }
 0x8b7   : > { %3207 = vpow2.f32 %v2035_v45 }
 0x8c1   : > { %v3208_v46 = vpop.eup %3207 }
 0x8c2   : > { %v2043_v47 = vsel %vm2018_vm4, %v3208_v46, 0.0 }
 0x8cd   : > { %2044 = vadd.xlane.f32.xlu1 %v2043_v47 }
 0x925   : > { %v2024_v48 = vpop.xlane.xlu1 %2023 }
 0x926   : > { %v2032_v49 = vsub.f32 %v1920_v26, %v2024_v48  ;;  %v2322_v26 = vsel %vm1254_vm3, %v2269_v29, 0 }
 0x928   : > { %v2037_v50 = vmul.f32 1.442695, %v2032_v49 }
 0x929   : > { %v2069_v51 = vpop.permute.xlu1 %2068  ;;  %v2027_v52 = vpop.xlane.xlu0 %2026 }
 0x92a   : > { %3209 = vpow2.f32 %v2037_v50  ;;  %v2075_v54 = vsel %vm2073_vm5, %v2069_v51, 0  ;;  %v2033_v55 = vsub.f32 %v1966_v34, %v2027_v52  ;;  %v2368_v34 = vsel %vm1254_vm3, %v2270_v30, 0 }
 0x92b   : > { %3078 = vmatpush3.bf16.msra.mxu0 %v2075_v54 }
 0x92c   : > { %v2039_v56 = vmul.f32 1.442695, %v2033_v55  ;;  %3089 = vmatprep.subr.bf16.mxu0 %v3251_v1 }
 0x92d   : > { %v2030_v57 = vpop.xlane.xlu0 %2029 }
 0x92e   : > { %3211 = vpow2.f32 %v2039_v56  ;;  %v2034_v58 = vsub.f32 %v2012_v39, %v2030_v57 }
 0x930   : > { %v2041_v59 = vmul.f32 1.442695, %v2034_v58 }
 0x932   : > { %3213 = vpow2.f32 %v2041_v59 }
 0x934   : > { %v3210_v60 = vpop.eup %3209 }
 0x935   : > { %v2046_v61 = vsel %vm2018_vm4, %v3210_v60, 0.0 }
 0x936   : > { %2047 = vadd.xlane.f32.xlu0 %v2046_v61 }
 0x938   : > { %v3212_v62 = vpop.eup %3211 }
 0x939   : > { %v2049_v63 = vsel %vm2018_vm4, %v3212_v62, 0.0 }
 0x93a   : > { %2050 = vadd.xlane.f32.xlu1 %v2049_v63 }
 0x93c   : > { %v3214_v2 = vpop.eup %3213 }
 0x93d   : > { %v2052_v3 = vsel %vm2018_vm4, %v3214_v2, 0.0 }
 0x93e   : > { %2053 = vadd.xlane.f32.xlu0 %v2052_v3 }
 0x94b   : > { %2167 = vrot.lane.b32.xlu1 %v3627_v9, %s3849_s7 }
 0x94f   : > { %2216 = vrot.lane.b32.xlu1 %v3638_v16, %s3849_s7 }
 0x954   : > { %2118 = vrot.lane.b32.xlu0 %v3619_v0, %s3849_s7 }
 0x95a   : > { %v2045_v4 = vpop.xlane.xlu1 %2044 }
 0x95b   : > { %3215 = vrcp.f32 %v2045_v4 }
 0x965   : > { %v3216_v6 = vpop.eup %3215 }
 0x966   : > { %v2059_v7 = vmul.f32 %v3216_v6, %v3208_v46 }
 0x968   : > { %v2063_v8 = vpack.c.bf16 %v2059_v7, %v2059_v7 }
 0x96a   : > { %3080 = vmatmul.mubr.msk.bf16.vlgmr.msra.gmra.mrb[40].mxu0 %vm2018_vm4, %v2063_v8 }
 0x96b   : > { %3091 = vmatprep.mubr.msk.bf16.mxu0 %vm3252_vm0, %v3251_v1 }
 0x9c3   : > { %v2048_v10 = vpop.xlane.xlu0 %2047 }
 0x9c4   : > { %3217 = vrcp.f32 %v2048_v10 }
 0x9c7   : > { %v2051_v11 = vpop.xlane.xlu1 %2050 }
 0x9c8   : > { %3219 = vrcp.f32 %v2051_v11 }
 0x9cb   : > { %v2168_v9 = vpop.permute.xlu1 %2167  ;;  %v2054_v12 = vpop.xlane.xlu0 %2053 }
 0x9cc   : > { %v2173_v13 = vsel %vm2073_vm5, %v2168_v9, 0  ;;  %3221 = vrcp.f32 %v2054_v12  ;;  %v2864_v12 = vld [vmem:[%s3803_s16] ss:$0 sm:$0xff] }
 0x9cd   : > { %3090 = vmatpush3.bf16.msra.mxu0 %v2173_v13 }
 0x9ce   : > { %v3218_v0 = vpop.eup %3217  ;;  %3101 = vmatprep.subr.bf16.mxu0 %v3251_v1 }
 0x9cf   : > { %v2060_v14 = vmul.f32 %v3218_v0, %v3210_v60  ;;  %v2119_v15 = vpop.permute.xlu0 %2118  ;;  %v2217_v17 = vpop.permute.xlu1 %2216 }
 0x9d0   : > { %v2124_v16 = vsel %vm2073_vm5, %v2119_v15, 0  ;;  %v2222_v22 = vsel %vm2073_vm5, %v2217_v17, 0 }
 0x9d1   : > { %3084 = vmatpush3.bf16.msra.mxu1 %v2124_v16  ;;  %v2064_v18 = vpack.c.bf16 %v2060_v14, %v2060_v14 }
 0x9d2   : > { %v3220_v19 = vpop.eup %3219  ;;  %3095 = vmatprep.subr.bf16.mxu1 %v3251_v1 }
 0x9d3   : > { %v2061_v21 = vmul.f32 %v3220_v19, %v3212_v62 }
 0x9d4   : > { %3086 = vmatmul.mubr.msk.bf16.vlgmr.msra.gmra.mrb[40].mxu1 %vm2018_vm4, %v2064_v18 }
 0x9d5   : > { %3096 = vmatpush3.bf16.msra.mxu1 %v2222_v22  ;;  %v2065_v23 = vpack.c.bf16 %v2061_v21, %v2061_v21  ;;  %3097 = vmatprep.mubr.msk.bf16.mxu1 %vm3252_vm0, %v3251_v1 }
 0x9d6   : > { %v3222_v25 = vpop.eup %3221  ;;  %3107 = vmatprep.subr.bf16.mxu1 %v3251_v1 }
 0x9d7   : > { %v2062_v27 = vmul.f32 %v3222_v25, %v3214_v2  ;;  %3092 = vmatmul.mubr.msk.bf16.vlgmr.msra.gmra.mrb[44].mxu0 %vm2018_vm4, %v2065_v23  ;;  %v3184_v25 = vld [vmem:[%s3806_s19 + $0x8] sm:$0xff]  }
 0x9d8   : > { %3102 = vmatpush3.bf16.msra.mxu0 %v2276_v24  ;;  %3103 = vmatprep.mubr.msk.bf16.mxu0 %vm3252_vm0, %v3251_v1  ;;  %v3183_v24 = vld [vmem:[%s3806_s19] sm:$0xff]  }
 0x9d9   : > { %v2066_v28 = vpack.c.bf16 %v2062_v27, %v2062_v27  ;;  %3113 = vmatprep.subr.bf16.mxu0 %v3251_v1  ;;  %v3186_v27 = vld [vmem:[%s3808_s21 + $0x8] sm:$0xff]  }
 0x9dc   : > { %3098 = vmatmul.mubr.msk.bf16.vlgmr.msra.gmra.mrb[44].mxu1 %vm2018_vm4, %v2066_v28 }
 0x9dd   : > { %3109 = vmatprep.mubr.msk.bf16.mxu1 %vm3252_vm0, %v3251_v1  ;;  %3108 = vmatpush3.bf16.msra.mxu1 %v2322_v26 }
 0x9de   : > { %3119 = vmatprep.subr.bf16.mxu1 %v3251_v1 }
 0xa3d   : > { %v2111_v31 = vpop.f32.mrb[40].mxu0 }
 0xa3e   : > { %v2264_v32 = vpack.c.bf16 %v2111_v31, %v2111_v31  ;;  %v3081_v33 = vpop.f32.mrb[41].mxu0  ;;  %v2865_v31 = vld [vmem:[%s3804_s17] ss:$0 sm:$0xff] }
 0xa3f   : > { %v2114_v35 = vpop.f32.mrb[42].mxu0  ;;  %v2866_v33 = vld [vmem:[%s3805_s18] ss:$0 sm:$0xff] }
 0xa40   : > { %v3082_v36 = vpop.f32.mrb[43].mxu0  ;;  %3104 = vmatmul.mubr.msk.bf16.vlgmr.msra.gmra.mrb[48].mxu0 %vm1015_vm2, %v2264_v32 }
 0xa41   : > { %3114 = vmatpush3.bf16.msra.mxu0 %v2368_v34  ;;  %3115 = vmatprep.mubr.msk.bf16.mxu0 %vm3252_vm0, %v3251_v1 }
 0xa42   : > { %3125 = vmatprep.subr.bf16.mxu0 %v3251_v1 }
 0xaa7   : > { %v2160_v38 = vpop.f32.mrb[40].mxu1 }
 0xaa8   : > { %v2265_v39 = vpack.c.bf16 %v2160_v38, %v2160_v38  ;;  %v3087_v40 = vpop.f32.mrb[41].mxu1  ;;  %v3188_v38 = vld [vmem:[%s3808_s21 + $0x18] sm:$0xff]  }
 0xaa9   : > { %v2163_v41 = vpop.f32.mrb[42].mxu1 }
 0xaaa   : > { %v3088_v42 = vpop.f32.mrb[43].mxu1  ;;  %v2209_v43 = vpop.f32.mrb[44].mxu0  ;;  %3110 = vmatmul.mubr.msk.bf16.vlgmr.msra.gmra.mrb[48].mxu1 %vm1015_vm2, %v2265_v39  ;;  %v2867_v39 = vld [vmem:[%s3807_s20] ss:$0 sm:$0xff] }
 0xaab   : > { %v2266_v44 = vpack.c.bf16 %v2209_v43, %v2209_v43  ;;  %v3093_v45 = vpop.f32.mrb[45].mxu0  ;;  %3120 = vmatpush3.bf16.msra.mxu1 %v2414_v5  ;;  %3121 = vmatprep.mubr.msk.bf16.mxu1 %vm3252_vm0, %v3251_v1 }
 0xaac   : > { %v2212_v46 = vpop.f32.mrb[46].mxu0  ;;  %3133 = vmatprep.subr.bf16.mxu1 %v3251_v1 }
 0xaad   : > { %v3094_v47 = vpop.f32.mrb[47].mxu0  ;;  %3116 = vmatmul.mubr.msk.bf16.vlgmr.msra.gmra.mrb[52].mxu0 %vm1015_vm2, %v2266_v44 }
 0xaae   : > { %3129 = vmatprep.mubr.msk.bf16.mxu0 %vm3252_vm0, %v3251_v1  ;;  %3126 = vmatpush3.bf16.msra.mxu0 %v3183_v24 }
 0xaaf   : > { %v2258_v48 = vpop.f32.mrb[44].mxu1  ;;  %3127 = vmatprep.subr.bf16.mxu0 %v3251_v1 }
 0xab0   : > { %v2267_v49 = vpack.c.bf16 %v2258_v48, %v2258_v48  ;;  %v3099_v50 = vpop.f32.mrb[45].mxu1 }
 0xab1   : > { %v2261_v51 = vpop.f32.mrb[46].mxu1 }
 0xab2   : > { %v3100_v52 = vpop.f32.mrb[47].mxu1  ;;  %3122 = vmatmul.mubr.msk.bf16.vlgmr.msra.gmra.mrb[52].mxu1 %vm1015_vm2, %v2267_v49  ;;  %3128 = vmatpush3.bf16.msra.mxu0 %v3184_v25 }
 0xab3   : > { %3141 = vmatprep.mubr.msk.bf16.mxu1 %vm3252_vm0, %v3251_v1 }
 0xb13   : > { %v2312_v54 = vpop.f32.mrb[48].mxu0 }
 0xb14   : > { %v3105_v55 = vpop.f32.mrb[49].mxu0  ;;  %v2456_v59 = vsel %vm881_vm1, %v2312_v54, 0.0 }
 0xb15   : > { %v2315_v56 = vpop.f32.mrb[50].mxu0 }
 0xb16   : > { %v3106_v57 = vpop.f32.mrb[51].mxu0 }
 0xb7d   : > { %v2358_v58 = vpop.f32.mrb[48].mxu1 }
 0xb7e   : > { %v2457_v60 = vsel %vm881_vm1, %v2358_v58, 0.0  ;;  %v3111_v61 = vpop.f32.mrb[49].mxu1 }
 0xb7f   : > { %v2458_v62 = vadd.f32 %v2457_v60, %v2456_v59  ;;  %v2361_v63 = vpop.f32.mrb[50].mxu1 }
 0xb80   : > { %v3112_v2 = vpop.f32.mrb[51].mxu1  ;;  %v2404_v3 = vpop.f32.mrb[52].mxu0  ;;  %v2877_v63 = vld [vmem:[%s3810_s23] ss:$0 sm:$0xff] }
 0xb81   : > { %v2459_v4 = vsel %vm881_vm1, %v2404_v3, 0.0  ;;  %v3117_v6 = vpop.f32.mrb[53].mxu0  ;;  %v2878_v3 = vld [vmem:[%s3811_s24] ss:$0 sm:$0xff] }
 0xb82   : > { %v2460_v7 = vadd.f32 %v2459_v4, %v2458_v62  ;;  %v2407_v8 = vpop.f32.mrb[54].mxu0 }
 0xb83   : > { %v3118_v10 = vpop.f32.mrb[55].mxu0 }
 0xb85   : > { %v2450_v11 = vpop.f32.mrb[52].mxu1 }
 0xb86   : > { %v2461_v9 = vsel %vm881_vm1, %v2450_v11, 0.0  ;;  %v3123_v13 = vpop.f32.mrb[53].mxu1 }
 0xb87   : > { %v2462_v0 = vadd.f32 %v2461_v9, %v2460_v7  ;;  %v2453_v14 = vpop.f32.mrb[54].mxu1 }
 0xb88   : > { %v3124_v15 = vpop.f32.mrb[55].mxu1 }
 0xb89   : > { %v2470_v16 = vadd.f32 %v2864_v12, %v2462_v0 }
 0xb8b   : > { %v2471_v17 = vadd.f32 %v2470_v16, %v3601_v53  ;;  %v3185_v53 = vld [vmem:[%s3808_s21] sm:$0xff]  }
 0xb8c   : > { %3134 = vmatpush3.bf16.msra.mxu1 %v3185_v53 }
 0xb8d   : > { %v2474_v18 = vsel %vm881_vm1, %v2471_v17, 0.0  ;;  %3135 = vmatprep.subr.bf16.mxu1 %v3251_v1 }
 0xb8e   : > { %2475 = vadd.xlane.f32.xlu0 %v2474_v18 }
 0xb90   : > { %3136 = vmatpush3.bf16.msra.mxu1 %v3186_v27 }
 0xb91   : > { %3137 = vmatprep.subr.bf16.mxu1 %v3251_v1 }
 0xb94   : > { %3138 = vmatpush3.bf16.msra.mxu1 %v3187_v37 }
 0xb95   : > { %3139 = vmatprep.subr.bf16.mxu1 %v3251_v1  ;;  %v2876_v1 = vld [vmem:[%s3809_s22] ss:$0 sm:$0xff] }
 0xb98   : > { %3140 = vmatpush3.bf16.msra.mxu1 %v3188_v38 }
 0xc1b   : > { %v2476_v19 = vpop.xlane.xlu0 %2475 }
 0xc1c   : > { %v2477_v20 = vmul.f32 0.03125, %v2476_v19 }
 0xc1e   : > { %v2478_v21 = vsub.f32 %v2471_v17, %v2477_v20 }
 0xc20   : > { %v2479_v22 = vmul.f32 %v2478_v21, %v2478_v21 }
 0xc22   : > { %v2480_v23 = vsel %vm881_vm1, %v2479_v22, 0.0 }
 0xc23   : > { %2481 = vadd.xlane.f32.xlu1 %v2480_v23 }
 0xcb0   : > { %v2482_v28 = vpop.xlane.xlu1 %2481 }
 0xcb1   : > { %v2483_v29 = vmul.f32 0.03125, %v2482_v28 }
 0xcb3   : > { %v2484_v26 = vadd.f32 1e-05, %v2483_v29 }
 0xcb5   : > { %3223 = vrsqrt.f32 %v2484_v26 }
 0xcbf   : > { %v3224_v30 = vpop.eup %3223 }
 0xcc0   : > { %v2486_v32 = vmul.f32 %v3224_v30, %v2478_v21 }
 0xcc2   : > { %v2493_v34 = vmul.f32 %v2865_v31, %v2486_v32 }
 0xcc4   : > { %v2500_v35 = vadd.f32 %v2866_v33, %v2493_v34 }
 0xcc6   : > { %v2501_v36 = vpack.c.bf16 %v2500_v35, %v2500_v35 }
 0xcc8   : > { %3130 = vmatmul.mubr.msk.bf16.vlgmr.msra.gmra.mrb[56].mxu0 %vm881_vm1, %v2501_v36 }
 0xd9b   : > { %v2562_v40 = vpop.f32.mrb[56].mxu0 }
 0xd9c   : > { %v2563_v5 = vadd.f32 %v2867_v39, %v2562_v40  ;;  %v3131_v41 = vpop.f32.mrb[57].mxu0 }
 0xd9d   : > { %v2565_v42 = vpop.f32.mrb[58].mxu0 }
 0xd9e   : > { %v2568_v43 = vmax.f32 %v2563_v5, 0.0  ;;  %v3132_v44 = vpop.f32.mrb[59].mxu0 }
 0xda0   : > { %v2569_v45 = vpack.c.bf16 %v2568_v43, %v2568_v43 }
 0xda2   : > { %3142 = vmatmul.mubr.msk.bf16.vlgmr.msra.gmra.mrb[56].mxu1 %vm2602_vm6, %v2569_v45 }
 0xe75   : > { %v2640_v46 = vpop.f32.mrb[56].mxu1 }
 0xe76   : > { %v2646_v47 = vadd.f32 %v2640_v46, %v2500_v35  ;;  %v3143_v48 = vpop.f32.mrb[57].mxu1 }
 0xe77   : > { %v2643_v49 = vpop.f32.mrb[58].mxu1 }
 0xe78   : > { %v3144_v50 = vpop.f32.mrb[59].mxu1  ;;  %v2654_v51 = vadd.f32 %v2876_v1, %v2646_v47 }
 0xe7a   : > { %v2657_v52 = vsel %vm881_vm1, %v2654_v51, 0.0 }
 0xe7b   : > { %2658 = vadd.xlane.f32.xlu0 %v2657_v52 }
 0xf08   : > { %v2659_v54 = vpop.xlane.xlu0 %2658 }
 0xf09   : > { %v2660_v55 = vmul.f32 0.03125, %v2659_v54 }
 0xf0b   : > { %v2661_v56 = vsub.f32 %v2654_v51, %v2660_v55 }
 0xf0d   : > { %v2662_v57 = vmul.f32 %v2661_v56, %v2661_v56 }
 0xf0f   : > { %v2663_v58 = vsel %vm881_vm1, %v2662_v57, 0.0 }
 0xf10   : > { %2664 = vadd.xlane.f32.xlu0 %v2663_v58 }
 0xf9d   : > { %v2665_v59 = vpop.xlane.xlu0 %2664 }
 0xf9e   : > { %v2666_v60 = vmul.f32 0.03125, %v2665_v59 }
 0xfa0   : > { %v2667_v61 = vadd.f32 1e-05, %v2666_v60 }
 0xfa2   : > { %3225 = vrsqrt.f32 %v2667_v61 }
 0xfac   : > { %v3226_v62 = vpop.eup %3225 }
 0xfad   : > { %v2669_v2 = vmul.f32 %v3226_v62, %v2661_v56 }
 0xfaf   : > { %v2676_v4 = vmul.f32 %v2877_v63, %v2669_v2 }
 0xfb1   : > { %v2683_v6 = vadd.f32 %v2878_v3, %v2676_v4 }
 0xfb3   : > { %2684 = vst.msk [vmem:[%s858_s9] sm:$0xff] %vm881_vm1, %v2683_v6 }
 0xfb4 PF: > { %s35_s6 = sadd.s32 1, %s3249_s6   ;;  %s3850_s29 = smov %s3245_s2 }
 0xfb5   : > { %p32_p5 = scmp.ge.s32.totalorder %s35_s6, 4   ;;  %s3851_s2 = smov %s3853_s30 }
 0xfb7   :  { %34 = sbr.rel (!%p32_p5) target bundleno = 11 (0xb), region = 162 }

</bundles_post_ra>
